<compile_context>
chip_gen: v5e
topology: v5e:2x2
jax: 0.10.0
libtpu: 0.0.40
codegen_flags: <defaults>
</compile_context>

<pallas_src>
import jax
import jax.numpy as jnp
from jax import lax
from jax.experimental import pallas as pl
from jax.experimental.pallas import tpu as pltpu


def fc3l_kernel(ids_ref, tab_ref, w1_ref, b1_ref, w2_ref, b2_ref, out_ref):
    # ids_ref: [TM, utt_len] int32 token ids for this batch tile
    # tab_ref: [V_pad, E]    embedding table (vocab zero-padded to 128)
    # w1_ref:  [utt_len*E, H_pad], b1_ref: [1, H_pad]   (translater, lane-padded)
    # w2_ref:  [H_pad, N_pad],     b2_ref: [1, N_pad]   (h_out,      lane-padded)
    # out_ref: [TM, N_pad]
    tm, utt_len = ids_ref.shape
    v_pad, emb = tab_ref.shape
    h_pad = w1_ref.shape[1]

    # dropout (eval identity) + tanh of the table; tanh commutes with the gather,
    # so this equals tanh(embedding(utts)).
    tab = jnp.tanh(tab_ref[...])                                    # [V_pad, E]

    iota_v = lax.broadcasted_iota(jnp.int32, (tm, v_pad), 1)        # hoisted

    acc = jnp.zeros((tm, h_pad), jnp.float32)
    for t in range(utt_len):  # static unroll: utt_len is small & compile-time
        ids_t = ids_ref[:, t:t + 1]                                 # [TM, 1]
        onehot = (iota_v == ids_t).astype(jnp.float32)              # [TM, V_pad]
        # gather -> tanh'd embedding of token at position t        # [TM, E]
        x_t = jnp.dot(onehot, tab,
                      preferred_element_type=jnp.float32,
                      precision=lax.Precision.HIGHEST)
        # partial first linear: x_t @ w1[t*E:(t+1)*E, :]            # [TM, H_pad]
        acc = acc + jnp.dot(x_t, w1_ref[t * emb:(t + 1) * emb, :],
                            preferred_element_type=jnp.float32,
                            precision=lax.Precision.HIGHEST)

    h = jnp.tanh(acc + b1_ref[...])                 # dropout identity + tanh
    out = jnp.dot(h, w2_ref[...],
                  preferred_element_type=jnp.float32,
                  precision=lax.Precision.HIGHEST) + b2_ref[...]
    out_ref[...] = out.astype(out_ref.dtype)


def _round_up(x, m):
    return ((x + m - 1) // m) * m


def fc3l_forward(utts, emb_table, w1, b1, w2, b2,
                 num_meaning_types, meanings_per_type, *, tm_max=256):
    """utts: int32 [utt_len, batch]. Returns float32 [batch, n_att, n_val]."""
    utt_len, batch = utts.shape
    vocab1, emb = emb_table.shape
    n_out = num_meaning_types * meanings_per_type

    lane = 128
    v_pad = _round_up(vocab1, lane)
    h_pad = _round_up(emb, lane)
    n_pad = _round_up(n_out, lane)

    # Lane-dense parameter padding (param-side; under jit with fixed params
    # these pads are constant-folded / hoisted out of the per-batch path).
    f32 = jnp.float32
    tab_p = jnp.zeros((v_pad, emb), f32).at[:vocab1, :].set(emb_table.astype(f32))
    w1_p = jnp.zeros((utt_len * emb, h_pad), f32).at[:, :emb].set(w1.astype(f32))
    b1_p = jnp.zeros((1, h_pad), f32).at[:, :emb].set(b1.reshape(1, emb).astype(f32))
    w2_p = jnp.zeros((h_pad, n_pad), f32).at[:emb, :n_out].set(w2.astype(f32))
    b2_p = jnp.zeros((1, n_pad), f32).at[:, :n_out].set(b2.reshape(1, n_out).astype(f32))

    # Batch tiling: TM rows per grid step, batch padded up to a whole tile.
    tm = min(tm_max, _round_up(batch, 8))
    b_pad = _round_up(batch, tm)
    ids = jnp.transpose(utts).astype(jnp.int32)              # [batch, utt_len]
    if b_pad != batch:
        ids = jnp.pad(ids, ((0, b_pad - batch), (0, 0)))     # pad rows w/ id 0
    grid_m = b_pad // tm

    cost = pl.CostEstimate(
        flops=2 * b_pad * (utt_len * (v_pad * emb + emb * h_pad) + h_pad * n_pad),
        transcendentals=b_pad * h_pad + grid_m * v_pad * emb,
        bytes_accessed=4 * (ids.size + tab_p.size + w1_p.size + b1_p.size
                            + w2_p.size + b2_p.size + b_pad * n_pad),
    )

    out_p = pl.pallas_call(
        fc3l_kernel,
        out_shape=jax.ShapeDtypeStruct((b_pad, n_pad), jnp.float32),
        grid=(grid_m,),
        in_specs=[
            pl.BlockSpec((tm, utt_len), lambda i: (i, 0)),            # ids tile
            pl.BlockSpec((v_pad, emb), lambda i: (0, 0)),             # table (resident)
            pl.BlockSpec((utt_len * emb, h_pad), lambda i: (0, 0)),   # w1 (resident)
            pl.BlockSpec((1, h_pad), lambda i: (0, 0)),               # b1
            pl.BlockSpec((h_pad, n_pad), lambda i: (0, 0)),           # w2 (resident)
            pl.BlockSpec((1, n_pad), lambda i: (0, 0)),               # b2
        ],
        out_specs=pl.BlockSpec((tm, n_pad), lambda i: (i, 0)),
        compiler_params=pltpu.CompilerParams(
            dimension_semantics=("parallel",)),
        cost_estimate=cost,
    )(ids, tab_p, w1_p, b1_p, w2_p, b2_p)

    out = out_p[:batch, :n_out]
    return out.reshape(batch, num_meaning_types, meanings_per_type)


if __name__ == "__main__":
    # Small shapes consistent with the module.
    embedding_size = 32
    vocab_size = 10
    utt_len = 8
    num_meaning_types = 4
    meanings_per_type = 8
    batch = 2

    key = jax.random.PRNGKey(0)
    k_emb, k_w1, k_b1, k_w2, k_b2, k_utt = jax.random.split(key, 6)

    # Deterministic parameter init (shapes follow the nn.Module definitions;
    # w1/w2 are the transposed Linear weights).
    emb_table = jax.random.normal(k_emb, (vocab_size + 1, embedding_size),
                                  dtype=jnp.float32) * 0.1
    w1 = jax.random.normal(k_w1, (utt_len * embedding_size, embedding_size),
                           dtype=jnp.float32) * 0.05
    b1 = jax.random.normal(k_b1, (1, embedding_size), dtype=jnp.float32) * 0.05
    w2 = jax.random.normal(k_w2, (embedding_size,
                                  num_meaning_types * meanings_per_type),
                           dtype=jnp.float32) * 0.05
    b2 = jax.random.normal(k_b2, (1, num_meaning_types * meanings_per_type),
                           dtype=jnp.float32) * 0.05

    # Input utterances: [utt_len, batch] int32 token ids in [0, vocab_size].
    utts = jax.random.randint(k_utt, (utt_len, batch), 0, vocab_size + 1,
                              dtype=jnp.int32)

    out = fc3l_forward(utts, emb_table, w1, b1, w2, b2,
                       num_meaning_types, meanings_per_type)
    jax.block_until_ready(out)

    # Pure-JAX reference (same math, no Pallas), at highest matmul precision.
    with jax.default_matmul_precision("highest"):
        embs = jnp.take(emb_table, utts, axis=0)          # [L, B, E]
        embs = jnp.tanh(embs)
        embs = jnp.transpose(embs, (1, 0, 2)).reshape(batch, -1)
        state = jnp.tanh(embs @ w1 + b1)
        ref = (state @ w2 + b2).reshape(batch, num_meaning_types,
                                        meanings_per_type)

    assert out.shape == (batch, num_meaning_types, meanings_per_type)
    assert jnp.allclose(out, ref, atol=1e-4, rtol=1e-4), (
        float(jnp.max(jnp.abs(out - ref))))

    print("KERNEL_OK")
</pallas_src>

<mosaic_0001>
module attributes {stable_mosaic.version = 11 : i64} {
  func.func @fc3l_kernel(%arg0: i32, %arg1: memref<8x8xi32, #tpu.memory_space<vmem>>, %arg2: memref<128x32xf32, #tpu.memory_space<vmem>>, %arg3: memref<256x128xf32, #tpu.memory_space<vmem>>, %arg4: memref<1x128xf32, #tpu.memory_space<vmem>>, %arg5: memref<128x128xf32, #tpu.memory_space<vmem>>, %arg6: memref<1x128xf32, #tpu.memory_space<vmem>>, %arg7: memref<8x128xf32, #tpu.memory_space<vmem>>) attributes {dimension_semantics = [#tpu.dimension_semantics<parallel>], iteration_bounds = array<i64: 1>, scalar_prefetch = 0 : i64, scratch_operands = 0 : i64, tpu.core_type = #tpu.core_type<tc>, window_params = [{transform_indices = @transform_0, window_bounds = array<i64: 8, 8>}, {pipeline_mode = #tpu.pipeline_mode<synchronous>, transform_indices = @transform_1, window_bounds = array<i64: 128, 32>}, {pipeline_mode = #tpu.pipeline_mode<synchronous>, transform_indices = @transform_2, window_bounds = array<i64: 256, 128>}, {pipeline_mode = #tpu.pipeline_mode<synchronous>, transform_indices = @transform_3, window_bounds = array<i64: 1, 128>}, {pipeline_mode = #tpu.pipeline_mode<synchronous>, transform_indices = @transform_4, window_bounds = array<i64: 128, 128>}, {pipeline_mode = #tpu.pipeline_mode<synchronous>, transform_indices = @transform_5, window_bounds = array<i64: 1, 128>}, {transform_indices = @transform_6, window_bounds = array<i64: 8, 128>}]} {
    %c0 = arith.constant 0 : index
    %c0_0 = arith.constant 0 : index
    %0 = vector.load %arg2[%c0, %c0_0] : memref<128x32xf32, #tpu.memory_space<vmem>>, vector<128x32xf32>
    %1 = math.tanh %0 : vector<128x32xf32>
    %2 = tpu.iota {dimensions = array<i32: 1>} : vector<8x128xi32>
    %cst = arith.constant 0.000000e+00 : f32
    %3 = vector.broadcast %cst : f32 to vector<8x128xf32>
    %c0_1 = arith.constant 0 : index
    %c0_2 = arith.constant 0 : index
    %4 = vector.load %arg1[%c0_1, %c0_2] : memref<8x8xi32, #tpu.memory_space<vmem>>, vector<8x1xi32>
    %5 = vector.broadcast %4 : vector<8x1xi32> to vector<8x128xi32>
    %6 = arith.cmpi eq, %2, %5 : vector<8x128xi32>
    %7 = arith.extui %6 : vector<8x128xi1> to vector<8x128xi32>
    %8 = arith.sitofp %7 : vector<8x128xi32> to vector<8x128xf32>
    %cst_3 = arith.constant dense<0.000000e+00> : vector<8x32xf32>
    %9 = tpu.matmul %8, %1, %cst_3 {dimension_numbers = #tpu.dot_dimension_numbers<[1], [0], [0], [1], [0, 0, 1, 1], [], []>, precision = #tpu.contract_precision<fp32>} : vector<8x128xf32>, vector<128x32xf32>, vector<8x32xf32> -> vector<8x32xf32>
    %c0_4 = arith.constant 0 : index
    %c0_5 = arith.constant 0 : index
    %10 = vector.load %arg3[%c0_4, %c0_5] : memref<256x128xf32, #tpu.memory_space<vmem>>, vector<32x128xf32>
    %cst_6 = arith.constant dense<0.000000e+00> : vector<8x128xf32>
    %11 = tpu.matmul %9, %10, %cst_6 {dimension_numbers = #tpu.dot_dimension_numbers<[1], [0], [0], [1], [0, 0, 1, 1], [], []>, precision = #tpu.contract_precision<fp32>} : vector<8x32xf32>, vector<32x128xf32>, vector<8x128xf32> -> vector<8x128xf32>
    %12 = arith.addf %3, %11 : vector<8x128xf32>
    %c0_7 = arith.constant 0 : index
    %c1 = arith.constant 1 : index
    %13 = vector.load %arg1[%c0_7, %c1] : memref<8x8xi32, #tpu.memory_space<vmem>>, vector<8x1xi32>
    %14 = vector.broadcast %13 : vector<8x1xi32> to vector<8x128xi32>
    %15 = arith.cmpi eq, %2, %14 : vector<8x128xi32>
    %16 = arith.extui %15 : vector<8x128xi1> to vector<8x128xi32>
    %17 = arith.sitofp %16 : vector<8x128xi32> to vector<8x128xf32>
    %cst_8 = arith.constant dense<0.000000e+00> : vector<8x32xf32>
    %18 = tpu.matmul %17, %1, %cst_8 {dimension_numbers = #tpu.dot_dimension_numbers<[1], [0], [0], [1], [0, 0, 1, 1], [], []>, precision = #tpu.contract_precision<fp32>} : vector<8x128xf32>, vector<128x32xf32>, vector<8x32xf32> -> vector<8x32xf32>
    %c32 = arith.constant 32 : index
    %c0_9 = arith.constant 0 : index
    %19 = vector.load %arg3[%c32, %c0_9] : memref<256x128xf32, #tpu.memory_space<vmem>>, vector<32x128xf32>
    %cst_10 = arith.constant dense<0.000000e+00> : vector<8x128xf32>
    %20 = tpu.matmul %18, %19, %cst_10 {dimension_numbers = #tpu.dot_dimension_numbers<[1], [0], [0], [1], [0, 0, 1, 1], [], []>, precision = #tpu.contract_precision<fp32>} : vector<8x32xf32>, vector<32x128xf32>, vector<8x128xf32> -> vector<8x128xf32>
    %21 = arith.addf %12, %20 : vector<8x128xf32>
    %c0_11 = arith.constant 0 : index
    %c2 = arith.constant 2 : index
    %22 = vector.load %arg1[%c0_11, %c2] : memref<8x8xi32, #tpu.memory_space<vmem>>, vector<8x1xi32>
    %23 = vector.broadcast %22 : vector<8x1xi32> to vector<8x128xi32>
    %24 = arith.cmpi eq, %2, %23 : vector<8x128xi32>
    %25 = arith.extui %24 : vector<8x128xi1> to vector<8x128xi32>
    %26 = arith.sitofp %25 : vector<8x128xi32> to vector<8x128xf32>
    %cst_12 = arith.constant dense<0.000000e+00> : vector<8x32xf32>
    %27 = tpu.matmul %26, %1, %cst_12 {dimension_numbers = #tpu.dot_dimension_numbers<[1], [0], [0], [1], [0, 0, 1, 1], [], []>, precision = #tpu.contract_precision<fp32>} : vector<8x128xf32>, vector<128x32xf32>, vector<8x32xf32> -> vector<8x32xf32>
    %c64 = arith.constant 64 : index
    %c0_13 = arith.constant 0 : index
    %28 = vector.load %arg3[%c64, %c0_13] : memref<256x128xf32, #tpu.memory_space<vmem>>, vector<32x128xf32>
    %cst_14 = arith.constant dense<0.000000e+00> : vector<8x128xf32>
    %29 = tpu.matmul %27, %28, %cst_14 {dimension_numbers = #tpu.dot_dimension_numbers<[1], [0], [0], [1], [0, 0, 1, 1], [], []>, precision = #tpu.contract_precision<fp32>} : vector<8x32xf32>, vector<32x128xf32>, vector<8x128xf32> -> vector<8x128xf32>
    %30 = arith.addf %21, %29 : vector<8x128xf32>
    %c0_15 = arith.constant 0 : index
    %c3 = arith.constant 3 : index
    %31 = vector.load %arg1[%c0_15, %c3] : memref<8x8xi32, #tpu.memory_space<vmem>>, vector<8x1xi32>
    %32 = vector.broadcast %31 : vector<8x1xi32> to vector<8x128xi32>
    %33 = arith.cmpi eq, %2, %32 : vector<8x128xi32>
    %34 = arith.extui %33 : vector<8x128xi1> to vector<8x128xi32>
    %35 = arith.sitofp %34 : vector<8x128xi32> to vector<8x128xf32>
    %cst_16 = arith.constant dense<0.000000e+00> : vector<8x32xf32>
    %36 = tpu.matmul %35, %1, %cst_16 {dimension_numbers = #tpu.dot_dimension_numbers<[1], [0], [0], [1], [0, 0, 1, 1], [], []>, precision = #tpu.contract_precision<fp32>} : vector<8x128xf32>, vector<128x32xf32>, vector<8x32xf32> -> vector<8x32xf32>
    %c96 = arith.constant 96 : index
    %c0_17 = arith.constant 0 : index
    %37 = vector.load %arg3[%c96, %c0_17] : memref<256x128xf32, #tpu.memory_space<vmem>>, vector<32x128xf32>
    %cst_18 = arith.constant dense<0.000000e+00> : vector<8x128xf32>
    %38 = tpu.matmul %36, %37, %cst_18 {dimension_numbers = #tpu.dot_dimension_numbers<[1], [0], [0], [1], [0, 0, 1, 1], [], []>, precision = #tpu.contract_precision<fp32>} : vector<8x32xf32>, vector<32x128xf32>, vector<8x128xf32> -> vector<8x128xf32>
    %39 = arith.addf %30, %38 : vector<8x128xf32>
    %c0_19 = arith.constant 0 : index
    %c4 = arith.constant 4 : index
    %40 = vector.load %arg1[%c0_19, %c4] : memref<8x8xi32, #tpu.memory_space<vmem>>, vector<8x1xi32>
    %41 = vector.broadcast %40 : vector<8x1xi32> to vector<8x128xi32>
    %42 = arith.cmpi eq, %2, %41 : vector<8x128xi32>
    %43 = arith.extui %42 : vector<8x128xi1> to vector<8x128xi32>
    %44 = arith.sitofp %43 : vector<8x128xi32> to vector<8x128xf32>
    %cst_20 = arith.constant dense<0.000000e+00> : vector<8x32xf32>
    %45 = tpu.matmul %44, %1, %cst_20 {dimension_numbers = #tpu.dot_dimension_numbers<[1], [0], [0], [1], [0, 0, 1, 1], [], []>, precision = #tpu.contract_precision<fp32>} : vector<8x128xf32>, vector<128x32xf32>, vector<8x32xf32> -> vector<8x32xf32>
    %c128 = arith.constant 128 : index
    %c0_21 = arith.constant 0 : index
    %46 = vector.load %arg3[%c128, %c0_21] : memref<256x128xf32, #tpu.memory_space<vmem>>, vector<32x128xf32>
    %cst_22 = arith.constant dense<0.000000e+00> : vector<8x128xf32>
    %47 = tpu.matmul %45, %46, %cst_22 {dimension_numbers = #tpu.dot_dimension_numbers<[1], [0], [0], [1], [0, 0, 1, 1], [], []>, precision = #tpu.contract_precision<fp32>} : vector<8x32xf32>, vector<32x128xf32>, vector<8x128xf32> -> vector<8x128xf32>
    %48 = arith.addf %39, %47 : vector<8x128xf32>
    %c0_23 = arith.constant 0 : index
    %c5 = arith.constant 5 : index
    %49 = vector.load %arg1[%c0_23, %c5] : memref<8x8xi32, #tpu.memory_space<vmem>>, vector<8x1xi32>
    %50 = vector.broadcast %49 : vector<8x1xi32> to vector<8x128xi32>
    %51 = arith.cmpi eq, %2, %50 : vector<8x128xi32>
    %52 = arith.extui %51 : vector<8x128xi1> to vector<8x128xi32>
    %53 = arith.sitofp %52 : vector<8x128xi32> to vector<8x128xf32>
    %cst_24 = arith.constant dense<0.000000e+00> : vector<8x32xf32>
    %54 = tpu.matmul %53, %1, %cst_24 {dimension_numbers = #tpu.dot_dimension_numbers<[1], [0], [0], [1], [0, 0, 1, 1], [], []>, precision = #tpu.contract_precision<fp32>} : vector<8x128xf32>, vector<128x32xf32>, vector<8x32xf32> -> vector<8x32xf32>
    %c160 = arith.constant 160 : index
    %c0_25 = arith.constant 0 : index
    %55 = vector.load %arg3[%c160, %c0_25] : memref<256x128xf32, #tpu.memory_space<vmem>>, vector<32x128xf32>
    %cst_26 = arith.constant dense<0.000000e+00> : vector<8x128xf32>
    %56 = tpu.matmul %54, %55, %cst_26 {dimension_numbers = #tpu.dot_dimension_numbers<[1], [0], [0], [1], [0, 0, 1, 1], [], []>, precision = #tpu.contract_precision<fp32>} : vector<8x32xf32>, vector<32x128xf32>, vector<8x128xf32> -> vector<8x128xf32>
    %57 = arith.addf %48, %56 : vector<8x128xf32>
    %c0_27 = arith.constant 0 : index
    %c6 = arith.constant 6 : index
    %58 = vector.load %arg1[%c0_27, %c6] : memref<8x8xi32, #tpu.memory_space<vmem>>, vector<8x1xi32>
    %59 = vector.broadcast %58 : vector<8x1xi32> to vector<8x128xi32>
    %60 = arith.cmpi eq, %2, %59 : vector<8x128xi32>
    %61 = arith.extui %60 : vector<8x128xi1> to vector<8x128xi32>
    %62 = arith.sitofp %61 : vector<8x128xi32> to vector<8x128xf32>
    %cst_28 = arith.constant dense<0.000000e+00> : vector<8x32xf32>
    %63 = tpu.matmul %62, %1, %cst_28 {dimension_numbers = #tpu.dot_dimension_numbers<[1], [0], [0], [1], [0, 0, 1, 1], [], []>, precision = #tpu.contract_precision<fp32>} : vector<8x128xf32>, vector<128x32xf32>, vector<8x32xf32> -> vector<8x32xf32>
    %c192 = arith.constant 192 : index
    %c0_29 = arith.constant 0 : index
    %64 = vector.load %arg3[%c192, %c0_29] : memref<256x128xf32, #tpu.memory_space<vmem>>, vector<32x128xf32>
    %cst_30 = arith.constant dense<0.000000e+00> : vector<8x128xf32>
    %65 = tpu.matmul %63, %64, %cst_30 {dimension_numbers = #tpu.dot_dimension_numbers<[1], [0], [0], [1], [0, 0, 1, 1], [], []>, precision = #tpu.contract_precision<fp32>} : vector<8x32xf32>, vector<32x128xf32>, vector<8x128xf32> -> vector<8x128xf32>
    %66 = arith.addf %57, %65 : vector<8x128xf32>
    %c0_31 = arith.constant 0 : index
    %c7 = arith.constant 7 : index
    %67 = vector.load %arg1[%c0_31, %c7] : memref<8x8xi32, #tpu.memory_space<vmem>>, vector<8x1xi32>
    %68 = vector.broadcast %67 : vector<8x1xi32> to vector<8x128xi32>
    %69 = arith.cmpi eq, %2, %68 : vector<8x128xi32>
    %70 = arith.extui %69 : vector<8x128xi1> to vector<8x128xi32>
    %71 = arith.sitofp %70 : vector<8x128xi32> to vector<8x128xf32>
    %cst_32 = arith.constant dense<0.000000e+00> : vector<8x32xf32>
    %72 = tpu.matmul %71, %1, %cst_32 {dimension_numbers = #tpu.dot_dimension_numbers<[1], [0], [0], [1], [0, 0, 1, 1], [], []>, precision = #tpu.contract_precision<fp32>} : vector<8x128xf32>, vector<128x32xf32>, vector<8x32xf32> -> vector<8x32xf32>
    %c224 = arith.constant 224 : index
    %c0_33 = arith.constant 0 : index
    %73 = vector.load %arg3[%c224, %c0_33] : memref<256x128xf32, #tpu.memory_space<vmem>>, vector<32x128xf32>
    %cst_34 = arith.constant dense<0.000000e+00> : vector<8x128xf32>
    %74 = tpu.matmul %72, %73, %cst_34 {dimension_numbers = #tpu.dot_dimension_numbers<[1], [0], [0], [1], [0, 0, 1, 1], [], []>, precision = #tpu.contract_precision<fp32>} : vector<8x32xf32>, vector<32x128xf32>, vector<8x128xf32> -> vector<8x128xf32>
    %75 = arith.addf %66, %74 : vector<8x128xf32>
    %c0_35 = arith.constant 0 : index
    %c0_36 = arith.constant 0 : index
    %76 = vector.load %arg4[%c0_35, %c0_36] : memref<1x128xf32, #tpu.memory_space<vmem>>, vector<1x128xf32>
    %77 = vector.broadcast %76 : vector<1x128xf32> to vector<8x128xf32>
    %78 = arith.addf %75, %77 : vector<8x128xf32>
    %79 = math.tanh %78 : vector<8x128xf32>
    %c0_37 = arith.constant 0 : index
    %c0_38 = arith.constant 0 : index
    %80 = vector.load %arg5[%c0_37, %c0_38] : memref<128x128xf32, #tpu.memory_space<vmem>>, vector<128x128xf32>
    %cst_39 = arith.constant dense<0.000000e+00> : vector<8x128xf32>
    %81 = tpu.matmul %79, %80, %cst_39 {dimension_numbers = #tpu.dot_dimension_numbers<[1], [0], [0], [1], [0, 0, 1, 1], [], []>, precision = #tpu.contract_precision<fp32>} : vector<8x128xf32>, vector<128x128xf32>, vector<8x128xf32> -> vector<8x128xf32>
    %c0_40 = arith.constant 0 : index
    %c0_41 = arith.constant 0 : index
    %82 = vector.load %arg6[%c0_40, %c0_41] : memref<1x128xf32, #tpu.memory_space<vmem>>, vector<1x128xf32>
    %83 = vector.broadcast %82 : vector<1x128xf32> to vector<8x128xf32>
    %84 = arith.addf %81, %83 : vector<8x128xf32>
    %c0_42 = arith.constant 0 : index
    %c0_43 = arith.constant 0 : index
    %85 = vector.load %arg7[%c0_42, %c0_43] : memref<8x128xf32, #tpu.memory_space<vmem>>, vector<8x128xf32>
    tpu.vector_store %arg7[%c0_42, %c0_43], %84 {strides = array<i32>} : memref<8x128xf32, #tpu.memory_space<vmem>>, vector<8x128xf32>,
    return
  }
  func.func @transform_0(%arg0: i32) -> (i32, i32) {
    %c0_i32 = arith.constant 0 : i32
    %c0_i32_0 = arith.constant 0 : i32
    return %arg0, %c0_i32 : i32, i32
  }
  func.func @transform_1(%arg0: i32) -> (i32, i32) {
    %c0_i32 = arith.constant 0 : i32
    %c0_i32_0 = arith.constant 0 : i32
    %c0_i32_1 = arith.constant 0 : i32
    return %c0_i32, %c0_i32_0 : i32, i32
  }
  func.func @transform_2(%arg0: i32) -> (i32, i32) {
    %c0_i32 = arith.constant 0 : i32
    %c0_i32_0 = arith.constant 0 : i32
    %c0_i32_1 = arith.constant 0 : i32
    return %c0_i32, %c0_i32_0 : i32, i32
  }
  func.func @transform_3(%arg0: i32) -> (i32, i32) {
    %c0_i32 = arith.constant 0 : i32
    %c0_i32_0 = arith.constant 0 : i32
    %c0_i32_1 = arith.constant 0 : i32
    return %c0_i32, %c0_i32_0 : i32, i32
  }
  func.func @transform_4(%arg0: i32) -> (i32, i32) {
    %c0_i32 = arith.constant 0 : i32
    %c0_i32_0 = arith.constant 0 : i32
    %c0_i32_1 = arith.constant 0 : i32
    return %c0_i32, %c0_i32_0 : i32, i32
  }
  func.func @transform_5(%arg0: i32) -> (i32, i32) {
    %c0_i32 = arith.constant 0 : i32
    %c0_i32_0 = arith.constant 0 : i32
    %c0_i32_1 = arith.constant 0 : i32
    return %c0_i32, %c0_i32_0 : i32, i32
  }
  func.func @transform_6(%arg0: i32) -> (i32, i32) {
    %c0_i32 = arith.constant 0 : i32
    %c0_i32_0 = arith.constant 0 : i32
    return %arg0, %c0_i32 : i32, i32
  }
}

</mosaic_0001>

<bundles_post_ra>
// kernel: tpu_custom_call.1
= control target key start
LH: loop header
LB: loop body
LE: loop exit
PB: predicated region body
PF: predicated region fallthrough
CT: control target
= control target key end

     0   :  { %11 = vsyncpa [#allocation3], 0  ;;  %s6702_s0 = inlined_call_operand.vmem [shape: s32[8,8], index: 0, kind: input, shape index: {}]   ;;  %s6703_s1 = inlined_call_operand.vmem [shape: f32[128,32], index: 1, kind: input, shape index: {}]   ;;  %s6704_s2 = inlined_call_operand.hbm [shape: f32[256,128], index: 2, kind: input, shape index: {}]   ;;  %s6705_s3 = inlined_call_operand.vmem [shape: f32[1,128], index: 3, kind: input, shape index: {}]   ;;  %s6706_s4 = inlined_call_operand.vmem [shape: f32[128,128], index: 4, kind: input, shape index: {}]   ;;  %s6707_s5 = inlined_call_operand.vmem [shape: f32[1,128], index: 5, kind: input, shape index: {}]   ;;  %s6708_s6 = inlined_call_operand.hbm [shape: f32[8,128], index: 6, kind: output, shape index: {}]  }
   0x1   :  { %12 = vsyncpa [#allocation4], 0  ;;  %s21_s23 = sshll.u32 %s6704_s2, 4  ;;  %s4924_s24 = smov [#allocation2]   ;;  %s22_s23 = int_to_ptr.hbm [resolvable:$true] %s21_s23 }
   0x2   :  { %s23_s25 = sshll.u32 %s4924_s24, 4  ;;  %s4925_s26 = smov 128   ;;  %s24_s25 = int_to_ptr.vmem [resolvable:$true] %s23_s25 }
   0x3   :  { %s4926_s27 = smov 8  }
   0x4   :  { %29 = dma.hbm_to_vmem [thread:$0]  %s22_s23, 4096, %s24_s25, [#allocation3], %s4925_s26, %s4925_s26, %s4926_s27  }
   0x5   :  { %4920 = dma.done.wait [#allocation3], 4096  }
   0x6   :  { %4921 = vsyncadd [#allocation3], 4294963200  ;;  %v4927_v0 = vmov 0   ;;  %v4979_v1 = vld [vmem:[%s6702_s0] sm:$0xff]  ;;  %v55_v2 = vld [vmem:[%s6703_s1 + $0x78] sm:$0xff]  ;;  %v4928_v17 = vmov 1  }
   0x7   :  { %4825 = vset.pattern.permute.xlu0 %v4927_v0  ;;  %6839 = vst [vmem:[#allocation8_spill] sm:$0xff] %v4979_v1  ;;  %v54_v3 = vld [vmem:[%s6703_s1 + $0x70] sm:$0xff]  ;;  %4836 = vtanh.f32 %v55_v2  ;;  %v53_v4 = vld [vmem:[%s6703_s1 + $0x68] sm:$0xff]  ;;  %v52_v5 = vld [vmem:[%s6703_s1 + $0x60] sm:$0xff]  ;;  %vm777_vm2 = vcmask 261120   ;;  %s4769_s25 = sshll.u32 %s6708_s6, 4  ;;  %s4770_s25 = int_to_ptr.hbm [resolvable:$true] %s4769_s25 }
   0x8   :  { %76 = vperm.xlu0 %4825, %v4979_v1   ;;  %4838 = vtanh.f32 %v54_v3  ;;  %v51_v6 = vld [vmem:[%s6703_s1 + $0x58] sm:$0xff]  ;;  %v50_v7 = vld [vmem:[%s6703_s1 + $0x50] sm:$0xff]  ;;  %v49_v8 = vld [vmem:[%s6703_s1 + $0x48] sm:$0xff] }
   0x9   :  { %4840 = vtanh.f32 %v53_v4  ;;  %v48_v9 = vld [vmem:[%s6703_s1 + $0x40] sm:$0xff]  ;;  %v47_v10 = vld [vmem:[%s6703_s1 + $0x38] sm:$0xff]  ;;  %v46_v12 = vld [vmem:[%s6703_s1 + $0x30] sm:$0xff] }
   0xa   :  { %4842 = vtanh.f32 %v52_v5  ;;  %v45_v15 = vld [vmem:[%s6703_s1 + $0x28] sm:$0xff]  ;;  %v44_v19 = vld [vmem:[%s6703_s1 + $0x20] sm:$0xff]  ;;  %v43_v23 = vld [vmem:[%s6703_s1 + $0x18] sm:$0xff] }
   0xb   :  { %4844 = vtanh.f32 %v51_v6  ;;  %v42_v4 = vld [vmem:[%s6703_s1 + $0x10] sm:$0xff] }
   0xc   :  { %4846 = vtanh.f32 %v50_v7 }
   0xd   :  { %v4837_v11 = vpop.eup %4836  ;;  %4848 = vtanh.f32 %v49_v8  ;;  %v41_v8 = vld [vmem:[%s6703_s1 + $0x8] sm:$0xff] }
   0xe   :  { %v4839_v13 = vpop.eup %4838  ;;  %v5012_v14 = vand.u32 4294901760, %v4837_v11  ;;  %4850 = vtanh.f32 %v48_v9 }
   0xf   :  { %v4841_v16 = vpop.eup %4840  ;;  %v5017_v18 = vand.u32 4294901760, %v4839_v13  ;;  %4852 = vtanh.f32 %v47_v10 }
  0x10   :  { %4826 = vset.pattern.permute.xlu0 %v4928_v17  ;;  %v4843_v20 = vpop.eup %4842  ;;  %v5024_v21 = vsub.f32 %v4837_v11, %v5012_v14  ;;  %v5026_v22 = vand.u32 4294901760, %v4841_v16  ;;  %278 = vmatpush.msra.mxu3 %v5012_v14  ;;  %4854 = vtanh.f32 %v46_v12 }
  0x11   :  { %427 = vperm.xlu0 %4826, %v4979_v1   ;;  %v4845_v24 = vpop.eup %4844  ;;  %v5033_v25 = vsub.f32 %v4839_v13, %v5017_v18  ;;  %v5035_v26 = vand.u32 4294901760, %v4843_v20  ;;  %82 = vmatpush.msra.mxu0 %v5012_v14  ;;  %4856 = vtanh.f32 %v45_v15  ;;  %v40_v13 = vld [vmem:[%s6703_s1] sm:$0xff] }
  0x12   :  { %6840 = vst [vmem:[#allocation9_spill] sm:$0xff] %v5024_v21  ;;  %v4847_v27 = vpop.eup %4846  ;;  %v5039_v28 = vand.u32 4294901760, %v5024_v21  ;;  %225 = vmatpush.msra.mxu2 %v5024_v21  ;;  %v5043_v29 = vsub.f32 %v4841_v16, %v5026_v22  ;;  %280 = vmatpush.msra.mxu3 %v5017_v18  ;;  %v5046_v30 = vand.u32 4294901760, %v4845_v24  ;;  %4858 = vtanh.f32 %v44_v19 }
  0x13   :  { %6841 = vst [vmem:[#allocation10_spill] sm:$0xff] %v5033_v25  ;;  %v4849_v31 = vpop.eup %4848  ;;  %v5049_v32 = vand.u32 4294901760, %v5033_v25  ;;  %v5052_v33 = vsub.f32 %v4843_v20, %v5035_v26  ;;  %v5054_v34 = vand.u32 4294901760, %v4847_v27  ;;  %84 = vmatpush.msra.mxu0 %v5017_v18  ;;  %4860 = vtanh.f32 %v43_v23 }
  0x14   :  { %6842 = vst [vmem:[#allocation11_spill] sm:$0xff] %v5043_v29  ;;  %v4851_v35 = vpop.eup %4850  ;;  %v125_v36 = vsub.f32 %v5024_v21, %v5039_v28  ;;  %v5060_v37 = vand.u32 4294901760, %v5043_v29  ;;  %228 = vmatpush.msra.mxu2 %v5033_v25  ;;  %v5064_v38 = vsub.f32 %v4845_v24, %v5046_v30  ;;  %282 = vmatpush.msra.mxu3 %v5026_v22  ;;  %v5067_v39 = vand.u32 4294901760, %v4849_v31 }
  0x15   :  { %6843 = vst [vmem:[#allocation12_spill] sm:$0xff] %v5049_v32  ;;  %v4853_v40 = vpop.eup %4852  ;;  %v131_v41 = vsub.f32 %v5033_v25, %v5049_v32  ;;  %v5072_v42 = vand.u32 4294901760, %v5052_v33  ;;  %v5075_v43 = vsub.f32 %v4847_v27, %v5054_v34  ;;  %86 = vmatpush.msra.mxu0 %v5026_v22  ;;  %v5078_v44 = vand.u32 4294901760, %v4851_v35 }
  0x16   :  { %6844 = vst [vmem:[#allocation13_spill] sm:$0xff] %v5052_v33  ;;  %v4855_v45 = vpop.eup %4854  ;;  %v5080_v46 = vand.u32 4294901760, %v125_v36  ;;  %v137_v47 = vsub.f32 %v5043_v29, %v5060_v37  ;;  %231 = vmatpush.msra.mxu2 %v5043_v29  ;;  %v5086_v48 = vand.u32 4294901760, %v5064_v38  ;;  %284 = vmatpush.msra.mxu3 %v5035_v26  ;;  %v5090_v49 = vsub.f32 %v4849_v31, %v5067_v39 }
  0x17   :  { %6845 = vst [vmem:[#allocation14_spill] sm:$0xff] %v5060_v37  ;;  %v4857_v50 = vpop.eup %4856  ;;  %v5092_v51 = vand.u32 4294901760, %v131_v41  ;;  %v143_v52 = vsub.f32 %v5052_v33, %v5072_v42  ;;  %v5097_v53 = vand.u32 4294901760, %v5075_v43  ;;  %v5100_v54 = vsub.f32 %v4851_v35, %v5078_v44  ;;  %88 = vmatpush.msra.mxu0 %v5035_v26 }
  0x18   :  { %6846 = vst [vmem:[#allocation15_spill] sm:$0xff] %v5064_v38  ;;  %v4859_v55 = vpop.eup %4858  ;;  %127 = vmatpush.msra.mxu1 %v5080_v46  ;;  %v5104_v56 = vand.u32 4294901760, %v137_v47  ;;  %v149_v57 = vsub.f32 %v5064_v38, %v5086_v48  ;;  %234 = vmatpush.msra.mxu2 %v5052_v33  ;;  %v5110_v58 = vand.u32 4294901760, %v5090_v49  ;;  %v5112_v59 = vand.u32 4294901760, %v4853_v40 }
  0x19   :  { %6847 = vst [vmem:[#allocation16_spill] sm:$0xff] %v5072_v42  ;;  %v4861_v60 = vpop.eup %4860  ;;  %v155_v61 = vsub.f32 %v5075_v43, %v5097_v53  ;;  %286 = vmatpush.msra.mxu3 %v5046_v30  ;;  %90 = vmatpush.msra.mxu0 %v5046_v30  ;;  %v5118_v62 = vand.u32 4294901760, %v4855_v45  ;;  %v5121_v63 = vand.u32 4294901760, %v143_v52  ;;  %v5125_v0 = vand.u32 4294901760, %v5100_v54 }
  0x1a   :  { %6848 = vst [vmem:[#allocation17_spill] sm:$0xff] %v5075_v43  ;;  %133 = vmatpush.msra.mxu1 %v5092_v51  ;;  %237 = vmatpush.msra.mxu2 %v5064_v38  ;;  %v5128_v2 = vsub.f32 %v4853_v40, %v5112_v59  ;;  %v5130_v3 = vand.u32 4294901760, %v4857_v50  ;;  %v5135_v5 = vand.u32 4294901760, %v149_v57  ;;  %v5142_v7 = vand.u32 4294901760, %v4859_v55 }
  0x1b   :  { %6849 = vst [vmem:[#allocation18_spill] sm:$0xff] %v5080_v46  ;;  %288 = vmatpush.msra.mxu3 %v5054_v34  ;;  %v5139_v6 = vsub.f32 %v4855_v45, %v5118_v62  ;;  %92 = vmatpush.msra.mxu0 %v5054_v34  ;;  %v161_v9 = vsub.f32 %v5090_v49, %v5110_v58  ;;  %v5157_v12 = vand.u32 4294901760, %v4861_v60  ;;  %v5162_v15 = vand.u32 4294901760, %v155_v61 }
  0x1c   :  { %6850 = vst [vmem:[#allocation19_spill] sm:$0xff] %v5086_v48  ;;  %139 = vmatpush.msra.mxu1 %v5104_v56  ;;  %240 = vmatpush.msra.mxu2 %v5075_v43  ;;  %v5152_v10 = vand.u32 4294901760, %v5128_v2  ;;  %v5155_v11 = vsub.f32 %v4857_v50, %v5130_v3  ;;  %4862 = vtanh.f32 %v42_v4  ;;  %v167_v16 = vsub.f32 %v5100_v54, %v5125_v0 }
  0x1d   :  { %6851 = vst [vmem:[#allocation20_spill] sm:$0xff] %v5090_v49  ;;  %290 = vmatpush.msra.mxu3 %v5067_v39  ;;  %94 = vmatpush.msra.mxu0 %v5067_v39  ;;  %v5171_v17 = vand.u32 4294901760, %v5139_v6  ;;  %v5174_v19 = vsub.f32 %v4859_v55, %v5142_v7  ;;  %4864 = vtanh.f32 %v41_v8  ;;  %v5179_v20 = vand.u32 4294901760, %v161_v9 }
  0x1e   :  { %6852 = vst [vmem:[#allocation21_spill] sm:$0xff] %v5092_v51  ;;  %145 = vmatpush.msra.mxu1 %v5121_v63  ;;  %243 = vmatpush.msra.mxu2 %v5090_v49  ;;  %4866 = vtanh.f32 %v40_v13  ;;  %v173_v23 = vsub.f32 %v5128_v2, %v5152_v10  ;;  %v5185_v24 = vand.u32 4294901760, %v5155_v11  ;;  %v5188_v27 = vsub.f32 %v4861_v60, %v5157_v12 }
  0x1f   :  { %6853 = vst [vmem:[#allocation22_spill] sm:$0xff] %v5097_v53  ;;  %292 = vmatpush.msra.mxu3 %v5078_v44  ;;  %96 = vmatpush.msra.mxu0 %v5078_v44  ;;  %v5193_v31 = vand.u32 4294901760, %v167_v16  ;;  %v179_v35 = vsub.f32 %v5139_v6, %v5171_v17  ;;  %v5199_v36 = vand.u32 4294901760, %v5174_v19 }
  0x20   :  { %6854 = vst [vmem:[#allocation23_spill] sm:$0xff] %v5100_v54  ;;  %151 = vmatpush.msra.mxu1 %v5135_v5  ;;  %246 = vmatpush.msra.mxu2 %v5100_v54  ;;  %v5204_v45 = vand.u32 4294901760, %v173_v23  ;;  %v185_v47 = vsub.f32 %v5155_v11, %v5185_v24  ;;  %v5210_v50 = vand.u32 4294901760, %v5188_v27 }
  0x21   :  { %6855 = vst [vmem:[#allocation24_spill] sm:$0xff] %v5104_v56  ;;  %294 = vmatpush.msra.mxu3 %v5112_v59  ;;  %98 = vmatpush.msra.mxu0 %v5112_v59  ;;  %v5219_v60 = vand.u32 4294901760, %v179_v35  ;;  %v191_v61 = vsub.f32 %v5174_v19, %v5199_v36 }
  0x22   :  { %6856 = vst [vmem:[#allocation25_spill] sm:$0xff] %v5110_v58  ;;  %157 = vmatpush.msra.mxu1 %v5162_v15  ;;  %249 = vmatpush.msra.mxu2 %v5128_v2  ;;  %v4863_v40 = vpop.eup %4862  ;;  %v5235_v13 = vand.u32 4294901760, %v185_v47  ;;  %v197_v16 = vsub.f32 %v5188_v27, %v5210_v50 }
  0x23   :  { %6857 = vst [vmem:[#allocation26_spill] sm:$0xff] %v5121_v63  ;;  %296 = vmatpush.msra.mxu3 %v5118_v62  ;;  %100 = vmatpush.msra.mxu0 %v5118_v62  ;;  %v4865_v41 = vpop.eup %4864  ;;  %v5212_v52 = vand.u32 4294901760, %v4863_v40 }
  0x24   :  { %6858 = vst [vmem:[#allocation27_spill] sm:$0xff] %v5125_v0  ;;  %163 = vmatpush.msra.mxu1 %v5179_v20  ;;  %252 = vmatpush.msra.mxu2 %v5139_v6  ;;  %v4867_v55 = vpop.eup %4866  ;;  %v5215_v57 = vand.u32 4294901760, %v4865_v41 }
  0x25   :  { %6859 = vst [vmem:[#allocation28_spill] sm:$0xff] %v5128_v2  ;;  %298 = vmatpush.msra.mxu3 %v5130_v3  ;;  %102 = vmatpush.msra.mxu0 %v5130_v3  ;;  %v5225_v4 = vsub.f32 %v4863_v40, %v5212_v52  ;;  %v5227_v8 = vand.u32 4294901760, %v4867_v55 }
  0x26   :  { %6860 = vst [vmem:[#allocation29_spill] sm:$0xff] %v5135_v5  ;;  %169 = vmatpush.msra.mxu1 %v5193_v31  ;;  %255 = vmatpush.msra.mxu2 %v5155_v11  ;;  %v5231_v9 = vsub.f32 %v4865_v41, %v5215_v57  ;;  %v5252_v41 = vand.u32 4294901760, %v191_v61 }
  0x27   :  { %6861 = vst [vmem:[#allocation30_spill] sm:$0xff] %v5139_v6  ;;  %300 = vmatpush.msra.mxu3 %v5142_v7  ;;  %104 = vmatpush.msra.mxu0 %v5142_v7  ;;  %v5241_v23 = vand.u32 4294901760, %v5225_v4  ;;  %v5244_v35 = vsub.f32 %v4867_v55, %v5227_v8  ;;  %v5263_v55 = vand.u32 4294901760, %v197_v16 }
  0x28   :  { %6862 = vst [vmem:[#allocation31_spill] sm:$0xff] %v5152_v10  ;;  %175 = vmatpush.msra.mxu1 %v5204_v45  ;;  %258 = vmatpush.msra.mxu2 %v5174_v19  ;;  %v5247_v40 = vand.u32 4294901760, %v5231_v9 }
  0x29   :  { %6863 = vst [vmem:[#allocation32_spill] sm:$0xff] %v5155_v11  ;;  %302 = vmatpush.msra.mxu3 %v5157_v12  ;;  %106 = vmatpush.msra.mxu0 %v5157_v12  ;;  %v203_v47 = vsub.f32 %v5225_v4, %v5241_v23  ;;  %v5258_v1 = vand.u32 4294901760, %v5244_v35 }
  0x2a   :  { %6864 = vst [vmem:[#allocation33_spill] sm:$0xff] %v5162_v15  ;;  %181 = vmatpush.msra.mxu1 %v5219_v60  ;;  %261 = vmatpush.msra.mxu2 %v5188_v27  ;;  %v209_v61 = vsub.f32 %v5231_v9, %v5247_v40 }
  0x2b   :  { %6865 = vst [vmem:[#allocation34_spill] sm:$0xff] %v5171_v17  ;;  %304 = vmatpush.msra.mxu3 %v5212_v52  ;;  %108 = vmatpush.msra.mxu0 %v5212_v52 }
  0x2c   :  { %6866 = vst [vmem:[#allocation35_spill] sm:$0xff] %v5174_v19  ;;  %187 = vmatpush.msra.mxu1 %v5235_v13  ;;  %264 = vmatpush.msra.mxu2 %v5225_v4  ;;  %v215_v19 = vsub.f32 %v5244_v35, %v5258_v1  ;;  %v5279_v16 = vand.u32 4294901760, %v209_v61 }
  0x2d   :  { %6867 = vst [vmem:[#allocation36_spill] sm:$0xff] %v5179_v20  ;;  %306 = vmatpush.msra.mxu3 %v5215_v57  ;;  %110 = vmatpush.msra.mxu0 %v5215_v57 }
  0x2e   :  { %6868 = vst [vmem:[#allocation37_spill] sm:$0xff] %v5185_v24  ;;  %193 = vmatpush.msra.mxu1 %v5252_v41  ;;  %267 = vmatpush.msra.mxu2 %v5231_v9 }
  0x2f   :  { %6869 = vst [vmem:[#allocation38_spill] sm:$0xff] %v5188_v27  ;;  %v5271_v27 = vand.u32 4294901760, %v203_v47  ;;  %308 = vmatpush.msra.mxu3 %v5227_v8  ;;  %112 = vmatpush.msra.mxu0 %v5227_v8  ;;  %v5285_v47 = vand.u32 4294901760, %v215_v19  ;;  %v72_v19 = vlaneseq }
  0x30   :  { %6870 = vst [vmem:[#allocation39_spill] sm:$0xff] %v5193_v31  ;;  %199 = vmatpush.msra.mxu1 %v5263_v55  ;;  %270 = vmatpush.msra.mxu2 %v5244_v35 }
  0x31   :  { %6871 = vst [vmem:[#allocation40_spill] sm:$0xff] %v5199_v36  ;;  %478 = vmatpush.msrb.mxu3 %v5080_v46  ;;  %319 = vmatpush.msrb.mxu0 %v5039_v28  ;;  %v5351_v61 = vand.u32 127, %v72_v19 }
  0x32   :  { %6872 = vst [vmem:[#allocation41_spill] sm:$0xff] %v5204_v45  ;;  %433 = vmatpush.msrb.mxu2 %v5012_v14  ;;  %205 = vmatpush.msra.mxu1 %v5271_v27 }
  0x33   :  { %6873 = vst [vmem:[#allocation42_spill] sm:$0xff] %v5210_v50  ;;  %484 = vmatpush.msrb.mxu3 %v5092_v51  ;;  %323 = vmatpush.msrb.mxu0 %v5049_v32 }
  0x34   :  { %6874 = vst [vmem:[#allocation43_spill] sm:$0xff] %v5225_v4  ;;  %435 = vmatpush.msrb.mxu2 %v5017_v18  ;;  %211 = vmatpush.msra.mxu1 %v5279_v16 }
  0x35   :  { %6875 = vst [vmem:[#allocation44_spill] sm:$0xff] %v5231_v9  ;;  %490 = vmatpush.msrb.mxu3 %v5104_v56  ;;  %327 = vmatpush.msrb.mxu0 %v5060_v37 }
  0x36   :  { %6876 = vst [vmem:[#allocation45_spill] sm:$0xff] %v5235_v13  ;;  %437 = vmatpush.msrb.mxu2 %v5026_v22  ;;  %217 = vmatpush.msra.mxu1 %v5285_v47 }
  0x37   :  { %6877 = vst [vmem:[#allocation46_spill] sm:$0xff] %v5241_v23  ;;  %496 = vmatpush.msrb.mxu3 %v5121_v63  ;;  %331 = vmatpush.msrb.mxu0 %v5072_v42 }
  0x38   :  { %6878 = vst [vmem:[#allocation47_spill] sm:$0xff] %v5244_v35  ;;  %386 = vmatpush.msrb.mxu1 %v5012_v14  ;;  %439 = vmatpush.msrb.mxu2 %v5035_v26 }
  0x39   :  { %6879 = vst [vmem:[#allocation48_spill] sm:$0xff] %v5247_v40  ;;  %502 = vmatpush.msrb.mxu3 %v5135_v5  ;;  %335 = vmatpush.msrb.mxu0 %v5086_v48 }
  0x3a   :  { %6880 = vst [vmem:[#allocation49_spill] sm:$0xff] %v5252_v41  ;;  %388 = vmatpush.msrb.mxu1 %v5017_v18  ;;  %441 = vmatpush.msrb.mxu2 %v5046_v30 }
  0x3b   :  { %6881 = vst [vmem:[#allocation50_spill] sm:$0xff] %v5258_v1  ;;  %508 = vmatpush.msrb.mxu3 %v5162_v15  ;;  %339 = vmatpush.msrb.mxu0 %v5097_v53 }
  0x3c   :  { %6882 = vst [vmem:[#allocation51_spill] sm:$0xff] %v5263_v55  ;;  %390 = vmatpush.msrb.mxu1 %v5026_v22  ;;  %443 = vmatpush.msrb.mxu2 %v5054_v34 }
  0x3d   :  { %6883 = vst [vmem:[#allocation52_spill] sm:$0xff] %v5271_v27  ;;  %514 = vmatpush.msrb.mxu3 %v5179_v20  ;;  %343 = vmatpush.msrb.mxu0 %v5110_v58 }
  0x3e   :  { %6884 = vst [vmem:[#allocation53_spill] sm:$0xff] %v5279_v16  ;;  %392 = vmatpush.msrb.mxu1 %v5035_v26  ;;  %445 = vmatpush.msrb.mxu2 %v5067_v39 }
  0x3f   :  { %6885 = vst [vmem:[#allocation54_spill] sm:$0xff] %v5285_v47  ;;  %520 = vmatpush.msrb.mxu3 %v5193_v31  ;;  %347 = vmatpush.msrb.mxu0 %v5125_v0 }
  0x40   :  { %394 = vmatpush.msrb.mxu1 %v5046_v30  ;;  %447 = vmatpush.msrb.mxu2 %v5078_v44 }
  0x41   :  { %526 = vmatpush.msrb.mxu3 %v5204_v45  ;;  %351 = vmatpush.msrb.mxu0 %v5152_v10 }
  0x42   :  { %396 = vmatpush.msrb.mxu1 %v5054_v34  ;;  %449 = vmatpush.msrb.mxu2 %v5112_v59 }
  0x43   :  { %532 = vmatpush.msrb.mxu3 %v5219_v60  ;;  %355 = vmatpush.msrb.mxu0 %v5171_v17 }
  0x44   :  { %398 = vmatpush.msrb.mxu1 %v5067_v39  ;;  %451 = vmatpush.msrb.mxu2 %v5118_v62 }
  0x45   :  { %538 = vmatpush.msrb.mxu3 %v5235_v13  ;;  %359 = vmatpush.msrb.mxu0 %v5185_v24 }
  0x46   :  { %400 = vmatpush.msrb.mxu1 %v5078_v44  ;;  %453 = vmatpush.msrb.mxu2 %v5130_v3 }
  0x47   :  { %544 = vmatpush.msrb.mxu3 %v5252_v41  ;;  %363 = vmatpush.msrb.mxu0 %v5199_v36 }
  0x48   :  { %402 = vmatpush.msrb.mxu1 %v5112_v59  ;;  %455 = vmatpush.msrb.mxu2 %v5142_v7 }
  0x49   :  { %550 = vmatpush.msrb.mxu3 %v5263_v55  ;;  %367 = vmatpush.msrb.mxu0 %v5210_v50 }
  0x4a   :  { %404 = vmatpush.msrb.mxu1 %v5118_v62  ;;  %457 = vmatpush.msrb.mxu2 %v5157_v12 }
  0x4b   :  { %556 = vmatpush.msrb.mxu3 %v5271_v27  ;;  %371 = vmatpush.msrb.mxu0 %v5241_v23  ;;  %v6728_v27 = vmov 1.0  }
  0x4c   :  { %406 = vmatpush.msrb.mxu1 %v5130_v3  ;;  %459 = vmatpush.msrb.mxu2 %v5212_v52 }
  0x4d   :  { %562 = vmatpush.msrb.mxu3 %v5279_v16  ;;  %375 = vmatpush.msrb.mxu0 %v5247_v40 }
  0x4e   :  { %408 = vmatpush.msrb.mxu1 %v5142_v7  ;;  %461 = vmatpush.msrb.mxu2 %v5215_v57 }
  0x4f   :  { %568 = vmatpush.msrb.mxu3 %v5285_v47  ;;  %379 = vmatpush.msrb.mxu0 %v5258_v1  ;;  %v6726_v47 = vmov 0.0  }
  0x50   :  { %410 = vmatpush.msrb.mxu1 %v5157_v12  ;;  %463 = vmatpush.msrb.mxu2 %v5227_v8 }
  0x52   :  { %412 = vmatpush.msrb.mxu1 %v5212_v52 }
  0x54   :  { %414 = vmatpush.msrb.mxu1 %v5215_v57 }
  0x56   :  { %416 = vmatpush.msrb.mxu1 %v5227_v8 }
  0x7a   :  { %v77_v16 = vpop.permute.xlu0 %76 }
  0x7b   :  { %vm78_vm0 = vcmp.eq.s32.totalorder %v5351_v61, %v77_v16  ;;  %v6889_v16 = vld [vmem:[#allocation38_spill] sm:$0xff] }
  0x7c   :  { %4780 = vmatmul.msk.f32.vlgmr.msra.gmra.mxu1 %vm78_vm0, %v6728_v27  ;;  %v4779_v55 = vsel %vm78_vm0, 1.0, %v6726_v47 }
  0x7d   :  { %629 = vmatpush.msra.mxu1 %v5012_v14  ;;  %v114_v41 = vsub.f32 %v4779_v55, %v4779_v55  ;;  %v6886_v55 = vmov 1.0  }
  0x7f   :  { %631 = vmatpush.msra.mxu1 %v5017_v18  ;;  %273 = vmatmul.f32.vlgmr.msra.gmra.mxu2 %v114_v41  ;;  %v115_v19 = vand.u32 4294901760, %v114_v41 }
  0x80   :  { %670 = vmatpush.msra.mxu2 %v5039_v28 }
  0x81   :  { %633 = vmatpush.msra.mxu1 %v5026_v22  ;;  %312 = vmatmul.f32.vlgmr.msra.gmra.mxu3 %v115_v19  ;;  %v116_v13 = vsub.f32 %v114_v41, %v115_v19  ;;  %v6887_v41 = vmov 0.0  }
  0x82   :  { %674 = vmatpush.msra.mxu2 %v5049_v32  ;;  %737 = vmatpush.msra.mxu3 %v5012_v14 }
  0x83   :  { %635 = vmatpush.msra.mxu1 %v5035_v26  ;;  %v117_v47 = vand.u32 4294901760, %v116_v13  ;;  %v5367_v27 = vpop.permute.xlu0 %427 }
  0x84   :  { %678 = vmatpush.msra.mxu2 %v5060_v37  ;;  %739 = vmatpush.msra.mxu3 %v5017_v18  ;;  %vm429_vm1 = vcmp.eq.s32.totalorder %v5351_v61, %v5367_v27 }
  0x85   :  { %4782 = vmatmul.msk.f32.vlgmr.msrb.gmra.mxu1 %vm78_vm0, %v6886_v55  ;;  %118 = vmatmul.f32.vlgmr.msra.gmra.mxu0 %v117_v47  ;;  %v4783_v19 = vsel %vm429_vm1, 1.0, %v6887_v41 }
  0x86   :  { %637 = vmatpush.msra.mxu1 %v5046_v30  ;;  %576 = vmatpush.msra.mxu0 %v5024_v21  ;;  %v5382_v13 = vsub.f32 %v4783_v19, %v4783_v19 }
  0x87   :  { %682 = vmatpush.msra.mxu2 %v5072_v42  ;;  %741 = vmatpush.msra.mxu3 %v5026_v22 }
  0x88   :  { %639 = vmatpush.msra.mxu1 %v5054_v34  ;;  %579 = vmatpush.msra.mxu0 %v5033_v25  ;;  %v466_v47 = vand.u32 4294901760, %v5382_v13 }
  0x89   :  { %686 = vmatpush.msra.mxu2 %v5086_v48  ;;  %743 = vmatpush.msra.mxu3 %v5035_v26 }
  0x8a   :  { %641 = vmatpush.msra.mxu1 %v5067_v39  ;;  %582 = vmatpush.msra.mxu0 %v5043_v29  ;;  %v467_v19 = vsub.f32 %v5382_v13, %v466_v47 }
  0x8b   :  { %690 = vmatpush.msra.mxu2 %v5097_v53  ;;  %745 = vmatpush.msra.mxu3 %v5046_v30 }
  0x8c   :  { %643 = vmatpush.msra.mxu1 %v5078_v44  ;;  %585 = vmatpush.msra.mxu0 %v5052_v33  ;;  %v468_v29 = vand.u32 4294901760, %v467_v19  ;;  %v4931_v19 = vmov 2  }
  0x8d   :  { %694 = vmatpush.msra.mxu2 %v5110_v58  ;;  %747 = vmatpush.msra.mxu3 %v5054_v34 }
  0x8e   :  { %645 = vmatpush.msra.mxu1 %v5112_v59  ;;  %4781 = vmatmul.msk.f32.vlgmr.msrb.gmra.mxu0 %vm78_vm0, %v6886_v55 }
  0x8f   :  { %588 = vmatpush.msra.mxu0 %v5064_v38  ;;  %698 = vmatpush.msra.mxu2 %v5125_v0  ;;  %v773_v38 = vld [vmem:[#allocation2 + $0x20] sm:$0xff] }
  0x90   :  { %749 = vmatpush.msra.mxu3 %v5067_v39  ;;  %647 = vmatpush.msra.mxu1 %v5118_v62 }
  0x91   :  { %591 = vmatpush.msra.mxu0 %v5075_v43  ;;  %702 = vmatpush.msra.mxu2 %v5152_v10 }
  0x92   :  { %751 = vmatpush.msra.mxu3 %v5078_v44  ;;  %649 = vmatpush.msra.mxu1 %v5130_v3 }
  0x93   :  { %469 = vmatmul.f32.vlgmr.msrb.gmra.mxu2 %v468_v29  ;;  %4784 = vmatmul.msk.f32.vlgmr.msrb.gmra.mxu3 %vm429_vm1, %v6886_v55  ;;  %v6888_v29 = vld [vmem:[#allocation35_spill] sm:$0xff] }
  0x94   :  { %594 = vmatpush.msra.mxu0 %v5090_v49  ;;  %706 = vmatpush.msra.mxu2 %v5171_v17 }
  0x95   :  { %753 = vmatpush.msra.mxu3 %v5112_v59  ;;  %651 = vmatpush.msra.mxu1 %v5142_v7 }
  0x96   :  { %597 = vmatpush.msra.mxu0 %v5100_v54  ;;  %710 = vmatpush.msra.mxu2 %v5185_v24 }
  0x97   :  { %755 = vmatpush.msra.mxu3 %v5118_v62  ;;  %653 = vmatpush.msra.mxu1 %v5157_v12 }
  0x98   :  { %600 = vmatpush.msra.mxu0 %v5128_v2  ;;  %714 = vmatpush.msra.mxu2 %v5199_v36 }
  0x99   :  { %757 = vmatpush.msra.mxu3 %v5130_v3  ;;  %655 = vmatpush.msra.mxu1 %v5212_v52 }
  0x9a   :  { %603 = vmatpush.msra.mxu0 %v5139_v6  ;;  %718 = vmatpush.msra.mxu2 %v5210_v50 }
  0x9b   :  { %759 = vmatpush.msra.mxu3 %v5142_v7  ;;  %657 = vmatpush.msra.mxu1 %v5215_v57 }
  0x9c   :  { %606 = vmatpush.msra.mxu0 %v5155_v11  ;;  %722 = vmatpush.msra.mxu2 %v5241_v23 }
  0x9d   :  { %761 = vmatpush.msra.mxu3 %v5157_v12  ;;  %659 = vmatpush.msra.mxu1 %v5227_v8 }
  0x9e   :  { %609 = vmatpush.msra.mxu0 %v6888_v29  ;;  %663 = vmatmul.f32.vlgmr.msra.gmra.mxu1 %v466_v47  ;;  %v6890_v47 = vld [vmem:[#allocation8_spill] sm:$0xff]  ;;  %v424_v29 = vld [vmem:[#allocation2 + $0x10] sm:$0xff] }
  0x9f   :  { %726 = vmatpush.msra.mxu2 %v5247_v40  ;;  %763 = vmatpush.msra.mxu3 %v5212_v52  ;;  %v5461_v11 = vand.u32 4294901760, %v424_v29 }
  0xa0   :  { %612 = vmatpush.msra.mxu0 %v6889_v16  ;;  %4827 = vset.pattern.permute.xlu1 %v4931_v19  ;;  %v425_v19 = vld [vmem:[#allocation2 + $0x18] sm:$0xff] }
  0xa1   :  { %730 = vmatpush.msra.mxu2 %v5258_v1  ;;  %765 = vmatpush.msra.mxu3 %v5215_v57  ;;  %v5456_v16 = vand.u32 4294901760, %v425_v19  ;;  %v5466_v27 = vsub.f32 %v424_v29, %v5461_v11  ;;  %v776_v29 = vld [vmem:[#allocation2 + $0x38] sm:$0xff] }
  0xa2   :  { %4785 = vmatmul.msk.f32.vlgmr.msra.gmra.mxu2 %vm429_vm1, %v6886_v55  ;;  %615 = vmatpush.msra.mxu0 %v5225_v4 }
  0xa3   :  { %767 = vmatpush.msra.mxu3 %v5227_v8  ;;  %1155 = vperm.xlu1 %4827, %v6890_v47   ;;  %v5459_v4 = vsub.f32 %v425_v19, %v5456_v16  ;;  %v423_v47 = vld [vmem:[#allocation2 + $0x8] sm:$0xff] }
  0xa4   :  { %4786 = vmatmul.msk.f32.vlgmr.msra.gmra.mxu3 %vm429_vm1, %v6886_v55  ;;  %618 = vmatpush.msra.mxu0 %v5231_v9 }
  0xa5   :  { %1082 = vmatpush.msrb.mxu1 %v5456_v16 }
  0xa6   :  { %621 = vmatpush.msra.mxu0 %v5244_v35  ;;  %v5468_v35 = vand.u32 4294901760, %v423_v47 }
  0xa7   :  { %624 = vmatmul.f32.vlgmr.msra.gmra.mxu0 %v5382_v13  ;;  %1084 = vmatpush.msrb.mxu1 %v5461_v11  ;;  %v422_v13 = vld [vmem:[#allocation2] sm:$0xff] }
  0xa8   :  { %1053 = vmatpush.msrb.mxu0 %v5459_v4  ;;  %6891 = vst [vmem:[#allocation8_spill] sm:$0xff] %v5468_v35  ;;  %v5473_v19 = vsub.f32 %v423_v47, %v5468_v35  ;;  %v5475_v9 = vand.u32 4294901760, %v422_v13  ;;  %v5493_v47 = vand.u32 4294901760, %v776_v29 }
  0xa9   :  { %1086 = vmatpush.msrb.mxu1 %v5468_v35 }
  0xaa   :  { %1056 = vmatpush.msrb.mxu0 %v5466_v27  ;;  %6892 = vst [vmem:[#allocation55_spill] sm:$0xff] %v5475_v9  ;;  %v5480_v6 = vsub.f32 %v422_v13, %v5475_v9  ;;  %v775_v13 = vld [vmem:[#allocation2 + $0x30] sm:$0xff]  ;;  %794 = vmatpush.msrb.mxu2 %v5493_v47 }
  0xab   :  { %1088 = vmatpush.msrb.mxu1 %v5475_v9  ;;  %v5500_v2 = vand.u32 4294901760, %v775_v13  ;;  %v6893_v9 = vld [vmem:[#allocation45_spill] sm:$0xff] }
  0xac   :  { %1059 = vmatpush.msrb.mxu0 %v5473_v19 }
  0xad   :  { %1206 = vmatpush.msra.mxu1 %v5080_v46  ;;  %796 = vmatpush.msrb.mxu2 %v5500_v2 }
  0xae   :  { %1062 = vmatpush.msrb.mxu0 %v5480_v6 }
  0xaf   :  { %1212 = vmatpush.msra.mxu1 %v5092_v51 }
  0xb0   :  { %1161 = vmatpush.msra.mxu0 %v5012_v14 }
  0xb1   :  { %1218 = vmatpush.msra.mxu1 %v5104_v56  ;;  %v5498_v56 = vsub.f32 %v776_v29, %v5493_v47 }
  0xb2   :  { %1163 = vmatpush.msra.mxu0 %v5017_v18 }
  0xb3   :  { %1224 = vmatpush.msra.mxu1 %v5121_v63  ;;  %v774_v63 = vld [vmem:[#allocation2 + $0x28] sm:$0xff]  ;;  %v6766_v49 = vand.u32 4294901760, %v5498_v56 }
  0xb4   :  { %1165 = vmatpush.msra.mxu0 %v5026_v22  ;;  %v5509_v43 = vand.u32 4294901760, %v774_v63 }
  0xb5   :  { %1230 = vmatpush.msra.mxu1 %v5135_v5 }
  0xb6   :  { %1167 = vmatpush.msra.mxu0 %v5035_v26  ;;  %798 = vmatpush.msrb.mxu2 %v5509_v43 }
  0xb7   :  { %1236 = vmatpush.msra.mxu1 %v5162_v15  ;;  %v5507_v15 = vsub.f32 %v775_v13, %v5500_v2  ;;  %v5521_v13 = vand.u32 4294901760, %v773_v38 }
  0xb8   :  { %1169 = vmatpush.msra.mxu0 %v5046_v30 }
  0xb9   :  { %1242 = vmatpush.msra.mxu1 %v5179_v20  ;;  %v5519_v20 = vsub.f32 %v774_v63, %v5509_v43  ;;  %800 = vmatpush.msrb.mxu2 %v5521_v13 }
  0xba   :  { %1171 = vmatpush.msra.mxu0 %v5054_v34 }
  0xbb   :  { %1248 = vmatpush.msra.mxu1 %v5193_v31  ;;  %v5531_v31 = vsub.f32 %v773_v38, %v5521_v13  ;;  %865 = vmatpush.msra.mxu2 %v5498_v56 }
  0xbc   :  { %1173 = vmatpush.msra.mxu0 %v5067_v39 }
  0xbd   :  { %1254 = vmatpush.msra.mxu1 %v5204_v45  ;;  %v6782_v33 = vand.u32 4294901760, %v5531_v31  ;;  %868 = vmatpush.msra.mxu2 %v5507_v15 }
  0xbe   :  { %1175 = vmatpush.msra.mxu0 %v5078_v44 }
  0xbf   :  { %1260 = vmatpush.msra.mxu1 %v5219_v60  ;;  %871 = vmatpush.msra.mxu2 %v5519_v20 }
  0xc0   :  { %1177 = vmatpush.msra.mxu0 %v5112_v59 }
  0xc1   :  { %1266 = vmatpush.msra.mxu1 %v6893_v9  ;;  %874 = vmatpush.msra.mxu2 %v5531_v31 }
  0xc2   :  { %1179 = vmatpush.msra.mxu0 %v5118_v62 }
  0xc4   :  { %1181 = vmatpush.msra.mxu0 %v5130_v3 }
  0xc6   :  { %1183 = vmatpush.msra.mxu0 %v5142_v7 }
  0xc8   :  { %1185 = vmatpush.msra.mxu0 %v5157_v12 }
  0xca   :  { %1187 = vmatpush.msra.mxu0 %v5212_v52 }
  0xcc   :  { %1189 = vmatpush.msra.mxu0 %v5215_v57 }
  0xce   :  { %1191 = vmatpush.msra.mxu0 %v5227_v8 }
  0xf9   :  { %v220_v51 = vpop.f32.mrf.mxu1 }
 0x102   :  { %v119_v46 = vpop.f32.mrf.mxu0  ;;  %v274_v54 = vpop.f32.mrf.mxu2 }
 0x103   :  { %v221_v5 = vadd.f32 %v220_v51, %v119_v46  ;;  %v825_v46 = vsub.f32 %v5498_v56, %v6766_v49  ;;  %v6771_v51 = vand.u32 4294901760, %v5507_v15  ;;  %v6780_v49 = vand.u32 4294901760, %v5519_v20 }
 0x104   :  { %v313_v63 = vpop.f32.mrf.mxu3 }
 0x105   :  { %v275_v29 = vadd.f32 %v274_v54, %v221_v5  ;;  %v826_v54 = vand.u32 4294901760, %v825_v46  ;;  %v831_v5 = vsub.f32 %v5507_v15, %v6771_v51  ;;  %v837_v51 = vsub.f32 %v5519_v20, %v6780_v49 }
 0x107   :  { %v314_v45 = vadd.f32 %v313_v63, %v275_v29  ;;  %827 = vmatpush.msrb.mxu3 %v826_v54  ;;  %v832_v46 = vand.u32 4294901760, %v831_v5  ;;  %v838_v35 = vand.u32 4294901760, %v837_v51  ;;  %v843_v29 = vsub.f32 %v5531_v31, %v6782_v33  ;;  %v419_v54 = vpop.f32.mrf.mxu1  ;;  %v6894_v5 = vld [vmem:[#allocation49_spill] sm:$0xff] }
 0x108   :  { %1272 = vmatpush.msra.mxu1 %v6894_v5 }
 0x109   :  { %833 = vmatpush.msrb.mxu3 %v832_v46  ;;  %v844_v49 = vand.u32 4294901760, %v843_v29  ;;  %v6898_v29 = vld [vmem:[#allocation54_spill] sm:$0xff] }
 0x10b   :  { %v382_v38 = vpop.f32.mrf.mxu0  ;;  %839 = vmatpush.msrb.mxu3 %v838_v35  ;;  %v6897_v35 = vld [vmem:[#allocation53_spill] sm:$0xff] }
 0x10c   :  { %v383_v25 = vadd.f32 %v382_v38, %v314_v45  ;;  %v6895_v45 = vld [vmem:[#allocation51_spill] sm:$0xff]  ;;  %v6896_v38 = vld [vmem:[#allocation52_spill] sm:$0xff] }
 0x10d   :  { %1278 = vmatpush.msra.mxu1 %v6895_v45  ;;  %845 = vmatpush.msrb.mxu3 %v844_v49 }
 0x10e   :  { %v420_v63 = vadd.f32 %v419_v54, %v383_v25 }
 0x10f   :  { %894 = vmatpush.msra.mxu3 %v5493_v47  ;;  %1284 = vmatpush.msra.mxu1 %v6896_v38 }
 0x110   :  { %v967_v51 = vsel %vm777_vm2, %v420_v63, 0 }
 0x111   :  { %v5555_v46 = vand.u32 4294901760, %v967_v51  ;;  %896 = vmatpush.msra.mxu3 %v5500_v2  ;;  %1290 = vmatpush.msra.mxu1 %v6897_v35 }
 0x113   :  { %v5561_v25 = vsub.f32 %v967_v51, %v5555_v46  ;;  %898 = vmatpush.msra.mxu3 %v5509_v43  ;;  %1296 = vmatpush.msra.mxu1 %v6898_v29 }
 0x115   :  { %1065 = vmatmul.f32.vlgmr.msrb.gmra.mxu0 %v5561_v25  ;;  %v6781_v49 = vand.u32 4294901760, %v5561_v25  ;;  %900 = vmatpush.msra.mxu3 %v5521_v13 }
 0x116   :  { %1398 = vmatpush.msrb.mxu0 %v5039_v28  ;;  %v470_v54 = vpop.f32.mrf.mxu2  ;;  %v571_v63 = vpop.f32.mrf.mxu3 }
 0x117   :  { %1092 = vmatmul.f32.vlgmr.msrb.gmra.mxu1 %v6781_v49  ;;  %v572_v51 = vadd.f32 %v571_v63, %v470_v54 }
 0x118   :  { %1465 = vmatpush.msrb.mxu1 %v5012_v14  ;;  %1402 = vmatpush.msrb.mxu0 %v5049_v32 }
 0x11a   :  { %1467 = vmatpush.msrb.mxu1 %v5017_v18  ;;  %1406 = vmatpush.msrb.mxu0 %v5060_v37 }
 0x11c   :  { %1469 = vmatpush.msrb.mxu1 %v5026_v22  ;;  %1410 = vmatpush.msrb.mxu0 %v5072_v42  ;;  %v664_v42 = vpop.f32.mrf.mxu1 }
 0x11e   :  { %1471 = vmatpush.msrb.mxu1 %v5035_v26  ;;  %1414 = vmatpush.msrb.mxu0 %v5086_v48 }
 0x120   :  { %1473 = vmatpush.msrb.mxu1 %v5046_v30  ;;  %1418 = vmatpush.msrb.mxu0 %v5097_v53 }
 0x122   :  { %1475 = vmatpush.msrb.mxu1 %v5054_v34  ;;  %1422 = vmatpush.msrb.mxu0 %v5110_v58 }
 0x124   :  { %v625_v49 = vpop.f32.mrf.mxu0  ;;  %1477 = vmatpush.msrb.mxu1 %v5067_v39  ;;  %1426 = vmatpush.msrb.mxu0 %v5125_v0 }
 0x125   :  { %v626_v33 = vadd.f32 %v625_v49, %v572_v51  ;;  %v733_v48 = vpop.f32.mrf.mxu2 }
 0x126   :  { %1479 = vmatpush.msrb.mxu1 %v5078_v44  ;;  %1430 = vmatpush.msrb.mxu0 %v5152_v10 }
 0x127   :  { %v665_v37 = vadd.f32 %v664_v42, %v626_v33  ;;  %v770_v32 = vpop.f32.mrf.mxu3  ;;  %v6793_v33 = vand.u32 4294901760, %v5459_v4 }
 0x128   :  { %1481 = vmatpush.msrb.mxu1 %v5112_v59  ;;  %1434 = vmatpush.msrb.mxu0 %v5171_v17 }
 0x129   :  { %v734_v53 = vadd.f32 %v733_v48, %v665_v37  ;;  %v6796_v37 = vand.u32 4294901760, %v5466_v27 }
 0x12a   :  { %1483 = vmatpush.msrb.mxu1 %v5118_v62  ;;  %1438 = vmatpush.msrb.mxu0 %v5185_v24 }
 0x12b   :  { %v771_v54 = vadd.f32 %v770_v32, %v734_v53  ;;  %v1013_v32 = vsub.f32 %v5459_v4, %v6793_v33  ;;  %v6797_v53 = vand.u32 4294901760, %v5473_v19  ;;  %v1019_v51 = vsub.f32 %v5466_v27, %v6796_v37 }
 0x12c   :  { %1485 = vmatpush.msrb.mxu1 %v5130_v3  ;;  %1442 = vmatpush.msrb.mxu0 %v5199_v36 }
 0x12d   :  { %v779_v49 = vsel %vm777_vm2, %v771_v54, 0  ;;  %v6798_v54 = vand.u32 4294901760, %v5480_v6  ;;  %v1025_v33 = vsub.f32 %v5473_v19, %v6797_v53  ;;  %v1020_v37 = vand.u32 4294901760, %v1019_v51 }
 0x12e   :  { %v5598_v42 = vand.u32 4294901760, %v779_v49  ;;  %1487 = vmatpush.msrb.mxu1 %v5142_v7  ;;  %1446 = vmatpush.msrb.mxu0 %v5210_v50  ;;  %v6899_v53 = vand.u32 4294901760, %v5498_v56 }
 0x130   :  { %v802_v48 = vsub.f32 %v779_v49, %v5598_v42  ;;  %847 = vmatmul.f32.vlgmr.msrb.gmra.mxu3 %v5598_v42  ;;  %1489 = vmatpush.msrb.mxu1 %v5157_v12  ;;  %v1014_v49 = vand.u32 4294901760, %v1013_v32 }
 0x131   :  { %954 = vmatpush.msrb.mxu3 %v5493_v47  ;;  %1450 = vmatpush.msrb.mxu0 %v5241_v23  ;;  %v1156_v23 = vpop.permute.xlu1 %1155 }
 0x132   :  { %v803_v63 = vand.u32 4294901760, %v802_v48  ;;  %1491 = vmatpush.msrb.mxu1 %v5212_v52  ;;  %vm1157_vm3 = vcmp.eq.s32.totalorder %v5351_v61, %v1156_v23  ;;  %v6912_v23 = vand.u32 4294901760, %v5480_v6 }
 0x133   :  { %956 = vmatpush.msrb.mxu3 %v5500_v2  ;;  %1454 = vmatpush.msrb.mxu0 %v5247_v40  ;;  %v4787_v32 = vsel %vm1157_vm3, 1.0, %v6887_v41 }
 0x134   :  { %v804_v47 = vsub.f32 %v802_v48, %v803_v63  ;;  %1493 = vmatpush.msrb.mxu1 %v5215_v57 }
 0x135   :  { %958 = vmatpush.msrb.mxu3 %v5509_v43  ;;  %1458 = vmatpush.msrb.mxu0 %v5258_v1  ;;  %v1031_v43 = vsub.f32 %v5480_v6, %v6798_v54  ;;  %v6900_v54 = vand.u32 4294901760, %v5507_v15  ;;  %v6915_v6 = vld [vmem:[#allocation20_spill] sm:$0xff] }
 0x136   :  { %v805_v2 = vand.u32 4294901760, %v804_v47  ;;  %4788 = vmatmul.msk.f32.vlgmr.msra.gmra.mxu1 %vm1157_vm3, %v6886_v55  ;;  %v5637_v47 = vsub.f32 %v4787_v32, %v4787_v32  ;;  %v6921_v32 = vld [vmem:[#allocation38_spill] sm:$0xff] }
 0x137   :  { %960 = vmatpush.msrb.mxu3 %v5521_v13  ;;  %v1026_v13 = vand.u32 4294901760, %v1025_v33  ;;  %1495 = vmatpush.msrb.mxu1 %v5227_v8  ;;  %v1032_v1 = vand.u32 4294901760, %v1031_v43  ;;  %v6902_v33 = vand.u32 4294901760, %v5531_v31  ;;  %v6905_v31 = vld [vmem:[#allocation55_spill] sm:$0xff] }
 0x138   :  { %806 = vmatmul.f32.vlgmr.msrb.gmra.mxu2 %v805_v2  ;;  %904 = vmatmul.f32.vlgmr.msra.gmra.mxu3 %v803_v63  ;;  %v1194_v51 = vand.u32 4294901760, %v5637_v47  ;;  %v6901_v63 = vand.u32 4294901760, %v5519_v20  ;;  %v6904_v20 = vld [vmem:[#allocation10_spill] sm:$0xff]  ;;  %v6920_v43 = vld [vmem:[#allocation35_spill] sm:$0xff] }
 0x139   :  { %923 = vmatpush.msrb.mxu2 %v6899_v53  ;;  %1015 = vmatpush.msra.mxu3 %v1014_v49  ;;  %v6911_v53 = vld [vmem:[#allocation13_spill] sm:$0xff]  ;;  %v6917_v49 = vld [vmem:[#allocation28_spill] sm:$0xff]  ;;  %v6918_v2 = vld [vmem:[#allocation30_spill] sm:$0xff] }
 0x13a   :  { %1897 = vmatpush.msra.mxu1 %v5012_v14  ;;  %v1195_v56 = vsub.f32 %v5637_v47, %v1194_v51 }
 0x13b   :  { %927 = vmatpush.msrb.mxu2 %v6900_v54  ;;  %1021 = vmatpush.msra.mxu3 %v1020_v37  ;;  %v6916_v54 = vld [vmem:[#allocation23_spill] sm:$0xff] }
 0x13c   :  { %1899 = vmatpush.msra.mxu1 %v5017_v18  ;;  %v1196_v15 = vand.u32 4294901760, %v1195_v56  ;;  %v6924_v56 = vld [vmem:[#allocation47_spill] sm:$0xff] }
 0x13d   :  { %931 = vmatpush.msrb.mxu2 %v6901_v63  ;;  %1027 = vmatpush.msra.mxu3 %v1026_v13  ;;  %v6922_v13 = vld [vmem:[#allocation43_spill] sm:$0xff]  ;;  %v6923_v63 = vld [vmem:[#allocation44_spill] sm:$0xff] }
 0x13e   :  { %1197 = vmatmul.f32.vlgmr.msra.gmra.mxu0 %v1196_v15  ;;  %4790 = vmatmul.msk.f32.vlgmr.msrb.gmra.mxu1 %vm1157_vm3, %v6886_v55  ;;  %v5752_v15 = vld [vmem:[%s6702_s0] sm:$0xff] }
 0x13f   :  { %935 = vmatpush.msrb.mxu2 %v6902_v33  ;;  %1033 = vmatpush.msra.mxu3 %v1032_v1  ;;  %v6903_v1 = vld [vmem:[#allocation8_spill] sm:$0xff]  ;;  %v4932_v33 = vmov 3   ;;  %6925 = vst [vmem:[#allocation45_spill] sm:$0xff] %v5752_v15 }
 0x140   :  { %877 = vmatmul.f32.vlgmr.msra.gmra.mxu2 %v802_v48  ;;  %962 = vmatmul.f32.vlgmr.msrb.gmra.mxu3 %v5598_v42  ;;  %v6908_v48 = vand.u32 4294901760, %v5466_v27  ;;  %v6913_v27 = vld [vmem:[#allocation15_spill] sm:$0xff] }
 0x141   :  { %982 = vmatpush.msra.mxu2 %v5456_v16  ;;  %1142 = vmatpush.msrb.mxu3 %v5456_v16  ;;  %v6907_v16 = vand.u32 4294901760, %v5561_v25 }
 0x142   :  { %1844 = vmatpush.msra.mxu0 %v5024_v21  ;;  %1901 = vmatpush.msra.mxu1 %v5026_v22 }
 0x143   :  { %984 = vmatpush.msra.mxu2 %v5461_v11  ;;  %1144 = vmatpush.msrb.mxu3 %v5461_v11  ;;  %v6906_v11 = vand.u32 4294901760, %v5459_v4  ;;  %v992_v37 = vsub.f32 %v5561_v25, %v6907_v16  ;;  %v6910_v4 = vand.u32 4294901760, %v5473_v19  ;;  %v6914_v19 = vld [vmem:[#allocation17_spill] sm:$0xff] }
 0x144   :  { %1847 = vmatpush.msra.mxu0 %v6904_v20  ;;  %1903 = vmatpush.msra.mxu1 %v5035_v26 }
 0x145   :  { %986 = vmatpush.msra.mxu2 %v6903_v1  ;;  %1146 = vmatpush.msrb.mxu3 %v6903_v1  ;;  %v993_v25 = vand.u32 4294901760, %v992_v37 }
 0x146   :  { %4789 = vmatmul.msk.f32.vlgmr.msrb.gmra.mxu0 %vm1157_vm3, %v6886_v55  ;;  %1905 = vmatpush.msra.mxu1 %v5046_v30 }
 0x147   :  { %988 = vmatpush.msra.mxu2 %v6905_v31  ;;  %1148 = vmatpush.msrb.mxu3 %v6905_v31 }
 0x148   :  { %937 = vmatmul.f32.vlgmr.msrb.gmra.mxu2 %v5598_v42  ;;  %1035 = vmatmul.f32.vlgmr.msra.gmra.mxu3 %v5555_v46  ;;  %v6909_v42 = vld [vmem:[#allocation11_spill] sm:$0xff] }
 0x149   :  { %1111 = vmatpush.msrb.mxu2 %v6906_v11  ;;  %1357 = vmatpush.msra.mxu3 %v5012_v14 }
 0x14a   :  { %1850 = vmatpush.msra.mxu0 %v6909_v42  ;;  %1907 = vmatpush.msra.mxu1 %v5054_v34 }
 0x14b   :  { %1115 = vmatpush.msrb.mxu2 %v6908_v48  ;;  %1359 = vmatpush.msra.mxu3 %v5017_v18 }
 0x14c   :  { %1853 = vmatpush.msra.mxu0 %v6911_v53  ;;  %1909 = vmatpush.msra.mxu1 %v5067_v39 }
 0x14d   :  { %1119 = vmatpush.msrb.mxu2 %v6910_v4  ;;  %1361 = vmatpush.msra.mxu3 %v5026_v22  ;;  %v1504_v4 = vld [vmem:[#allocation2 + $0x58] sm:$0xff] }
 0x14e   :  { %1856 = vmatpush.msra.mxu0 %v6913_v27  ;;  %1911 = vmatpush.msra.mxu1 %v5078_v44 }
 0x14f   :  { %1123 = vmatpush.msrb.mxu2 %v6912_v23  ;;  %1363 = vmatpush.msra.mxu3 %v5035_v26  ;;  %v1503_v23 = vld [vmem:[#allocation2 + $0x50] sm:$0xff] }
 0x150   :  { %994 = vmatmul.f32.vlgmr.msra.gmra.mxu2 %v993_v25  ;;  %1150 = vmatmul.f32.vlgmr.msrb.gmra.mxu3 %v5555_v46  ;;  %v5755_v25 = vand.u32 4294901760, %v1504_v4 }
 0x151   :  { %1304 = vmatpush.msra.mxu2 %v5024_v21  ;;  %1365 = vmatpush.msra.mxu3 %v5046_v30 }
 0x152   :  { %1859 = vmatpush.msra.mxu0 %v6914_v19  ;;  %1913 = vmatpush.msra.mxu1 %v5112_v59 }
 0x153   :  { %1307 = vmatpush.msra.mxu2 %v6904_v20  ;;  %1367 = vmatpush.msra.mxu3 %v5054_v34 }
 0x154   :  { %1862 = vmatpush.msra.mxu0 %v6915_v6  ;;  %1915 = vmatpush.msra.mxu1 %v5118_v62 }
 0x155   :  { %1310 = vmatpush.msra.mxu2 %v6909_v42  ;;  %1369 = vmatpush.msra.mxu3 %v5067_v39 }
 0x156   :  { %1865 = vmatpush.msra.mxu0 %v6916_v54  ;;  %1917 = vmatpush.msra.mxu1 %v5130_v3 }
 0x157   :  { %1313 = vmatpush.msra.mxu2 %v6911_v53  ;;  %1371 = vmatpush.msra.mxu3 %v5078_v44 }
 0x158   :  { %1125 = vmatmul.f32.vlgmr.msrb.gmra.mxu2 %v5555_v46  ;;  %1868 = vmatpush.msra.mxu0 %v6917_v49  ;;  %v6919_v46 = vld [vmem:[#allocation32_spill] sm:$0xff] }
 0x159   :  { %1316 = vmatpush.msra.mxu2 %v6913_v27  ;;  %1373 = vmatpush.msra.mxu3 %v5112_v59 }
 0x15a   :  { %1871 = vmatpush.msra.mxu0 %v6918_v2  ;;  %1919 = vmatpush.msra.mxu1 %v5142_v7 }
 0x15b   :  { %1319 = vmatpush.msra.mxu2 %v6914_v19  ;;  %1375 = vmatpush.msra.mxu3 %v5118_v62 }
 0x15c   :  { %1874 = vmatpush.msra.mxu0 %v6919_v46  ;;  %1921 = vmatpush.msra.mxu1 %v5157_v12 }
 0x15d   :  { %1322 = vmatpush.msra.mxu2 %v6915_v6  ;;  %1377 = vmatpush.msra.mxu3 %v5130_v3 }
 0x15e   :  { %1877 = vmatpush.msra.mxu0 %v6920_v43  ;;  %1923 = vmatpush.msra.mxu1 %v5212_v52 }
 0x15f   :  { %1325 = vmatpush.msra.mxu2 %v6916_v54  ;;  %1379 = vmatpush.msra.mxu3 %v5142_v7 }
 0x160   :  { %1880 = vmatpush.msra.mxu0 %v6921_v32  ;;  %1925 = vmatpush.msra.mxu1 %v5215_v57 }
 0x161   :  { %1328 = vmatpush.msra.mxu2 %v6917_v49  ;;  %1381 = vmatpush.msra.mxu3 %v5157_v12 }
 0x162   :  { %1883 = vmatpush.msra.mxu0 %v6922_v13  ;;  %1927 = vmatpush.msra.mxu1 %v5227_v8 }
 0x163   :  { %1331 = vmatpush.msra.mxu2 %v6918_v2  ;;  %1383 = vmatpush.msra.mxu3 %v5212_v52 }
 0x164   :  { %1886 = vmatpush.msra.mxu0 %v6923_v63  ;;  %4828 = vset.pattern.permute.xlu1 %v4932_v33  ;;  %v5758_v33 = vsub.f32 %v1504_v4, %v5755_v25 }
 0x165   :  { %1334 = vmatpush.msra.mxu2 %v6919_v46  ;;  %1385 = vmatpush.msra.mxu3 %v5215_v57 }
 0x166   :  { %1889 = vmatpush.msra.mxu0 %v6924_v56  ;;  %1695 = vperm.xlu1 %4828, %v5752_v15  }
 0x167   :  { %1337 = vmatpush.msra.mxu2 %v6920_v43  ;;  %1387 = vmatpush.msra.mxu3 %v5227_v8 }
 0x168   :  { %1391 = vmatmul.f32.vlgmr.msra.gmra.mxu3 %v1194_v51 }
 0x169   :  { %1340 = vmatpush.msra.mxu2 %v6921_v32 }
 0x16b   :  { %1343 = vmatpush.msra.mxu2 %v6922_v13 }
 0x16d   :  { %1346 = vmatpush.msra.mxu2 %v6923_v63  ;;  %v1502_v63 = vld [vmem:[#allocation2 + $0x48] sm:$0xff] }
 0x16f   :  { %1349 = vmatpush.msra.mxu2 %v6924_v56  ;;  %v5760_v56 = vand.u32 4294901760, %v1503_v23 }
 0x170   :  { %1352 = vmatmul.f32.vlgmr.msra.gmra.mxu2 %v5637_v47 }
 0x171   :  { %1521 = vmatpush.msrb.mxu2 %v5755_v25 }
 0x173   :  { %1523 = vmatpush.msrb.mxu2 %v5760_v56 }
 0x194   :  { %v1093_v6 = vpop.f32.mrf.mxu1 }
 0x1b3   :  { %v848_v51 = vpop.f32.mrf.mxu3 }
 0x1bb   :  { %v807_v1 = vpop.f32.mrf.mxu2  ;;  %v905_v11 = vpop.f32.mrf.mxu3 }
 0x1bc   :  { %v849_v31 = vadd.f32 %v848_v51, %v807_v1  ;;  %v6808_v51 = vand.u32 4294901760, %v5758_v33  ;;  %v5765_v1 = vsub.f32 %v1503_v23, %v5760_v56 }
 0x1be   :  { %v6812_v4 = vand.u32 4294901760, %v5765_v1 }
 0x1c0   :  { %v1558_v23 = vsub.f32 %v5765_v1, %v6812_v4 }
 0x1c3   :  { %v878_v16 = vpop.f32.mrf.mxu2  ;;  %v963_v47 = vpop.f32.mrf.mxu3 }
 0x1c4   :  { %v879_v37 = vadd.f32 %v878_v16, %v849_v31  ;;  %v5767_v31 = vand.u32 4294901760, %v1502_v63 }
 0x1c6   :  { %v906_v48 = vadd.f32 %v905_v11, %v879_v37  ;;  %v1501_v11 = vld [vmem:[#allocation2 + $0x40] sm:$0xff]  ;;  %v1552_v37 = vsub.f32 %v5758_v33, %v6808_v51  ;;  %v5775_v32 = vsub.f32 %v1502_v63, %v5767_v31  ;;  %1525 = vmatpush.msrb.mxu2 %v5767_v31 }
 0x1c8   :  { %v1563_v43 = vand.u32 4294901760, %v5775_v32 }
 0x1ca   :  { %v1564_v51 = vsub.f32 %v5775_v32, %v1563_v43 }
 0x1cb   :  { %v938_v15 = vpop.f32.mrf.mxu2  ;;  %v1036_v63 = vpop.f32.mrf.mxu3 }
 0x1cc   :  { %v939_v13 = vadd.f32 %v938_v15, %v906_v48  ;;  %v1526_v15 = vand.u32 4294901760, %v1501_v11  ;;  %v1553_v48 = vand.u32 4294901760, %v1552_v37  ;;  %v1565_v49 = vand.u32 4294901760, %v1564_v51 }
 0x1ce   :  { %v964_v16 = vadd.f32 %v963_v47, %v939_v13  ;;  %v5782_v13 = vsub.f32 %v1501_v11, %v1526_v15  ;;  %1527 = vmatpush.msrb.mxu2 %v1526_v15  ;;  %1554 = vmatpush.msrb.mxu3 %v1553_v48  ;;  %v1559_v47 = vand.u32 4294901760, %v1558_v23  ;;  %v1066_v48 = vpop.f32.mrf.mxu0 }
 0x1d0   :  { %1592 = vmatpush.msra.mxu2 %v5758_v33  ;;  %v1569_v2 = vand.u32 4294901760, %v5782_v13  ;;  %1560 = vmatpush.msrb.mxu3 %v1559_v47 }
 0x1d2   :  { %1595 = vmatpush.msra.mxu2 %v5765_v1  ;;  %v1570_v4 = vsub.f32 %v5782_v13, %v1569_v2  ;;  %1566 = vmatpush.msrb.mxu3 %v1565_v49 }
 0x1d3   :  { %v995_v46 = vpop.f32.mrf.mxu2 }
 0x1d4   :  { %v996_v37 = vadd.f32 %v995_v46, %v964_v16  ;;  %1598 = vmatpush.msra.mxu2 %v5775_v32  ;;  %v1571_v23 = vand.u32 4294901760, %v1570_v4  ;;  %v1151_v16 = vpop.f32.mrf.mxu3  ;;  %v1299_v32 = vpop.f32.mrf.mxu1 }
 0x1d6   :  { %v1037_v11 = vadd.f32 %v1036_v63, %v996_v37  ;;  %1601 = vmatpush.msra.mxu2 %v5782_v13  ;;  %1572 = vmatpush.msrb.mxu3 %v1571_v23  ;;  %v1198_v49 = vpop.f32.mrf.mxu0 }
 0x1d7   :  { %v1300_v4 = vadd.f32 %v1299_v32, %v1198_v49  ;;  %v6926_v32 = vld [vmem:[#allocation18_spill] sm:$0xff] }
 0x1d8   :  { %v1067_v54 = vadd.f32 %v1066_v48, %v1037_v11  ;;  %1621 = vmatpush.msra.mxu3 %v5755_v25 }
 0x1da   :  { %v1094_v19 = vadd.f32 %v1093_v6, %v1067_v54  ;;  %1623 = vmatpush.msra.mxu3 %v5760_v56 }
 0x1db   :  { %v1126_v46 = vpop.f32.mrf.mxu2 }
 0x1dc   :  { %v1127_v51 = vadd.f32 %v1126_v46, %v1094_v19  ;;  %1625 = vmatpush.msra.mxu3 %v5767_v31  ;;  %v1498_v48 = vpop.f32.mrf.mxu1 }
 0x1de   :  { %v5793_v47 = vadd.f32 %v1151_v16, %v1127_v51  ;;  %1627 = vmatpush.msra.mxu3 %v1526_v15  ;;  %v1461_v6 = vpop.f32.mrf.mxu0 }
 0x1eb   :  { %v1392_v37 = vpop.f32.mrf.mxu3 }
 0x1f3   :  { %v1353_v63 = vpop.f32.mrf.mxu2 }
 0x1f4   :  { %v1354_v13 = vadd.f32 %v1353_v63, %v1300_v4  ;;  %v6927_v4 = vand.u32 4294901760, %v5758_v33  ;;  %v6928_v63 = vld [vmem:[#allocation21_spill] sm:$0xff] }
 0x1f6   :  { %v1393_v11 = vadd.f32 %v1392_v37, %v1354_v13  ;;  %v6929_v13 = vand.u32 4294901760, %v5765_v1  ;;  %v6933_v37 = vld [vmem:[#allocation33_spill] sm:$0xff] }
 0x1f8   :  { %v1462_v54 = vadd.f32 %v1461_v6, %v1393_v11  ;;  %v6936_v11 = vld [vmem:[#allocation41_spill] sm:$0xff] }
 0x1fa   :  { %v1499_v23 = vadd.f32 %v1498_v48, %v1462_v54  ;;  %v6937_v48 = vld [vmem:[#allocation12_spill] sm:$0xff] }
 0x1fc   :  { %v1506_v19 = vsel %vm777_vm2, %v1499_v23, 0  ;;  %v6938_v23 = vld [vmem:[#allocation14_spill] sm:$0xff] }
 0x1fd   :  { %v1528_v46 = vand.u32 4294901760, %v1506_v19 }
 0x1ff   :  { %v1529_v27 = vsub.f32 %v1506_v19, %v1528_v46  ;;  %1574 = vmatmul.f32.vlgmr.msrb.gmra.mxu3 %v1528_v46  ;;  %v6939_v19 = vld [vmem:[#allocation16_spill] sm:$0xff] }
 0x200   :  { %1681 = vmatpush.msrb.mxu3 %v5755_v25  ;;  %v6930_v25 = vld [vmem:[#allocation24_spill] sm:$0xff] }
 0x201   :  { %v1530_v51 = vand.u32 4294901760, %v1529_v27 }
 0x202   :  { %1683 = vmatpush.msrb.mxu3 %v5760_v56  ;;  %v5807_v56 = vpop.permute.xlu1 %1695 }
 0x203   :  { %v1531_v16 = vsub.f32 %v1529_v27, %v1530_v51  ;;  %vm1697_vm4 = vcmp.eq.s32.totalorder %v5351_v61, %v5807_v56  ;;  %v6946_v56 = vld [vmem:[#allocation20_spill] sm:$0xff] }
 0x204   :  { %1685 = vmatpush.msrb.mxu3 %v5767_v31  ;;  %v6931_v31 = vld [vmem:[#allocation26_spill] sm:$0xff]  ;;  %v4791_v33 = vsel %vm1697_vm4, 1.0, %v6887_v41 }
 0x205   :  { %v1532_v49 = vand.u32 4294901760, %v1531_v16  ;;  %v1733_v1 = vsub.f32 %v4791_v33, %v4791_v33  ;;  %v6942_v16 = vld [vmem:[#allocation46_spill] sm:$0xff]  ;;  %v6947_v33 = vld [vmem:[#allocation23_spill] sm:$0xff] }
 0x206   :  { %1687 = vmatpush.msrb.mxu3 %v1526_v15  ;;  %v6932_v15 = vld [vmem:[#allocation29_spill] sm:$0xff] }
 0x207   :  { %1533 = vmatmul.f32.vlgmr.msrb.gmra.mxu2 %v1532_v49  ;;  %1631 = vmatmul.f32.vlgmr.msra.gmra.mxu3 %v1530_v51  ;;  %v6941_v51 = vld [vmem:[#allocation22_spill] sm:$0xff] }
 0x208   :  { %1746 = vmatpush.msra.mxu3 %v6926_v32  ;;  %1650 = vmatpush.msrb.mxu2 %v6927_v4  ;;  %v6943_v49 = vld [vmem:[#allocation50_spill] sm:$0xff]  ;;  %v6944_v4 = vld [vmem:[#allocation15_spill] sm:$0xff] }
 0x209   :  { %1892 = vmatmul.f32.vlgmr.msra.gmra.mxu0 %v1733_v1 }
 0x20a   :  { %1752 = vmatpush.msra.mxu3 %v6928_v63  ;;  %1654 = vmatpush.msrb.mxu2 %v6929_v13  ;;  %v6945_v13 = vld [vmem:[#allocation17_spill] sm:$0xff] }
 0x20c   :  { %1758 = vmatpush.msra.mxu3 %v6930_v25  ;;  %1658 = vmatpush.msrb.mxu2 %v1563_v43  ;;  %v1734_v43 = vand.u32 4294901760, %v1733_v1 }
 0x20e   :  { %1764 = vmatpush.msra.mxu3 %v6931_v31  ;;  %1662 = vmatpush.msrb.mxu2 %v1569_v2  ;;  %v6934_v2 = vld [vmem:[#allocation36_spill] sm:$0xff]  ;;  %v1735_v6 = vsub.f32 %v1733_v1, %v1734_v43 }
 0x20f   :  { %1604 = vmatmul.f32.vlgmr.msra.gmra.mxu2 %v1529_v27  ;;  %1689 = vmatmul.f32.vlgmr.msrb.gmra.mxu3 %v1528_v46  ;;  %v6935_v27 = vld [vmem:[#allocation39_spill] sm:$0xff]  ;;  %v6948_v1 = vld [vmem:[#allocation28_spill] sm:$0xff] }
 0x210   :  { %1701 = vmatpush.msra.mxu2 %v5012_v14  ;;  %1770 = vmatpush.msra.mxu3 %v6932_v15  ;;  %v1736_v54 = vand.u32 4294901760, %v1735_v6  ;;  %v6950_v6 = vld [vmem:[#allocation32_spill] sm:$0xff] }
 0x211   :  { %1931 = vmatmul.f32.vlgmr.msra.gmra.mxu1 %v1734_v43  ;;  %v6949_v43 = vld [vmem:[#allocation30_spill] sm:$0xff] }
 0x212   :  { %1703 = vmatpush.msra.mxu2 %v5017_v18  ;;  %1776 = vmatpush.msra.mxu3 %v6933_v37 }
 0x214   :  { %1705 = vmatpush.msra.mxu2 %v5026_v22  ;;  %1782 = vmatpush.msra.mxu3 %v6934_v2 }
 0x216   :  { %1707 = vmatpush.msra.mxu2 %v5035_v26  ;;  %1788 = vmatpush.msra.mxu3 %v6935_v27 }
 0x217   :  { %1664 = vmatmul.f32.vlgmr.msrb.gmra.mxu2 %v1528_v46  ;;  %v6940_v46 = vld [vmem:[#allocation19_spill] sm:$0xff] }
 0x218   :  { %1709 = vmatpush.msra.mxu2 %v5046_v30  ;;  %1794 = vmatpush.msra.mxu3 %v6936_v11 }
 0x21a   :  { %1711 = vmatpush.msra.mxu2 %v5054_v34  ;;  %1800 = vmatpush.msra.mxu3 %v5219_v60 }
 0x21c   :  { %1713 = vmatpush.msra.mxu2 %v5067_v39  ;;  %1806 = vmatpush.msra.mxu3 %v6893_v9 }
 0x21e   :  { %1715 = vmatpush.msra.mxu2 %v5078_v44  ;;  %1812 = vmatpush.msra.mxu3 %v6894_v5 }
 0x220   :  { %1717 = vmatpush.msra.mxu2 %v5112_v59  ;;  %1818 = vmatpush.msra.mxu3 %v6895_v45 }
 0x222   :  { %1719 = vmatpush.msra.mxu2 %v5118_v62  ;;  %1824 = vmatpush.msra.mxu3 %v6896_v38 }
 0x224   :  { %1721 = vmatpush.msra.mxu2 %v5130_v3  ;;  %1830 = vmatpush.msra.mxu3 %v6897_v35 }
 0x226   :  { %1723 = vmatpush.msra.mxu2 %v5142_v7  ;;  %1836 = vmatpush.msra.mxu3 %v6898_v29 }
 0x227   :  { %4792 = vmatmul.msk.f32.vlgmr.msra.gmra.mxu3 %vm1697_vm4, %v6886_v55 }
 0x228   :  { %2005 = vmatpush.msrb.mxu3 %v5012_v14  ;;  %1725 = vmatpush.msra.mxu2 %v5157_v12 }
 0x22a   :  { %2007 = vmatpush.msrb.mxu3 %v5017_v18  ;;  %1727 = vmatpush.msra.mxu2 %v5212_v52 }
 0x22c   :  { %2009 = vmatpush.msrb.mxu3 %v5026_v22  ;;  %1729 = vmatpush.msra.mxu2 %v5215_v57 }
 0x22e   :  { %2011 = vmatpush.msrb.mxu3 %v5035_v26  ;;  %1731 = vmatpush.msra.mxu2 %v5227_v8 }
 0x22f   :  { %1737 = vmatmul.f32.vlgmr.msra.gmra.mxu2 %v1736_v54  ;;  %v6951_v54 = vld [vmem:[#allocation35_spill] sm:$0xff] }
 0x230   :  { %1938 = vmatpush.msrb.mxu2 %v5039_v28  ;;  %2013 = vmatpush.msrb.mxu3 %v5046_v30 }
 0x232   :  { %1942 = vmatpush.msrb.mxu2 %v6937_v48  ;;  %2015 = vmatpush.msrb.mxu3 %v5054_v34 }
 0x234   :  { %1946 = vmatpush.msrb.mxu2 %v6938_v23  ;;  %2017 = vmatpush.msrb.mxu3 %v5067_v39 }
 0x236   :  { %1950 = vmatpush.msrb.mxu2 %v6939_v19  ;;  %2019 = vmatpush.msrb.mxu3 %v5078_v44 }
 0x238   :  { %1954 = vmatpush.msrb.mxu2 %v6940_v46  ;;  %2021 = vmatpush.msrb.mxu3 %v5112_v59 }
 0x23a   :  { %1958 = vmatpush.msrb.mxu2 %v6941_v51  ;;  %2023 = vmatpush.msrb.mxu3 %v5118_v62 }
 0x23c   :  { %1962 = vmatpush.msrb.mxu2 %v5110_v58  ;;  %2025 = vmatpush.msrb.mxu3 %v5130_v3 }
 0x23e   :  { %1966 = vmatpush.msrb.mxu2 %v5125_v0  ;;  %2027 = vmatpush.msrb.mxu3 %v5142_v7 }
 0x240   :  { %1970 = vmatpush.msrb.mxu2 %v5152_v10  ;;  %2029 = vmatpush.msrb.mxu3 %v5157_v12 }
 0x242   :  { %1974 = vmatpush.msrb.mxu2 %v5171_v17  ;;  %2031 = vmatpush.msrb.mxu3 %v5212_v52 }
 0x244   :  { %1978 = vmatpush.msrb.mxu2 %v5185_v24  ;;  %2033 = vmatpush.msrb.mxu3 %v5215_v57 }
 0x246   :  { %1982 = vmatpush.msrb.mxu2 %v5199_v36  ;;  %2035 = vmatpush.msrb.mxu3 %v5227_v8  ;;  %v2043_v36 = vld [vmem:[#allocation2 + $0x70] sm:$0xff] }
 0x247   :  { %4794 = vmatmul.msk.f32.vlgmr.msrb.gmra.mxu3 %vm1697_vm4, %v6886_v55  ;;  %v2062_v24 = vand.u32 4294901760, %v2043_v36 }
 0x248   :  { %1986 = vmatpush.msrb.mxu2 %v5210_v50  ;;  %2437 = vmatpush.msra.mxu3 %v5012_v14 }
 0x24a   :  { %1990 = vmatpush.msrb.mxu2 %v6942_v16  ;;  %2439 = vmatpush.msra.mxu3 %v5017_v18 }
 0x24c   :  { %1994 = vmatpush.msrb.mxu2 %v5247_v40  ;;  %2441 = vmatpush.msra.mxu3 %v5026_v22 }
 0x24e   :  { %1998 = vmatpush.msrb.mxu2 %v6943_v49  ;;  %2443 = vmatpush.msra.mxu3 %v5035_v26 }
 0x24f   :  { %4793 = vmatmul.msk.f32.vlgmr.msrb.gmra.mxu2 %vm1697_vm4, %v6886_v55 }
 0x250   :  { %2384 = vmatpush.msra.mxu2 %v5024_v21  ;;  %2445 = vmatpush.msra.mxu3 %v5046_v30 }
 0x252   :  { %2387 = vmatpush.msra.mxu2 %v6904_v20  ;;  %2447 = vmatpush.msra.mxu3 %v5054_v34 }
 0x254   :  { %2390 = vmatpush.msra.mxu2 %v6909_v42  ;;  %2449 = vmatpush.msra.mxu3 %v5067_v39 }
 0x256   :  { %2393 = vmatpush.msra.mxu2 %v6911_v53  ;;  %2451 = vmatpush.msra.mxu3 %v5078_v44 }
 0x258   :  { %2396 = vmatpush.msra.mxu2 %v6944_v4  ;;  %2453 = vmatpush.msra.mxu3 %v5112_v59  ;;  %v4933_v4 = vmov 4  }
 0x259   :  { %4829 = vset.pattern.permute.xlu2 %v4933_v4 }
 0x25a   :  { %2399 = vmatpush.msra.mxu2 %v6945_v13  ;;  %2455 = vmatpush.msra.mxu3 %v5118_v62  ;;  %v6954_v13 = vld [vmem:[#allocation44_spill] sm:$0xff] }
 0x25c   :  { %2402 = vmatpush.msra.mxu2 %v6946_v56  ;;  %2457 = vmatpush.msra.mxu3 %v5130_v3  ;;  %v6952_v56 = vld [vmem:[#allocation38_spill] sm:$0xff] }
 0x25e   :  { %2405 = vmatpush.msra.mxu2 %v6947_v33  ;;  %2459 = vmatpush.msra.mxu3 %v5142_v7  ;;  %v6953_v33 = vld [vmem:[#allocation43_spill] sm:$0xff] }
 0x260   :  { %2408 = vmatpush.msra.mxu2 %v6948_v1  ;;  %2461 = vmatpush.msra.mxu3 %v5157_v12  ;;  %v6955_v1 = vld [vmem:[#allocation47_spill] sm:$0xff] }
 0x262   :  { %2411 = vmatpush.msra.mxu2 %v6949_v43  ;;  %2463 = vmatpush.msra.mxu3 %v5212_v52  ;;  %v6956_v43 = vld [vmem:[#allocation45_spill] sm:$0xff] }
 0x263   :  { %2235 = vperm.xlu2 %4829, %v6956_v43   ;;  %v2042_v43 = vld [vmem:[#allocation2 + $0x68] sm:$0xff] }
 0x264   :  { %2414 = vmatpush.msra.mxu2 %v6950_v6  ;;  %2465 = vmatpush.msra.mxu3 %v5215_v57 }
 0x266   :  { %2417 = vmatpush.msra.mxu2 %v6951_v54  ;;  %2467 = vmatpush.msra.mxu3 %v5227_v8 }
 0x268   :  { %2420 = vmatpush.msra.mxu2 %v6952_v56 }
 0x26a   :  { %2423 = vmatpush.msra.mxu2 %v6953_v33 }
 0x26c   :  { %2426 = vmatpush.msra.mxu2 %v6954_v13  ;;  %v2044_v13 = vld [vmem:[#allocation2 + $0x78] sm:$0xff] }
 0x26e   :  { %2429 = vmatpush.msra.mxu2 %v6955_v1  ;;  %v2060_v1 = vand.u32 4294901760, %v2044_v13 }
 0x270   :  { %v2090_v4 = vsub.f32 %v2044_v13, %v2060_v1  ;;  %2061 = vmatpush.msrb.mxu0 %v2060_v1 }
 0x272   :  { %v2091_v17 = vand.u32 4294901760, %v2090_v4  ;;  %2063 = vmatpush.msrb.mxu0 %v2062_v24 }
 0x282   :  { %v1575_v53 = vpop.f32.mrf.mxu3 }
 0x28a   :  { %v1534_v6 = vpop.f32.mrf.mxu2  ;;  %v1632_v20 = vpop.f32.mrf.mxu3 }
 0x28b   :  { %v1576_v42 = vadd.f32 %v1575_v53, %v1534_v6  ;;  %v2096_v53 = vsub.f32 %v2043_v36, %v2062_v24  ;;  %v2064_v6 = vand.u32 4294901760, %v2042_v43 }
 0x28d   :  { %2065 = vmatpush.msrb.mxu0 %v2064_v6 }
 0x292   :  { %v1605_v21 = vpop.f32.mrf.mxu2  ;;  %v1690_v56 = vpop.f32.mrf.mxu3 }
 0x293   :  { %v1606_v54 = vadd.f32 %v1605_v21, %v1576_v42  ;;  %v2041_v21 = vld [vmem:[#allocation2 + $0x60] sm:$0xff]  ;;  %v2097_v42 = vand.u32 4294901760, %v2096_v53 }
 0x295   :  { %v1633_v49 = vadd.f32 %v1632_v20, %v1606_v54  ;;  %v2092_v20 = vsub.f32 %v2090_v4, %v2091_v17 }
 0x29a   :  { %v1665_v40 = vpop.f32.mrf.mxu2 }
 0x29b   :  { %v1666_v16 = vadd.f32 %v1665_v40, %v1633_v49  ;;  %v2102_v40 = vsub.f32 %v2042_v43, %v2064_v6  ;;  %v2066_v49 = vand.u32 4294901760, %v2041_v21 }
 0x29d   :  { %v1691_v50 = vadd.f32 %v1690_v56, %v1666_v16  ;;  %v2093_v16 = vand.u32 4294901760, %v2092_v20  ;;  %v2108_v56 = vsub.f32 %v2041_v21, %v2066_v49  ;;  %2067 = vmatpush.msrb.mxu0 %v2066_v49  ;;  %v1893_v20 = vpop.f32.mrf.mxu0 }
 0x29f   :  { %v5922_v33 = vadd.f32 %v1691_v50, %v5793_v47  ;;  %v2098_v50 = vsub.f32 %v2096_v53, %v2097_v42  ;;  %v2103_v47 = vand.u32 4294901760, %v2102_v40  ;;  %2132 = vmatpush.msra.mxu0 %v2090_v4  ;;  %2094 = vmatpush.msrb.mxu1 %v2093_v16 }
 0x2a1   :  { %6957 = vst [vmem:[#allocation49_spill] sm:$0xff] %v5922_v33  ;;  %v2099_v13 = vand.u32 4294901760, %v2098_v50  ;;  %v2104_v54 = vsub.f32 %v2102_v40, %v2103_v47  ;;  %v2109_v33 = vand.u32 4294901760, %v2108_v56  ;;  %2135 = vmatpush.msra.mxu0 %v2096_v53  ;;  %v1932_v50 = vpop.f32.mrf.mxu1 }
 0x2a3   :  { %2100 = vmatpush.msrb.mxu1 %v2099_v13  ;;  %v2105_v36 = vand.u32 4294901760, %v2104_v54  ;;  %v2110_v10 = vsub.f32 %v2108_v56, %v2109_v33  ;;  %2138 = vmatpush.msra.mxu0 %v2102_v40 }
 0x2a5   :  { %2106 = vmatpush.msrb.mxu1 %v2105_v36  ;;  %v2111_v0 = vand.u32 4294901760, %v2110_v10  ;;  %2141 = vmatpush.msra.mxu0 %v2108_v56 }
 0x2a7   :  { %2112 = vmatpush.msrb.mxu1 %v2111_v0 }
 0x2a9   :  { %2161 = vmatpush.msra.mxu1 %v2060_v1 }
 0x2aa   :  { %v1839_v21 = vpop.f32.mrf.mxu3 }
 0x2ab   :  { %2163 = vmatpush.msra.mxu1 %v2062_v24 }
 0x2ad   :  { %2165 = vmatpush.msra.mxu1 %v2064_v6 }
 0x2af   :  { %2167 = vmatpush.msra.mxu1 %v2066_v49 }
 0x2b2   :  { %v1738_v43 = vpop.f32.mrf.mxu2 }
 0x2b3   :  { %v1840_v4 = vadd.f32 %v1839_v21, %v1738_v43  ;;  %v6963_v43 = vld [vmem:[#allocation34_spill] sm:$0xff]  ;;  %v6964_v21 = vld [vmem:[#allocation37_spill] sm:$0xff] }
 0x2b5   :  { %v1894_v16 = vadd.f32 %v1893_v20, %v1840_v4  ;;  %v6965_v4 = vld [vmem:[#allocation40_spill] sm:$0xff]  ;;  %v6966_v20 = vld [vmem:[#allocation42_spill] sm:$0xff] }
 0x2b7   :  { %v1933_v58 = vadd.f32 %v1932_v50, %v1894_v16  ;;  %v6967_v16 = vld [vmem:[#allocation46_spill] sm:$0xff]  ;;  %v6968_v50 = vld [vmem:[#allocation48_spill] sm:$0xff] }
 0x2ca   :  { %v2038_v54 = vpop.f32.mrf.mxu3 }
 0x2d2   :  { %v2001_v53 = vpop.f32.mrf.mxu2 }
 0x2d3   :  { %v2002_v13 = vadd.f32 %v2001_v53, %v1933_v58  ;;  %v5931_v58 = vpop.permute.xlu2 %2235  ;;  %v6969_v53 = vld [vmem:[#allocation50_spill] sm:$0xff] }
 0x2d4   :  { %vm2237_vm5 = vcmp.eq.s32.totalorder %v5351_v61, %v5931_v58  ;;  %v6977_v58 = vld [vmem:[#allocation23_spill] sm:$0xff] }
 0x2d5   :  { %v2039_v51 = vadd.f32 %v2038_v54, %v2002_v13  ;;  %v6970_v13 = vld [vmem:[#allocation9_spill] sm:$0xff]  ;;  %v6971_v54 = vld [vmem:[#allocation10_spill] sm:$0xff] }
 0x2d7   :  { %v2046_v40 = vsel %vm777_vm2, %v2039_v51, 0 }
 0x2d8   :  { %v2068_v10 = vand.u32 4294901760, %v2046_v40 }
 0x2da   :  { %v2069_v56 = vsub.f32 %v2046_v40, %v2068_v10  ;;  %2114 = vmatmul.f32.vlgmr.msrb.gmra.mxu1 %v2068_v10  ;;  %v6972_v40 = vld [vmem:[#allocation11_spill] sm:$0xff] }
 0x2db   :  { %2221 = vmatpush.msrb.mxu1 %v2060_v1  ;;  %v6958_v1 = vld [vmem:[#allocation19_spill] sm:$0xff] }
 0x2dc   :  { %v2070_v0 = vand.u32 4294901760, %v2069_v56 }
 0x2dd   :  { %2223 = vmatpush.msrb.mxu1 %v2062_v24 }
 0x2de   :  { %v2071_v36 = vsub.f32 %v2069_v56, %v2070_v0 }
 0x2df   :  { %2225 = vmatpush.msrb.mxu1 %v2064_v6  ;;  %v6959_v6 = vld [vmem:[#allocation22_spill] sm:$0xff] }
 0x2e0   :  { %v2072_v46 = vand.u32 4294901760, %v2071_v36  ;;  %v6976_v36 = vld [vmem:[#allocation20_spill] sm:$0xff] }
 0x2e1   :  { %2227 = vmatpush.msrb.mxu1 %v2066_v49  ;;  %v6961_v49 = vld [vmem:[#allocation27_spill] sm:$0xff] }
 0x2e2   :  { %2073 = vmatmul.f32.vlgmr.msrb.gmra.mxu0 %v2072_v46  ;;  %2171 = vmatmul.f32.vlgmr.msra.gmra.mxu1 %v2070_v0  ;;  %v6975_v0 = vld [vmem:[#allocation17_spill] sm:$0xff] }
 0x2e3   :  { %2286 = vmatpush.msra.mxu1 %v6926_v32  ;;  %2190 = vmatpush.msrb.mxu0 %v2091_v17  ;;  %v4795_v17 = vsel %vm2237_vm5, 1.0, %v6887_v41 }
 0x2e4   :  { %v2273_v24 = vsub.f32 %v4795_v17, %v4795_v17  ;;  %v6978_v17 = vld [vmem:[#allocation28_spill] sm:$0xff] }
 0x2e5   :  { %2292 = vmatpush.msra.mxu1 %v6928_v63  ;;  %2194 = vmatpush.msrb.mxu0 %v2097_v42  ;;  %v6960_v42 = vld [vmem:[#allocation25_spill] sm:$0xff] }
 0x2e6   :  { %2432 = vmatmul.f32.vlgmr.msra.gmra.mxu2 %v2273_v24  ;;  %v2274_v46 = vand.u32 4294901760, %v2273_v24 }
 0x2e7   :  { %2298 = vmatpush.msra.mxu1 %v6930_v25  ;;  %2198 = vmatpush.msrb.mxu0 %v2103_v47  ;;  %v6962_v47 = vld [vmem:[#allocation31_spill] sm:$0xff] }
 0x2e8   :  { %2471 = vmatmul.f32.vlgmr.msra.gmra.mxu3 %v2274_v46  ;;  %v2275_v51 = vsub.f32 %v2273_v24, %v2274_v46  ;;  %v6979_v24 = vld [vmem:[#allocation30_spill] sm:$0xff]  ;;  %v6980_v46 = vld [vmem:[#allocation32_spill] sm:$0xff] }
 0x2e9   :  { %2304 = vmatpush.msra.mxu1 %v6931_v31  ;;  %2202 = vmatpush.msrb.mxu0 %v2109_v33 }
 0x2ea   :  { %2144 = vmatmul.f32.vlgmr.msra.gmra.mxu0 %v2069_v56  ;;  %2229 = vmatmul.f32.vlgmr.msrb.gmra.mxu1 %v2068_v10  ;;  %v2276_v33 = vand.u32 4294901760, %v2275_v51  ;;  %v6974_v56 = vld [vmem:[#allocation15_spill] sm:$0xff] }
 0x2eb   :  { %2241 = vmatpush.msra.mxu0 %v5012_v14  ;;  %2310 = vmatpush.msra.mxu1 %v6932_v15  ;;  %v6981_v51 = vld [vmem:[#allocation35_spill] sm:$0xff] }
 0x2ed   :  { %2243 = vmatpush.msra.mxu0 %v5017_v18  ;;  %2316 = vmatpush.msra.mxu1 %v6933_v37 }
 0x2ef   :  { %2245 = vmatpush.msra.mxu0 %v5026_v22  ;;  %2322 = vmatpush.msra.mxu1 %v6934_v2 }
 0x2f1   :  { %2247 = vmatpush.msra.mxu0 %v5035_v26  ;;  %2328 = vmatpush.msra.mxu1 %v6935_v27 }
 0x2f2   :  { %2204 = vmatmul.f32.vlgmr.msrb.gmra.mxu0 %v2068_v10  ;;  %v6973_v10 = vld [vmem:[#allocation13_spill] sm:$0xff] }
 0x2f3   :  { %2249 = vmatpush.msra.mxu0 %v5046_v30  ;;  %2334 = vmatpush.msra.mxu1 %v6936_v11 }
 0x2f5   :  { %2251 = vmatpush.msra.mxu0 %v5054_v34  ;;  %2340 = vmatpush.msra.mxu1 %v5219_v60 }
 0x2f7   :  { %2253 = vmatpush.msra.mxu0 %v5067_v39  ;;  %2346 = vmatpush.msra.mxu1 %v6893_v9 }
 0x2f9   :  { %2255 = vmatpush.msra.mxu0 %v5078_v44  ;;  %2352 = vmatpush.msra.mxu1 %v6894_v5 }
 0x2fb   :  { %2257 = vmatpush.msra.mxu0 %v5112_v59  ;;  %2358 = vmatpush.msra.mxu1 %v6895_v45 }
 0x2fd   :  { %2259 = vmatpush.msra.mxu0 %v5118_v62  ;;  %2364 = vmatpush.msra.mxu1 %v6896_v38 }
 0x2ff   :  { %2261 = vmatpush.msra.mxu0 %v5130_v3  ;;  %2370 = vmatpush.msra.mxu1 %v6897_v35 }
 0x301   :  { %2263 = vmatpush.msra.mxu0 %v5142_v7  ;;  %2376 = vmatpush.msra.mxu1 %v6898_v29 }
 0x302   :  { %4796 = vmatmul.msk.f32.vlgmr.msra.gmra.mxu1 %vm2237_vm5, %v6886_v55 }
 0x303   :  { %2545 = vmatpush.msrb.mxu1 %v5012_v14  ;;  %2265 = vmatpush.msra.mxu0 %v5157_v12 }
 0x305   :  { %2547 = vmatpush.msrb.mxu1 %v5017_v18  ;;  %2267 = vmatpush.msra.mxu0 %v5212_v52 }
 0x307   :  { %2549 = vmatpush.msrb.mxu1 %v5026_v22  ;;  %2269 = vmatpush.msra.mxu0 %v5215_v57 }
 0x309   :  { %2551 = vmatpush.msrb.mxu1 %v5035_v26  ;;  %2271 = vmatpush.msra.mxu0 %v5227_v8 }
 0x30a   :  { %2277 = vmatmul.f32.vlgmr.msra.gmra.mxu0 %v2276_v33  ;;  %v6982_v33 = vld [vmem:[#allocation38_spill] sm:$0xff] }
 0x30b   :  { %2478 = vmatpush.msrb.mxu0 %v5039_v28  ;;  %2553 = vmatpush.msrb.mxu1 %v5046_v30 }
 0x30d   :  { %2482 = vmatpush.msrb.mxu0 %v6937_v48  ;;  %2555 = vmatpush.msrb.mxu1 %v5054_v34 }
 0x30f   :  { %2486 = vmatpush.msrb.mxu0 %v6938_v23  ;;  %2557 = vmatpush.msrb.mxu1 %v5067_v39 }
 0x311   :  { %2490 = vmatpush.msrb.mxu0 %v6939_v19  ;;  %2559 = vmatpush.msrb.mxu1 %v5078_v44 }
 0x313   :  { %2494 = vmatpush.msrb.mxu0 %v6958_v1  ;;  %2561 = vmatpush.msrb.mxu1 %v5112_v59 }
 0x315   :  { %2498 = vmatpush.msrb.mxu0 %v6959_v6  ;;  %2563 = vmatpush.msrb.mxu1 %v5118_v62 }
 0x317   :  { %2502 = vmatpush.msrb.mxu0 %v6960_v42  ;;  %2565 = vmatpush.msrb.mxu1 %v5130_v3 }
 0x319   :  { %2506 = vmatpush.msrb.mxu0 %v6961_v49  ;;  %2567 = vmatpush.msrb.mxu1 %v5142_v7 }
 0x31b   :  { %2510 = vmatpush.msrb.mxu0 %v6962_v47  ;;  %2569 = vmatpush.msrb.mxu1 %v5157_v12 }
 0x31d   :  { %2514 = vmatpush.msrb.mxu0 %v6963_v43  ;;  %2571 = vmatpush.msrb.mxu1 %v5212_v52 }
 0x31f   :  { %2518 = vmatpush.msrb.mxu0 %v6964_v21  ;;  %2573 = vmatpush.msrb.mxu1 %v5215_v57 }
 0x321   :  { %2522 = vmatpush.msrb.mxu0 %v6965_v4  ;;  %2575 = vmatpush.msrb.mxu1 %v5227_v8  ;;  %v2583_v4 = vld [vmem:[#allocation2 + $0x90] sm:$0xff] }
 0x322   :  { %4798 = vmatmul.msk.f32.vlgmr.msrb.gmra.mxu1 %vm2237_vm5, %v6886_v55  ;;  %v2602_v21 = vand.u32 4294901760, %v2583_v4 }
 0x323   :  { %2526 = vmatpush.msrb.mxu0 %v6966_v20  ;;  %2977 = vmatpush.msra.mxu1 %v5012_v14 }
 0x325   :  { %2530 = vmatpush.msrb.mxu0 %v6967_v16  ;;  %2979 = vmatpush.msra.mxu1 %v5017_v18 }
 0x327   :  { %2534 = vmatpush.msrb.mxu0 %v6968_v50  ;;  %2981 = vmatpush.msra.mxu1 %v5026_v22 }
 0x329   :  { %2538 = vmatpush.msrb.mxu0 %v6969_v53  ;;  %2983 = vmatpush.msra.mxu1 %v5035_v26 }
 0x32a   :  { %4797 = vmatmul.msk.f32.vlgmr.msrb.gmra.mxu0 %vm2237_vm5, %v6886_v55 }
 0x32b   :  { %2924 = vmatpush.msra.mxu0 %v6970_v13  ;;  %2985 = vmatpush.msra.mxu1 %v5046_v30 }
 0x32d   :  { %2927 = vmatpush.msra.mxu0 %v6971_v54  ;;  %2987 = vmatpush.msra.mxu1 %v5054_v34 }
 0x32f   :  { %2930 = vmatpush.msra.mxu0 %v6972_v40  ;;  %2989 = vmatpush.msra.mxu1 %v5067_v39 }
 0x331   :  { %2933 = vmatpush.msra.mxu0 %v6973_v10  ;;  %2991 = vmatpush.msra.mxu1 %v5078_v44 }
 0x333   :  { %2936 = vmatpush.msra.mxu0 %v6974_v56  ;;  %2993 = vmatpush.msra.mxu1 %v5112_v59 }
 0x335   :  { %2939 = vmatpush.msra.mxu0 %v6975_v0  ;;  %2995 = vmatpush.msra.mxu1 %v5118_v62  ;;  %v4934_v0 = vmov 5  }
 0x336   :  { %4830 = vset.pattern.permute.xlu2 %v4934_v0 }
 0x337   :  { %2942 = vmatpush.msra.mxu0 %v6976_v36  ;;  %2997 = vmatpush.msra.mxu1 %v5130_v3  ;;  %v6984_v36 = vld [vmem:[#allocation44_spill] sm:$0xff] }
 0x339   :  { %2945 = vmatpush.msra.mxu0 %v6977_v58  ;;  %2999 = vmatpush.msra.mxu1 %v5142_v7  ;;  %v6983_v58 = vld [vmem:[#allocation43_spill] sm:$0xff] }
 0x33b   :  { %2948 = vmatpush.msra.mxu0 %v6978_v17  ;;  %3001 = vmatpush.msra.mxu1 %v5157_v12  ;;  %v6985_v17 = vld [vmem:[#allocation47_spill] sm:$0xff] }
 0x33d   :  { %2951 = vmatpush.msra.mxu0 %v6979_v24  ;;  %3003 = vmatpush.msra.mxu1 %v5212_v52  ;;  %v6986_v24 = vld [vmem:[#allocation45_spill] sm:$0xff] }
 0x33e   :  { %2775 = vperm.xlu2 %4830, %v6986_v24   ;;  %v2582_v24 = vld [vmem:[#allocation2 + $0x88] sm:$0xff] }
 0x33f   :  { %2954 = vmatpush.msra.mxu0 %v6980_v46  ;;  %3005 = vmatpush.msra.mxu1 %v5215_v57 }
 0x341   :  { %2957 = vmatpush.msra.mxu0 %v6981_v51  ;;  %3007 = vmatpush.msra.mxu1 %v5227_v8 }
 0x343   :  { %2960 = vmatpush.msra.mxu0 %v6982_v33 }
 0x345   :  { %2963 = vmatpush.msra.mxu0 %v6983_v58  ;;  %v6987_v58 = vld [vmem:[#allocation49_spill] sm:$0xff] }
 0x347   :  { %2966 = vmatpush.msra.mxu0 %v6984_v36  ;;  %v2584_v36 = vld [vmem:[#allocation2 + $0x98] sm:$0xff] }
 0x349   :  { %2969 = vmatpush.msra.mxu0 %v6985_v17  ;;  %v2600_v17 = vand.u32 4294901760, %v2584_v36 }
 0x34b   :  { %v2630_v0 = vsub.f32 %v2584_v36, %v2600_v17  ;;  %2601 = vmatpush.msrb.mxu2 %v2600_v17 }
 0x34d   :  { %v2631_v43 = vand.u32 4294901760, %v2630_v0  ;;  %2603 = vmatpush.msrb.mxu2 %v2602_v21 }
 0x357   :  { %v2115_v56 = vpop.f32.mrf.mxu1 }
 0x35f   :  { %v2074_v46 = vpop.f32.mrf.mxu0  ;;  %v2172_v40 = vpop.f32.mrf.mxu1 }
 0x360   :  { %v2116_v10 = vadd.f32 %v2115_v56, %v2074_v46  ;;  %v2636_v56 = vsub.f32 %v2583_v4, %v2602_v21  ;;  %v2604_v46 = vand.u32 4294901760, %v2582_v24 }
 0x362   :  { %2605 = vmatpush.msrb.mxu2 %v2604_v46 }
 0x367   :  { %v2145_v54 = vpop.f32.mrf.mxu0  ;;  %v2230_v33 = vpop.f32.mrf.mxu1 }
 0x368   :  { %v2146_v51 = vadd.f32 %v2145_v54, %v2116_v10  ;;  %v2581_v54 = vld [vmem:[#allocation2 + $0x80] sm:$0xff]  ;;  %v2637_v10 = vand.u32 4294901760, %v2636_v56 }
 0x36a   :  { %v2173_v13 = vadd.f32 %v2172_v40, %v2146_v51  ;;  %v2632_v40 = vsub.f32 %v2630_v0, %v2631_v43 }
 0x36f   :  { %v2205_v53 = vpop.f32.mrf.mxu0 }
 0x370   :  { %v2206_v50 = vadd.f32 %v2205_v53, %v2173_v13  ;;  %v2642_v53 = vsub.f32 %v2582_v24, %v2604_v46  ;;  %v2606_v13 = vand.u32 4294901760, %v2581_v54 }
 0x372   :  { %v2231_v16 = vadd.f32 %v2230_v33, %v2206_v50  ;;  %v2633_v50 = vand.u32 4294901760, %v2632_v40  ;;  %v2648_v51 = vsub.f32 %v2581_v54, %v2606_v13  ;;  %2607 = vmatpush.msrb.mxu2 %v2606_v13  ;;  %v2433_v40 = vpop.f32.mrf.mxu2 }
 0x374   :  { %v6043_v20 = vadd.f32 %v2231_v16, %v6987_v58  ;;  %v2638_v16 = vsub.f32 %v2636_v56, %v2637_v10  ;;  %v2643_v58 = vand.u32 4294901760, %v2642_v53  ;;  %2672 = vmatpush.msra.mxu2 %v2630_v0  ;;  %2634 = vmatpush.msrb.mxu3 %v2633_v50 }
 0x376   :  { %6988 = vst [vmem:[#allocation51_spill] sm:$0xff] %v6043_v20  ;;  %v2639_v36 = vand.u32 4294901760, %v2638_v16  ;;  %v2644_v33 = vsub.f32 %v2642_v53, %v2643_v58  ;;  %v2649_v20 = vand.u32 4294901760, %v2648_v51  ;;  %2675 = vmatpush.msra.mxu2 %v2636_v56  ;;  %v2472_v16 = vpop.f32.mrf.mxu3 }
 0x378   :  { %2640 = vmatpush.msrb.mxu3 %v2639_v36  ;;  %v2645_v4 = vand.u32 4294901760, %v2644_v33  ;;  %v2650_v47 = vsub.f32 %v2648_v51, %v2649_v20  ;;  %2678 = vmatpush.msra.mxu2 %v2642_v53 }
 0x37a   :  { %2646 = vmatpush.msrb.mxu3 %v2645_v4  ;;  %v2651_v49 = vand.u32 4294901760, %v2650_v47  ;;  %2681 = vmatpush.msra.mxu2 %v2648_v51 }
 0x37c   :  { %2652 = vmatpush.msrb.mxu3 %v2651_v49 }
 0x37e   :  { %2701 = vmatpush.msra.mxu3 %v2600_v17 }
 0x37f   :  { %v2379_v54 = vpop.f32.mrf.mxu1 }
 0x380   :  { %2703 = vmatpush.msra.mxu3 %v2602_v21 }
 0x382   :  { %2705 = vmatpush.msra.mxu3 %v2604_v46 }
 0x384   :  { %2707 = vmatpush.msra.mxu3 %v2606_v13 }
 0x387   :  { %v2278_v24 = vpop.f32.mrf.mxu0 }
 0x388   :  { %v2380_v0 = vadd.f32 %v2379_v54, %v2278_v24  ;;  %v6994_v24 = vld [vmem:[#allocation34_spill] sm:$0xff]  ;;  %v6995_v54 = vld [vmem:[#allocation37_spill] sm:$0xff] }
 0x38a   :  { %v2434_v50 = vadd.f32 %v2433_v40, %v2380_v0  ;;  %v6996_v0 = vld [vmem:[#allocation40_spill] sm:$0xff]  ;;  %v6997_v40 = vld [vmem:[#allocation42_spill] sm:$0xff] }
 0x38c   :  { %v2473_v42 = vadd.f32 %v2472_v16, %v2434_v50  ;;  %v6998_v50 = vld [vmem:[#allocation46_spill] sm:$0xff]  ;;  %v6999_v16 = vld [vmem:[#allocation48_spill] sm:$0xff] }
 0x39f   :  { %v2578_v33 = vpop.f32.mrf.mxu1 }
 0x3a7   :  { %v2541_v56 = vpop.f32.mrf.mxu0 }
 0x3a8   :  { %v2542_v36 = vadd.f32 %v2541_v56, %v2473_v42  ;;  %v7000_v56 = vld [vmem:[#allocation50_spill] sm:$0xff] }
 0x3aa   :  { %v2579_v6 = vadd.f32 %v2578_v33, %v2542_v36  ;;  %v7001_v36 = vld [vmem:[#allocation9_spill] sm:$0xff]  ;;  %v7002_v33 = vld [vmem:[#allocation10_spill] sm:$0xff] }
 0x3ac   :  { %v2586_v53 = vsel %vm777_vm2, %v2579_v6, 0  ;;  %v6049_v6 = vpop.permute.xlu2 %2775 }
 0x3ad   :  { %v2608_v47 = vand.u32 4294901760, %v2586_v53  ;;  %vm2777_vm6 = vcmp.eq.s32.totalorder %v5351_v61, %v6049_v6  ;;  %v7008_v6 = vld [vmem:[#allocation23_spill] sm:$0xff] }
 0x3af   :  { %v2609_v51 = vsub.f32 %v2586_v53, %v2608_v47  ;;  %2654 = vmatmul.f32.vlgmr.msrb.gmra.mxu3 %v2608_v47  ;;  %v7003_v53 = vld [vmem:[#allocation11_spill] sm:$0xff] }
 0x3b0   :  { %2761 = vmatpush.msrb.mxu3 %v2600_v17  ;;  %v6989_v17 = vld [vmem:[#allocation19_spill] sm:$0xff] }
 0x3b1   :  { %v2610_v49 = vand.u32 4294901760, %v2609_v51 }
 0x3b2   :  { %2763 = vmatpush.msrb.mxu3 %v2602_v21 }
 0x3b3   :  { %v2611_v4 = vsub.f32 %v2609_v51, %v2610_v49 }
 0x3b4   :  { %2765 = vmatpush.msrb.mxu3 %v2604_v46  ;;  %v6990_v46 = vld [vmem:[#allocation22_spill] sm:$0xff] }
 0x3b5   :  { %v2612_v1 = vand.u32 4294901760, %v2611_v4  ;;  %v7007_v4 = vld [vmem:[#allocation20_spill] sm:$0xff] }
 0x3b6   :  { %2767 = vmatpush.msrb.mxu3 %v2606_v13  ;;  %v6992_v13 = vld [vmem:[#allocation27_spill] sm:$0xff] }
 0x3b7   :  { %2613 = vmatmul.f32.vlgmr.msrb.gmra.mxu2 %v2612_v1  ;;  %2711 = vmatmul.f32.vlgmr.msra.gmra.mxu3 %v2610_v49  ;;  %v4799_v1 = vsel %vm2777_vm6, 1.0, %v6887_v41  ;;  %v7006_v49 = vld [vmem:[#allocation17_spill] sm:$0xff] }
 0x3b8   :  { %2826 = vmatpush.msra.mxu3 %v6926_v32  ;;  %2730 = vmatpush.msrb.mxu2 %v2631_v43  ;;  %v2813_v42 = vsub.f32 %v4799_v1, %v4799_v1  ;;  %v7009_v1 = vld [vmem:[#allocation28_spill] sm:$0xff] }
 0x3ba   :  { %2832 = vmatpush.msra.mxu3 %v6928_v63  ;;  %2734 = vmatpush.msrb.mxu2 %v2637_v10  ;;  %v2814_v43 = vand.u32 4294901760, %v2813_v42  ;;  %v6991_v10 = vld [vmem:[#allocation25_spill] sm:$0xff] }
 0x3bb   :  { %2972 = vmatmul.f32.vlgmr.msra.gmra.mxu0 %v2813_v42 }
 0x3bc   :  { %2838 = vmatpush.msra.mxu3 %v6930_v25  ;;  %2738 = vmatpush.msrb.mxu2 %v2643_v58  ;;  %v2815_v21 = vsub.f32 %v2813_v42, %v2814_v43  ;;  %v6993_v58 = vld [vmem:[#allocation31_spill] sm:$0xff]  ;;  %v7010_v42 = vld [vmem:[#allocation30_spill] sm:$0xff] }
 0x3bd   :  { %3011 = vmatmul.f32.vlgmr.msra.gmra.mxu1 %v2814_v43  ;;  %v7011_v43 = vld [vmem:[#allocation32_spill] sm:$0xff] }
 0x3be   :  { %2844 = vmatpush.msra.mxu3 %v6931_v31  ;;  %2742 = vmatpush.msrb.mxu2 %v2649_v20  ;;  %v2816_v20 = vand.u32 4294901760, %v2815_v21  ;;  %v7012_v21 = vld [vmem:[#allocation35_spill] sm:$0xff] }
 0x3bf   :  { %2684 = vmatmul.f32.vlgmr.msra.gmra.mxu2 %v2609_v51  ;;  %2769 = vmatmul.f32.vlgmr.msrb.gmra.mxu3 %v2608_v47  ;;  %v7005_v51 = vld [vmem:[#allocation15_spill] sm:$0xff] }
 0x3c0   :  { %2781 = vmatpush.msra.mxu2 %v5012_v14  ;;  %2850 = vmatpush.msra.mxu3 %v6932_v15 }
 0x3c2   :  { %2783 = vmatpush.msra.mxu2 %v5017_v18  ;;  %2856 = vmatpush.msra.mxu3 %v6933_v37 }
 0x3c4   :  { %2785 = vmatpush.msra.mxu2 %v5026_v22  ;;  %2862 = vmatpush.msra.mxu3 %v6934_v2 }
 0x3c6   :  { %2787 = vmatpush.msra.mxu2 %v5035_v26  ;;  %2868 = vmatpush.msra.mxu3 %v6935_v27 }
 0x3c7   :  { %2744 = vmatmul.f32.vlgmr.msrb.gmra.mxu2 %v2608_v47  ;;  %v7004_v47 = vld [vmem:[#allocation13_spill] sm:$0xff] }
 0x3c8   :  { %2789 = vmatpush.msra.mxu2 %v5046_v30  ;;  %2874 = vmatpush.msra.mxu3 %v6936_v11 }
 0x3ca   :  { %2791 = vmatpush.msra.mxu2 %v5054_v34  ;;  %2880 = vmatpush.msra.mxu3 %v5219_v60 }
 0x3cc   :  { %2793 = vmatpush.msra.mxu2 %v5067_v39  ;;  %2886 = vmatpush.msra.mxu3 %v6893_v9 }
 0x3ce   :  { %2795 = vmatpush.msra.mxu2 %v5078_v44  ;;  %2892 = vmatpush.msra.mxu3 %v6894_v5 }
 0x3d0   :  { %2797 = vmatpush.msra.mxu2 %v5112_v59  ;;  %2898 = vmatpush.msra.mxu3 %v6895_v45 }
 0x3d2   :  { %2799 = vmatpush.msra.mxu2 %v5118_v62  ;;  %2904 = vmatpush.msra.mxu3 %v6896_v38 }
 0x3d4   :  { %2801 = vmatpush.msra.mxu2 %v5130_v3  ;;  %2910 = vmatpush.msra.mxu3 %v6897_v35 }
 0x3d6   :  { %2803 = vmatpush.msra.mxu2 %v5142_v7  ;;  %2916 = vmatpush.msra.mxu3 %v6898_v29 }
 0x3d7   :  { %4800 = vmatmul.msk.f32.vlgmr.msra.gmra.mxu3 %vm2777_vm6, %v6886_v55 }
 0x3d8   :  { %3085 = vmatpush.msrb.mxu3 %v5012_v14  ;;  %2805 = vmatpush.msra.mxu2 %v5157_v12 }
 0x3da   :  { %3087 = vmatpush.msrb.mxu3 %v5017_v18  ;;  %2807 = vmatpush.msra.mxu2 %v5212_v52 }
 0x3dc   :  { %3089 = vmatpush.msrb.mxu3 %v5026_v22  ;;  %2809 = vmatpush.msra.mxu2 %v5215_v57 }
 0x3de   :  { %3091 = vmatpush.msrb.mxu3 %v5035_v26  ;;  %2811 = vmatpush.msra.mxu2 %v5227_v8 }
 0x3df   :  { %2817 = vmatmul.f32.vlgmr.msra.gmra.mxu2 %v2816_v20  ;;  %v7013_v20 = vld [vmem:[#allocation38_spill] sm:$0xff] }
 0x3e0   :  { %3018 = vmatpush.msrb.mxu2 %v5039_v28  ;;  %3093 = vmatpush.msrb.mxu3 %v5046_v30 }
 0x3e2   :  { %3022 = vmatpush.msrb.mxu2 %v6937_v48  ;;  %3095 = vmatpush.msrb.mxu3 %v5054_v34 }
 0x3e4   :  { %3026 = vmatpush.msrb.mxu2 %v6938_v23  ;;  %3097 = vmatpush.msrb.mxu3 %v5067_v39 }
 0x3e6   :  { %3030 = vmatpush.msrb.mxu2 %v6939_v19  ;;  %3099 = vmatpush.msrb.mxu3 %v5078_v44 }
 0x3e8   :  { %3034 = vmatpush.msrb.mxu2 %v6989_v17  ;;  %3101 = vmatpush.msrb.mxu3 %v5112_v59 }
 0x3ea   :  { %3038 = vmatpush.msrb.mxu2 %v6990_v46  ;;  %3103 = vmatpush.msrb.mxu3 %v5118_v62 }
 0x3ec   :  { %3042 = vmatpush.msrb.mxu2 %v6991_v10  ;;  %3105 = vmatpush.msrb.mxu3 %v5130_v3 }
 0x3ee   :  { %3046 = vmatpush.msrb.mxu2 %v6992_v13  ;;  %3107 = vmatpush.msrb.mxu3 %v5142_v7 }
 0x3f0   :  { %3050 = vmatpush.msrb.mxu2 %v6993_v58  ;;  %3109 = vmatpush.msrb.mxu3 %v5157_v12 }
 0x3f2   :  { %3054 = vmatpush.msrb.mxu2 %v6994_v24  ;;  %3111 = vmatpush.msrb.mxu3 %v5212_v52 }
 0x3f4   :  { %3058 = vmatpush.msrb.mxu2 %v6995_v54  ;;  %3113 = vmatpush.msrb.mxu3 %v5215_v57 }
 0x3f6   :  { %3062 = vmatpush.msrb.mxu2 %v6996_v0  ;;  %3115 = vmatpush.msrb.mxu3 %v5227_v8 }
 0x3f7   :  { %4802 = vmatmul.msk.f32.vlgmr.msrb.gmra.mxu3 %vm2777_vm6, %v6886_v55 }
 0x3f8   :  { %3066 = vmatpush.msrb.mxu2 %v6997_v40  ;;  %3517 = vmatpush.msra.mxu3 %v5012_v14  ;;  %v3123_v40 = vld [vmem:[#allocation2 + $0xb0] sm:$0xff] }
 0x3f9   :  { %v3142_v54 = vand.u32 4294901760, %v3123_v40 }
 0x3fa   :  { %3070 = vmatpush.msrb.mxu2 %v6998_v50  ;;  %3519 = vmatpush.msra.mxu3 %v5017_v18 }
 0x3fc   :  { %3074 = vmatpush.msrb.mxu2 %v6999_v16  ;;  %3521 = vmatpush.msra.mxu3 %v5026_v22  ;;  %v3124_v16 = vld [vmem:[#allocation2 + $0xb8] sm:$0xff] }
 0x3fd   :  { %v3140_v50 = vand.u32 4294901760, %v3124_v16 }
 0x3fe   :  { %3078 = vmatpush.msrb.mxu2 %v7000_v56  ;;  %3523 = vmatpush.msra.mxu3 %v5035_v26  ;;  %v7018_v56 = vld [vmem:[#allocation51_spill] sm:$0xff] }
 0x3ff   :  { %4801 = vmatmul.msk.f32.vlgmr.msrb.gmra.mxu2 %vm2777_vm6, %v6886_v55  ;;  %v3170_v0 = vsub.f32 %v3124_v16, %v3140_v50  ;;  %3141 = vmatpush.msrb.mxu0 %v3140_v50 }
 0x400   :  { %3464 = vmatpush.msra.mxu2 %v7001_v36  ;;  %3525 = vmatpush.msra.mxu3 %v5046_v30 }
 0x401   :  { %v3171_v24 = vand.u32 4294901760, %v3170_v0  ;;  %3143 = vmatpush.msrb.mxu0 %v3142_v54 }
 0x402   :  { %3467 = vmatpush.msra.mxu2 %v7002_v33  ;;  %3527 = vmatpush.msra.mxu3 %v5054_v34 }
 0x404   :  { %3470 = vmatpush.msra.mxu2 %v7003_v53  ;;  %3529 = vmatpush.msra.mxu3 %v5067_v39 }
 0x406   :  { %3473 = vmatpush.msra.mxu2 %v7004_v47  ;;  %3531 = vmatpush.msra.mxu3 %v5078_v44 }
 0x408   :  { %3476 = vmatpush.msra.mxu2 %v7005_v51  ;;  %3533 = vmatpush.msra.mxu3 %v5112_v59 }
 0x40a   :  { %3479 = vmatpush.msra.mxu2 %v7006_v49  ;;  %3535 = vmatpush.msra.mxu3 %v5118_v62  ;;  %v4935_v49 = vmov 6  }
 0x40b   :  { %4831 = vset.pattern.permute.xlu1 %v4935_v49 }
 0x40c   :  { %3482 = vmatpush.msra.mxu2 %v7007_v4  ;;  %3537 = vmatpush.msra.mxu3 %v5130_v3  ;;  %v7015_v4 = vld [vmem:[#allocation44_spill] sm:$0xff] }
 0x40e   :  { %3485 = vmatpush.msra.mxu2 %v7008_v6  ;;  %3539 = vmatpush.msra.mxu3 %v5142_v7  ;;  %v7014_v6 = vld [vmem:[#allocation43_spill] sm:$0xff] }
 0x410   :  { %3488 = vmatpush.msra.mxu2 %v7009_v1  ;;  %3541 = vmatpush.msra.mxu3 %v5157_v12  ;;  %v7016_v1 = vld [vmem:[#allocation47_spill] sm:$0xff] }
 0x412   :  { %3491 = vmatpush.msra.mxu2 %v7010_v42  ;;  %3543 = vmatpush.msra.mxu3 %v5212_v52 }
 0x414   :  { %3494 = vmatpush.msra.mxu2 %v7011_v43  ;;  %3545 = vmatpush.msra.mxu3 %v5215_v57  ;;  %v6165_v43 = vld [vmem:[%s6702_s0] sm:$0xff] }
 0x415   :  { %7017 = vst [vmem:[#allocation52_spill] sm:$0xff] %v6165_v43  ;;  %3315 = vperm.xlu1 %4831, %v6165_v43   ;;  %v3122_v43 = vld [vmem:[#allocation2 + $0xa8] sm:$0xff] }
 0x416   :  { %3497 = vmatpush.msra.mxu2 %v7012_v21  ;;  %3547 = vmatpush.msra.mxu3 %v5227_v8 }
 0x418   :  { %3500 = vmatpush.msra.mxu2 %v7013_v20 }
 0x41a   :  { %3503 = vmatpush.msra.mxu2 %v7014_v6 }
 0x41c   :  { %3506 = vmatpush.msra.mxu2 %v7015_v4 }
 0x41e   :  { %3509 = vmatpush.msra.mxu2 %v7016_v1 }
 0x432   :  { %v2655_v21 = vpop.f32.mrf.mxu3 }
 0x43a   :  { %v2614_v42 = vpop.f32.mrf.mxu2  ;;  %v2712_v47 = vpop.f32.mrf.mxu3 }
 0x43b   :  { %v2656_v51 = vadd.f32 %v2655_v21, %v2614_v42  ;;  %v3176_v42 = vsub.f32 %v3123_v40, %v3142_v54  ;;  %v3144_v21 = vand.u32 4294901760, %v3122_v43 }
 0x43d   :  { %3145 = vmatpush.msrb.mxu0 %v3144_v21 }
 0x442   :  { %v2685_v20 = vpop.f32.mrf.mxu2  ;;  %v2770_v36 = vpop.f32.mrf.mxu3 }
 0x443   :  { %v2686_v53 = vadd.f32 %v2685_v20, %v2656_v51  ;;  %v3121_v51 = vld [vmem:[#allocation2 + $0xa0] sm:$0xff] }
 0x445   :  { %v2713_v6 = vadd.f32 %v2712_v47, %v2686_v53  ;;  %v3172_v53 = vsub.f32 %v3170_v0, %v3171_v24  ;;  %v3177_v47 = vand.u32 4294901760, %v3176_v42 }
 0x44a   :  { %v2745_v33 = vpop.f32.mrf.mxu2 }
 0x44b   :  { %v2746_v4 = vadd.f32 %v2745_v33, %v2713_v6  ;;  %v3182_v33 = vsub.f32 %v3122_v43, %v3144_v21  ;;  %v3146_v6 = vand.u32 4294901760, %v3121_v51 }
 0x44d   :  { %v2771_v1 = vadd.f32 %v2770_v36, %v2746_v4  ;;  %v3173_v36 = vand.u32 4294901760, %v3172_v53  ;;  %v3183_v4 = vand.u32 4294901760, %v3182_v33  ;;  %3147 = vmatpush.msrb.mxu0 %v3146_v6  ;;  %v2973_v53 = vpop.f32.mrf.mxu0 }
 0x44f   :  { %v6169_v49 = vadd.f32 %v2771_v1, %v7018_v56  ;;  %v3178_v56 = vsub.f32 %v3176_v42, %v3177_v47  ;;  %v3188_v1 = vsub.f32 %v3121_v51, %v3146_v6  ;;  %3212 = vmatpush.msra.mxu0 %v3170_v0  ;;  %3174 = vmatpush.msrb.mxu1 %v3173_v36 }
 0x450   :  { %v3184_v20 = vsub.f32 %v3182_v33, %v3183_v4 }
 0x451   :  { %7019 = vst [vmem:[#allocation53_spill] sm:$0xff] %v6169_v49  ;;  %v3179_v16 = vand.u32 4294901760, %v3178_v56  ;;  %v3189_v49 = vand.u32 4294901760, %v3188_v1  ;;  %3215 = vmatpush.msra.mxu0 %v3176_v42  ;;  %v3012_v56 = vpop.f32.mrf.mxu1 }
 0x452   :  { %v3185_v40 = vand.u32 4294901760, %v3184_v20 }
 0x453   :  { %3180 = vmatpush.msrb.mxu1 %v3179_v16  ;;  %v3190_v58 = vsub.f32 %v3188_v1, %v3189_v49  ;;  %3218 = vmatpush.msra.mxu0 %v3182_v33 }
 0x455   :  { %3186 = vmatpush.msrb.mxu1 %v3185_v40  ;;  %v3191_v13 = vand.u32 4294901760, %v3190_v58  ;;  %3221 = vmatpush.msra.mxu0 %v3188_v1 }
 0x457   :  { %3192 = vmatpush.msrb.mxu1 %v3191_v13 }
 0x459   :  { %3241 = vmatpush.msra.mxu1 %v3140_v50 }
 0x45a   :  { %v2919_v51 = vpop.f32.mrf.mxu3 }
 0x45b   :  { %3243 = vmatpush.msra.mxu1 %v3142_v54 }
 0x45d   :  { %3245 = vmatpush.msra.mxu1 %v3144_v21 }
 0x45f   :  { %3247 = vmatpush.msra.mxu1 %v3146_v6 }
 0x462   :  { %v2818_v43 = vpop.f32.mrf.mxu2 }
 0x463   :  { %v2920_v0 = vadd.f32 %v2919_v51, %v2818_v43  ;;  %v7025_v43 = vld [vmem:[#allocation34_spill] sm:$0xff]  ;;  %v7026_v51 = vld [vmem:[#allocation37_spill] sm:$0xff] }
 0x465   :  { %v2974_v36 = vadd.f32 %v2973_v53, %v2920_v0  ;;  %v7027_v0 = vld [vmem:[#allocation40_spill] sm:$0xff]  ;;  %v7028_v53 = vld [vmem:[#allocation42_spill] sm:$0xff] }
 0x467   :  { %v3013_v10 = vadd.f32 %v3012_v56, %v2974_v36  ;;  %v7029_v36 = vld [vmem:[#allocation46_spill] sm:$0xff]  ;;  %v7030_v56 = vld [vmem:[#allocation48_spill] sm:$0xff] }
 0x47a   :  { %v3118_v20 = vpop.f32.mrf.mxu3 }
 0x482   :  { %v3081_v42 = vpop.f32.mrf.mxu2 }
 0x483   :  { %v3082_v16 = vadd.f32 %v3081_v42, %v3013_v10  ;;  %v7031_v42 = vld [vmem:[#allocation50_spill] sm:$0xff] }
 0x485   :  { %v3119_v46 = vadd.f32 %v3118_v20, %v3082_v16  ;;  %v7032_v16 = vld [vmem:[#allocation9_spill] sm:$0xff]  ;;  %v7033_v20 = vld [vmem:[#allocation10_spill] sm:$0xff] }
 0x487   :  { %v3126_v33 = vsel %vm777_vm2, %v3119_v46, 0 }
 0x488   :  { %v3148_v58 = vand.u32 4294901760, %v3126_v33 }
 0x48a   :  { %v3149_v1 = vsub.f32 %v3126_v33, %v3148_v58  ;;  %3194 = vmatmul.f32.vlgmr.msrb.gmra.mxu1 %v3148_v58  ;;  %v7034_v33 = vld [vmem:[#allocation11_spill] sm:$0xff] }
 0x48b   :  { %3301 = vmatpush.msrb.mxu1 %v3140_v50 }
 0x48c   :  { %v3150_v13 = vand.u32 4294901760, %v3149_v1 }
 0x48d   :  { %3303 = vmatpush.msrb.mxu1 %v3142_v54 }
 0x48e   :  { %v3151_v40 = vsub.f32 %v3149_v1, %v3150_v13 }
 0x48f   :  { %3305 = vmatpush.msrb.mxu1 %v3144_v21  ;;  %v7021_v21 = vld [vmem:[#allocation22_spill] sm:$0xff] }
 0x490   :  { %v3152_v17 = vand.u32 4294901760, %v3151_v40  ;;  %v7038_v40 = vld [vmem:[#allocation20_spill] sm:$0xff] }
 0x491   :  { %3307 = vmatpush.msrb.mxu1 %v3146_v6  ;;  %v7023_v6 = vld [vmem:[#allocation27_spill] sm:$0xff] }
 0x492   :  { %3153 = vmatmul.f32.vlgmr.msrb.gmra.mxu0 %v3152_v17  ;;  %3251 = vmatmul.f32.vlgmr.msra.gmra.mxu1 %v3150_v13  ;;  %v6178_v17 = vpop.permute.xlu1 %3315  ;;  %v7037_v13 = vld [vmem:[#allocation17_spill] sm:$0xff] }
 0x493   :  { %3366 = vmatpush.msra.mxu1 %v6926_v32  ;;  %3270 = vmatpush.msrb.mxu0 %v3171_v24  ;;  %vm3317_vm7 = vcmp.eq.s32.totalorder %v5351_v61, %v6178_v17  ;;  %v7039_v17 = vld [vmem:[#allocation23_spill] sm:$0xff] }
 0x494   :  { %v4803_v46 = vsel %vm3317_vm7, 1.0, %v6887_v41 }
 0x495   :  { %3372 = vmatpush.msra.mxu1 %v6928_v63  ;;  %3274 = vmatpush.msrb.mxu0 %v3177_v47  ;;  %v3353_v10 = vsub.f32 %v4803_v46, %v4803_v46  ;;  %v7022_v47 = vld [vmem:[#allocation25_spill] sm:$0xff]  ;;  %v7040_v46 = vld [vmem:[#allocation28_spill] sm:$0xff] }
 0x497   :  { %3378 = vmatpush.msra.mxu1 %v6930_v25  ;;  %3278 = vmatpush.msrb.mxu0 %v3183_v4  ;;  %v3354_v24 = vand.u32 4294901760, %v3353_v10  ;;  %v7024_v4 = vld [vmem:[#allocation31_spill] sm:$0xff] }
 0x498   :  { %3512 = vmatmul.f32.vlgmr.msra.gmra.mxu2 %v3353_v10 }
 0x499   :  { %3384 = vmatpush.msra.mxu1 %v6931_v31  ;;  %3282 = vmatpush.msrb.mxu0 %v3189_v49  ;;  %v3355_v54 = vsub.f32 %v3353_v10, %v3354_v24  ;;  %v7020_v49 = vld [vmem:[#allocation19_spill] sm:$0xff]  ;;  %v7041_v10 = vld [vmem:[#allocation30_spill] sm:$0xff] }
 0x49a   :  { %3224 = vmatmul.f32.vlgmr.msra.gmra.mxu0 %v3149_v1  ;;  %3309 = vmatmul.f32.vlgmr.msrb.gmra.mxu1 %v3148_v58  ;;  %v7036_v1 = vld [vmem:[#allocation15_spill] sm:$0xff] }
 0x49b   :  { %3321 = vmatpush.msra.mxu0 %v5012_v14  ;;  %3390 = vmatpush.msra.mxu1 %v6932_v15  ;;  %v3356_v50 = vand.u32 4294901760, %v3355_v54  ;;  %v7043_v54 = vld [vmem:[#allocation35_spill] sm:$0xff] }
 0x49c   :  { %3551 = vmatmul.f32.vlgmr.msra.gmra.mxu3 %v3354_v24  ;;  %v7042_v24 = vld [vmem:[#allocation32_spill] sm:$0xff] }
 0x49d   :  { %3323 = vmatpush.msra.mxu0 %v5017_v18  ;;  %3396 = vmatpush.msra.mxu1 %v6933_v37 }
 0x49f   :  { %3325 = vmatpush.msra.mxu0 %v5026_v22  ;;  %3402 = vmatpush.msra.mxu1 %v6934_v2 }
 0x4a1   :  { %3327 = vmatpush.msra.mxu0 %v5035_v26  ;;  %3408 = vmatpush.msra.mxu1 %v6935_v27 }
 0x4a2   :  { %3284 = vmatmul.f32.vlgmr.msrb.gmra.mxu0 %v3148_v58  ;;  %v7035_v58 = vld [vmem:[#allocation13_spill] sm:$0xff] }
 0x4a3   :  { %3329 = vmatpush.msra.mxu0 %v5046_v30  ;;  %3414 = vmatpush.msra.mxu1 %v6936_v11 }
 0x4a5   :  { %3331 = vmatpush.msra.mxu0 %v5054_v34  ;;  %3420 = vmatpush.msra.mxu1 %v5219_v60 }
 0x4a7   :  { %3333 = vmatpush.msra.mxu0 %v5067_v39  ;;  %3426 = vmatpush.msra.mxu1 %v6893_v9 }
 0x4a9   :  { %3335 = vmatpush.msra.mxu0 %v5078_v44  ;;  %3432 = vmatpush.msra.mxu1 %v6894_v5 }
 0x4ab   :  { %3337 = vmatpush.msra.mxu0 %v5112_v59  ;;  %3438 = vmatpush.msra.mxu1 %v6895_v45 }
 0x4ad   :  { %3339 = vmatpush.msra.mxu0 %v5118_v62  ;;  %3444 = vmatpush.msra.mxu1 %v6896_v38 }
 0x4af   :  { %3341 = vmatpush.msra.mxu0 %v5130_v3  ;;  %3450 = vmatpush.msra.mxu1 %v6897_v35 }
 0x4b1   :  { %3343 = vmatpush.msra.mxu0 %v5142_v7  ;;  %3456 = vmatpush.msra.mxu1 %v6898_v29 }
 0x4b2   :  { %4804 = vmatmul.msk.f32.vlgmr.msra.gmra.mxu1 %vm3317_vm7, %v6886_v55 }
 0x4b3   :  { %3625 = vmatpush.msrb.mxu1 %v5012_v14  ;;  %3345 = vmatpush.msra.mxu0 %v5157_v12 }
 0x4b5   :  { %3627 = vmatpush.msrb.mxu1 %v5017_v18  ;;  %3347 = vmatpush.msra.mxu0 %v5212_v52 }
 0x4b7   :  { %3629 = vmatpush.msrb.mxu1 %v5026_v22  ;;  %3349 = vmatpush.msra.mxu0 %v5215_v57 }
 0x4b9   :  { %3631 = vmatpush.msrb.mxu1 %v5035_v26  ;;  %3351 = vmatpush.msra.mxu0 %v5227_v8 }
 0x4ba   :  { %3357 = vmatmul.f32.vlgmr.msra.gmra.mxu0 %v3356_v50  ;;  %v7044_v50 = vld [vmem:[#allocation38_spill] sm:$0xff] }
 0x4bb   :  { %3558 = vmatpush.msrb.mxu0 %v5039_v28  ;;  %3633 = vmatpush.msrb.mxu1 %v5046_v30 }
 0x4bd   :  { %3562 = vmatpush.msrb.mxu0 %v6937_v48  ;;  %3635 = vmatpush.msrb.mxu1 %v5054_v34 }
 0x4bf   :  { %3566 = vmatpush.msrb.mxu0 %v6938_v23  ;;  %3637 = vmatpush.msrb.mxu1 %v5067_v39 }
 0x4c1   :  { %3570 = vmatpush.msrb.mxu0 %v6939_v19  ;;  %3639 = vmatpush.msrb.mxu1 %v5078_v44 }
 0x4c3   :  { %3574 = vmatpush.msrb.mxu0 %v7020_v49  ;;  %3641 = vmatpush.msrb.mxu1 %v5112_v59 }
 0x4c5   :  { %3578 = vmatpush.msrb.mxu0 %v7021_v21  ;;  %3643 = vmatpush.msrb.mxu1 %v5118_v62 }
 0x4c7   :  { %3582 = vmatpush.msrb.mxu0 %v7022_v47  ;;  %3645 = vmatpush.msrb.mxu1 %v5130_v3 }
 0x4c9   :  { %3586 = vmatpush.msrb.mxu0 %v7023_v6  ;;  %3647 = vmatpush.msrb.mxu1 %v5142_v7 }
 0x4cb   :  { %3590 = vmatpush.msrb.mxu0 %v7024_v4  ;;  %3649 = vmatpush.msrb.mxu1 %v5157_v12 }
 0x4cd   :  { %3594 = vmatpush.msrb.mxu0 %v7025_v43  ;;  %3651 = vmatpush.msrb.mxu1 %v5212_v52 }
 0x4cf   :  { %3598 = vmatpush.msrb.mxu0 %v7026_v51  ;;  %3653 = vmatpush.msrb.mxu1 %v5215_v57 }
 0x4d1   :  { %3602 = vmatpush.msrb.mxu0 %v7027_v0  ;;  %3655 = vmatpush.msrb.mxu1 %v5227_v8  ;;  %v3663_v0 = vld [vmem:[#allocation2 + $0xd0] sm:$0xff] }
 0x4d2   :  { %4806 = vmatmul.msk.f32.vlgmr.msrb.gmra.mxu1 %vm3317_vm7, %v6886_v55  ;;  %v3682_v51 = vand.u32 4294901760, %v3663_v0 }
 0x4d3   :  { %3606 = vmatpush.msrb.mxu0 %v7028_v53  ;;  %4057 = vmatpush.msra.mxu1 %v5012_v14 }
 0x4d5   :  { %3610 = vmatpush.msrb.mxu0 %v7029_v36  ;;  %4059 = vmatpush.msra.mxu1 %v5017_v18  ;;  %v7049_v36 = vld [vmem:[#allocation53_spill] sm:$0xff] }
 0x4d7   :  { %3614 = vmatpush.msrb.mxu0 %v7030_v56  ;;  %4061 = vmatpush.msra.mxu1 %v5026_v22 }
 0x4d9   :  { %3618 = vmatpush.msrb.mxu0 %v7031_v42  ;;  %4063 = vmatpush.msra.mxu1 %v5035_v26 }
 0x4da   :  { %4805 = vmatmul.msk.f32.vlgmr.msrb.gmra.mxu0 %vm3317_vm7, %v6886_v55 }
 0x4db   :  { %4004 = vmatpush.msra.mxu0 %v7032_v16  ;;  %4065 = vmatpush.msra.mxu1 %v5046_v30  ;;  %v7045_v16 = vld [vmem:[#allocation43_spill] sm:$0xff] }
 0x4dd   :  { %4007 = vmatpush.msra.mxu0 %v7033_v20  ;;  %4067 = vmatpush.msra.mxu1 %v5054_v34  ;;  %v7046_v20 = vld [vmem:[#allocation44_spill] sm:$0xff] }
 0x4df   :  { %4010 = vmatpush.msra.mxu0 %v7034_v33  ;;  %4069 = vmatpush.msra.mxu1 %v5067_v39  ;;  %v7047_v33 = vld [vmem:[#allocation47_spill] sm:$0xff] }
 0x4e1   :  { %4013 = vmatpush.msra.mxu0 %v7035_v58  ;;  %4071 = vmatpush.msra.mxu1 %v5078_v44  ;;  %v4936_v58 = vmov 7  }
 0x4e2   :  { %4832 = vset.pattern.permute.xlu2 %v4936_v58  ;;  %4833 = vset.pattern.permute.xlu0 %v4936_v58 }
 0x4e3   :  { %4016 = vmatpush.msra.mxu0 %v7036_v1  ;;  %4073 = vmatpush.msra.mxu1 %v5112_v59  ;;  %v7048_v1 = vld [vmem:[#allocation52_spill] sm:$0xff] }
 0x4e4   :  { %3855 = vperm.xlu2 %4832, %v7048_v1   ;;  %v3662_v1 = vld [vmem:[#allocation2 + $0xc8] sm:$0xff] }
 0x4e5   :  { %4019 = vmatpush.msra.mxu0 %v7037_v13  ;;  %4075 = vmatpush.msra.mxu1 %v5118_v62 }
 0x4e7   :  { %4022 = vmatpush.msra.mxu0 %v7038_v40  ;;  %4077 = vmatpush.msra.mxu1 %v5130_v3 }
 0x4e9   :  { %4025 = vmatpush.msra.mxu0 %v7039_v17  ;;  %4079 = vmatpush.msra.mxu1 %v5142_v7 }
 0x4eb   :  { %4028 = vmatpush.msra.mxu0 %v7040_v46  ;;  %4081 = vmatpush.msra.mxu1 %v5157_v12 }
 0x4ed   :  { %4031 = vmatpush.msra.mxu0 %v7041_v10  ;;  %4083 = vmatpush.msra.mxu1 %v5212_v52 }
 0x4ef   :  { %4034 = vmatpush.msra.mxu0 %v7042_v24  ;;  %4085 = vmatpush.msra.mxu1 %v5215_v57 }
 0x4f1   :  { %4037 = vmatpush.msra.mxu0 %v7043_v54  ;;  %4087 = vmatpush.msra.mxu1 %v5227_v8 }
 0x4f3   :  { %4040 = vmatpush.msra.mxu0 %v7044_v50 }
 0x4f5   :  { %4043 = vmatpush.msra.mxu0 %v7045_v16 }
 0x4f7   :  { %4046 = vmatpush.msra.mxu0 %v7046_v20 }
 0x4f9   :  { %4049 = vmatpush.msra.mxu0 %v7047_v33  ;;  %v3664_v33 = vld [vmem:[#allocation2 + $0xd8] sm:$0xff] }
 0x4fa   :  { %v3680_v53 = vand.u32 4294901760, %v3664_v33 }
 0x4fc   :  { %v3710_v58 = vsub.f32 %v3664_v33, %v3680_v53  ;;  %3681 = vmatpush.msrb.mxu2 %v3680_v53 }
 0x4fe   :  { %v3711_v43 = vand.u32 4294901760, %v3710_v58  ;;  %3683 = vmatpush.msrb.mxu2 %v3682_v51 }
 0x507   :  { %v3195_v13 = vpop.f32.mrf.mxu1 }
 0x50f   :  { %v3154_v40 = vpop.f32.mrf.mxu0  ;;  %v3252_v46 = vpop.f32.mrf.mxu1 }
 0x510   :  { %v3196_v17 = vadd.f32 %v3195_v13, %v3154_v40  ;;  %v3716_v13 = vsub.f32 %v3663_v0, %v3682_v51  ;;  %v3684_v40 = vand.u32 4294901760, %v3662_v1 }
 0x512   :  { %3685 = vmatpush.msrb.mxu2 %v3684_v40 }
 0x517   :  { %v3225_v10 = vpop.f32.mrf.mxu0  ;;  %v3310_v56 = vpop.f32.mrf.mxu1 }
 0x518   :  { %v3226_v24 = vadd.f32 %v3225_v10, %v3196_v17  ;;  %v3661_v17 = vld [vmem:[#allocation2 + $0xc0] sm:$0xff]  ;;  %v3717_v10 = vand.u32 4294901760, %v3716_v13 }
 0x51a   :  { %v3253_v54 = vadd.f32 %v3252_v46, %v3226_v24  ;;  %v3712_v46 = vsub.f32 %v3710_v58, %v3711_v43  ;;  %v3686_v24 = vand.u32 4294901760, %v3661_v17 }
 0x51c   :  { %3687 = vmatpush.msrb.mxu2 %v3686_v24 }
 0x51e   :  { %3752 = vmatpush.msra.mxu2 %v3710_v58 }
 0x51f   :  { %v3285_v42 = vpop.f32.mrf.mxu0 }
 0x520   :  { %v3286_v50 = vadd.f32 %v3285_v42, %v3253_v54  ;;  %v3722_v42 = vsub.f32 %v3662_v1, %v3684_v40  ;;  %3755 = vmatpush.msra.mxu2 %v3716_v13 }
 0x522   :  { %v3311_v16 = vadd.f32 %v3310_v56, %v3286_v50  ;;  %v3713_v56 = vand.u32 4294901760, %v3712_v46  ;;  %v3723_v54 = vand.u32 4294901760, %v3722_v42  ;;  %v3728_v50 = vsub.f32 %v3661_v17, %v3686_v24  ;;  %3758 = vmatpush.msra.mxu2 %v3722_v42  ;;  %v3513_v46 = vpop.f32.mrf.mxu2 }
 0x524   :  { %v6290_v20 = vadd.f32 %v3311_v16, %v7049_v36  ;;  %v3718_v36 = vsub.f32 %v3716_v13, %v3717_v10  ;;  %3714 = vmatpush.msrb.mxu3 %v3713_v56  ;;  %v3724_v33 = vsub.f32 %v3722_v42, %v3723_v54  ;;  %3761 = vmatpush.msra.mxu2 %v3728_v50 }
 0x526   :  { %7050 = vst [vmem:[#allocation54_spill] sm:$0xff] %v6290_v20  ;;  %v3719_v16 = vand.u32 4294901760, %v3718_v36  ;;  %v3729_v20 = vand.u32 4294901760, %v3728_v50  ;;  %v3725_v0 = vand.u32 4294901760, %v3724_v33  ;;  %v3552_v36 = vpop.f32.mrf.mxu3 }
 0x528   :  { %3720 = vmatpush.msrb.mxu3 %v3719_v16  ;;  %v3730_v4 = vsub.f32 %v3728_v50, %v3729_v20 }
 0x52a   :  { %3726 = vmatpush.msrb.mxu3 %v3725_v0  ;;  %v3731_v6 = vand.u32 4294901760, %v3730_v4 }
 0x52c   :  { %3732 = vmatpush.msrb.mxu3 %v3731_v6 }
 0x52e   :  { %3781 = vmatpush.msra.mxu3 %v3680_v53 }
 0x52f   :  { %v3459_v17 = vpop.f32.mrf.mxu1 }
 0x530   :  { %3783 = vmatpush.msra.mxu3 %v3682_v51 }
 0x532   :  { %3785 = vmatpush.msra.mxu3 %v3684_v40 }
 0x534   :  { %3787 = vmatpush.msra.mxu3 %v3686_v24 }
 0x537   :  { %v3358_v1 = vpop.f32.mrf.mxu0 }
 0x538   :  { %v3460_v58 = vadd.f32 %v3459_v17, %v3358_v1 }
 0x53a   :  { %v3514_v56 = vadd.f32 %v3513_v46, %v3460_v58 }
 0x53c   :  { %v3553_v47 = vadd.f32 %v3552_v36, %v3514_v56 }
 0x54f   :  { %v3658_v33 = vpop.f32.mrf.mxu1 }
 0x557   :  { %v3621_v13 = vpop.f32.mrf.mxu0 }
 0x558   :  { %v3622_v16 = vadd.f32 %v3621_v13, %v3553_v47 }
 0x55a   :  { %v3659_v21 = vadd.f32 %v3658_v33, %v3622_v16 }
 0x55c   :  { %v3666_v42 = vsel %vm777_vm2, %v3659_v21, 0  ;;  %v6296_v21 = vpop.permute.xlu2 %3855 }
 0x55d   :  { %v3688_v4 = vand.u32 4294901760, %v3666_v42  ;;  %vm3857_vm8 = vcmp.eq.s32.totalorder %v5351_v61, %v6296_v21  ;;  %v4414_v21 = vld [vmem:[%s6706_s4 + $0x70] sm:$0xff] }
 0x55f   :  { %v3689_v50 = vsub.f32 %v3666_v42, %v3688_v4  ;;  %3734 = vmatmul.f32.vlgmr.msrb.gmra.mxu3 %v3688_v4 }
 0x560   :  { %3841 = vmatpush.msrb.mxu3 %v3680_v53 }
 0x561   :  { %v3690_v6 = vand.u32 4294901760, %v3689_v50 }
 0x562   :  { %3843 = vmatpush.msrb.mxu3 %v3682_v51 }
 0x563   :  { %v3691_v0 = vsub.f32 %v3689_v50, %v3690_v6 }
 0x564   :  { %3845 = vmatpush.msrb.mxu3 %v3684_v40 }
 0x565   :  { %v3692_v49 = vand.u32 4294901760, %v3691_v0  ;;  %v4415_v0 = vld [vmem:[%s6706_s4 + $0x78] sm:$0xff] }
 0x566   :  { %3847 = vmatpush.msrb.mxu3 %v3686_v24 }
 0x567   :  { %3693 = vmatmul.f32.vlgmr.msrb.gmra.mxu2 %v3692_v49  ;;  %3791 = vmatmul.f32.vlgmr.msra.gmra.mxu3 %v3690_v6  ;;  %v4201_v49 = vld [vmem:[#allocation2 + $0xe0] sm:$0xff] }
 0x568   :  { %3906 = vmatpush.msra.mxu3 %v6926_v32  ;;  %3810 = vmatpush.msrb.mxu2 %v3711_v43  ;;  %v4807_v32 = vsel %vm3857_vm8, 1.0, %v6887_v41  ;;  %v6402_v53 = vand.u32 4294901760, %v4201_v49 }
 0x56a   :  { %3912 = vmatpush.msra.mxu3 %v6928_v63  ;;  %3814 = vmatpush.msrb.mxu2 %v3717_v10  ;;  %v3893_v63 = vsub.f32 %v4807_v32, %v4807_v32  ;;  %v6410_v24 = vsub.f32 %v4201_v49, %v6402_v53  ;;  %v4413_v32 = vld [vmem:[%s6706_s4 + $0x68] sm:$0xff] }
 0x56c   :  { %3918 = vmatpush.msra.mxu3 %v6930_v25  ;;  %3818 = vmatpush.msrb.mxu2 %v3723_v54  ;;  %v3894_v25 = vand.u32 4294901760, %v3893_v63  ;;  %v4269_v17 = vand.u32 4294901760, %v6410_v24 }
 0x56d   :  { %4052 = vmatmul.f32.vlgmr.msra.gmra.mxu0 %v3893_v63 }
 0x56e   :  { %3924 = vmatpush.msra.mxu3 %v6931_v31  ;;  %3822 = vmatpush.msrb.mxu2 %v3729_v20  ;;  %v7063_v31 = vld [vmem:[#allocation54_spill] sm:$0xff]  ;;  %v4270_v46 = vsub.f32 %v6410_v24, %v4269_v17 }
 0x56f   :  { %3764 = vmatmul.f32.vlgmr.msra.gmra.mxu2 %v3689_v50  ;;  %3849 = vmatmul.f32.vlgmr.msrb.gmra.mxu3 %v3688_v4 }
 0x570   :  { %3861 = vmatpush.msra.mxu2 %v5012_v14  ;;  %3930 = vmatpush.msra.mxu3 %v6932_v15  ;;  %v4271_v56 = vand.u32 4294901760, %v4270_v46 }
 0x571   :  { %4091 = vmatmul.f32.vlgmr.msra.gmra.mxu1 %v3894_v25 }
 0x572   :  { %3863 = vmatpush.msra.mxu2 %v5017_v18  ;;  %3936 = vmatpush.msra.mxu3 %v6933_v37  ;;  %v4204_v37 = vld [vmem:[#allocation2 + $0xf8] sm:$0xff] }
 0x574   :  { %3865 = vmatpush.msra.mxu2 %v5026_v22  ;;  %3942 = vmatpush.msra.mxu3 %v6934_v2  ;;  %v6380_v2 = vand.u32 4294901760, %v4204_v37 }
 0x576   :  { %3867 = vmatpush.msra.mxu2 %v5035_v26  ;;  %3948 = vmatpush.msra.mxu3 %v6935_v27  ;;  %v4203_v27 = vld [vmem:[#allocation2 + $0xf0] sm:$0xff]  ;;  %v6383_v61 = vsub.f32 %v4204_v37, %v6380_v2 }
 0x577   :  { %3824 = vmatmul.f32.vlgmr.msrb.gmra.mxu2 %v3688_v4  ;;  %4221 = vmatpush.msrb.mxu0 %v6380_v2 }
 0x578   :  { %3869 = vmatpush.msra.mxu2 %v5046_v30  ;;  %3954 = vmatpush.msra.mxu3 %v6936_v11  ;;  %v4202_v11 = vld [vmem:[#allocation2 + $0xe8] sm:$0xff] }
 0x57a   :  { %3871 = vmatpush.msra.mxu2 %v5054_v34  ;;  %3960 = vmatpush.msra.mxu3 %v5219_v60  ;;  %v3895_v60 = vsub.f32 %v3893_v63, %v3894_v25  ;;  %v6437_v25 = vand.u32 4294901760, %v4415_v0 }
 0x57c   :  { %3873 = vmatpush.msra.mxu2 %v5067_v39  ;;  %3966 = vmatpush.msra.mxu3 %v6893_v9  ;;  %v3896_v9 = vand.u32 4294901760, %v3895_v60  ;;  %v6439_v60 = vand.u32 4294901760, %v4414_v21 }
 0x57e   :  { %3875 = vmatpush.msra.mxu2 %v5078_v44  ;;  %3972 = vmatpush.msra.mxu3 %v6894_v5 }
 0x580   :  { %3877 = vmatpush.msra.mxu2 %v5112_v59  ;;  %3978 = vmatpush.msra.mxu3 %v6895_v45 }
 0x582   :  { %3879 = vmatpush.msra.mxu2 %v5118_v62  ;;  %3984 = vmatpush.msra.mxu3 %v6896_v38 }
 0x584   :  { %3881 = vmatpush.msra.mxu2 %v5130_v3  ;;  %3990 = vmatpush.msra.mxu3 %v6897_v35 }
 0x586   :  { %3883 = vmatpush.msra.mxu2 %v5142_v7  ;;  %3996 = vmatpush.msra.mxu3 %v6898_v29 }
 0x587   :  { %4808 = vmatmul.msk.f32.vlgmr.msra.gmra.mxu3 %vm3857_vm8, %v6886_v55 }
 0x588   :  { %4165 = vmatpush.msrb.mxu3 %v5012_v14  ;;  %3885 = vmatpush.msra.mxu2 %v5157_v12  ;;  %v7051_v14 = vld [vmem:[#allocation19_spill] sm:$0xff] }
 0x58a   :  { %4167 = vmatpush.msrb.mxu3 %v5017_v18  ;;  %3887 = vmatpush.msra.mxu2 %v5212_v52  ;;  %v7052_v18 = vld [vmem:[#allocation22_spill] sm:$0xff] }
 0x58c   :  { %4169 = vmatpush.msrb.mxu3 %v5026_v22  ;;  %3889 = vmatpush.msra.mxu2 %v5215_v57  ;;  %v7053_v22 = vld [vmem:[#allocation25_spill] sm:$0xff] }
 0x58e   :  { %4171 = vmatpush.msrb.mxu3 %v5035_v26  ;;  %3891 = vmatpush.msra.mxu2 %v5227_v8  ;;  %v7054_v26 = vld [vmem:[#allocation27_spill] sm:$0xff] }
 0x58f   :  { %3897 = vmatmul.f32.vlgmr.msra.gmra.mxu2 %v3896_v9  ;;  %v6441_v9 = vand.u32 4294901760, %v4413_v32 }
 0x590   :  { %4098 = vmatpush.msrb.mxu2 %v5039_v28  ;;  %4173 = vmatpush.msrb.mxu3 %v5046_v30  ;;  %v7055_v28 = vld [vmem:[#allocation31_spill] sm:$0xff]  ;;  %v7056_v30 = vld [vmem:[#allocation34_spill] sm:$0xff] }
 0x592   :  { %4102 = vmatpush.msrb.mxu2 %v6937_v48  ;;  %4175 = vmatpush.msrb.mxu3 %v5054_v34  ;;  %v7057_v34 = vld [vmem:[#allocation37_spill] sm:$0xff]  ;;  %v4251_v48 = vand.u32 4294901760, %v6383_v61 }
 0x594   :  { %4106 = vmatpush.msrb.mxu2 %v6938_v23  ;;  %4177 = vmatpush.msrb.mxu3 %v5067_v39  ;;  %v7058_v39 = vld [vmem:[#allocation40_spill] sm:$0xff]  ;;  %v4252_v47 = vsub.f32 %v6383_v61, %v4251_v48 }
 0x596   :  { %4110 = vmatpush.msrb.mxu2 %v6939_v19  ;;  %4179 = vmatpush.msrb.mxu3 %v5078_v44  ;;  %v7059_v44 = vld [vmem:[#allocation42_spill] sm:$0xff]  ;;  %v6392_v19 = vand.u32 4294901760, %v4202_v11  ;;  %v4253_v20 = vand.u32 4294901760, %v4252_v47 }
 0x598   :  { %4114 = vmatpush.msrb.mxu2 %v7051_v14  ;;  %4181 = vmatpush.msrb.mxu3 %v5112_v59  ;;  %v7060_v59 = vld [vmem:[#allocation46_spill] sm:$0xff]  ;;  %v6400_v51 = vsub.f32 %v4202_v11, %v6392_v19  ;;  %v4412_v14 = vld [vmem:[%s6706_s4 + $0x60] sm:$0xff] }
 0x599   :  { %4254 = vmatpush.msrb.mxu1 %v4253_v20 }
 0x59a   :  { %4118 = vmatpush.msrb.mxu2 %v7052_v18  ;;  %4183 = vmatpush.msrb.mxu3 %v5118_v62  ;;  %v7061_v62 = vld [vmem:[#allocation48_spill] sm:$0xff]  ;;  %v4263_v10 = vand.u32 4294901760, %v6400_v51 }
 0x59c   :  { %4122 = vmatpush.msrb.mxu2 %v7053_v22  ;;  %4185 = vmatpush.msrb.mxu3 %v5130_v3  ;;  %v7062_v3 = vld [vmem:[#allocation50_spill] sm:$0xff]  ;;  %v4264_v1 = vsub.f32 %v6400_v51, %v4263_v10 }
 0x59d   :  { %v4411_v22 = vld [vmem:[%s6706_s4 + $0x58] sm:$0xff] }
 0x59e   :  { %4126 = vmatpush.msrb.mxu2 %v7054_v26  ;;  %4187 = vmatpush.msrb.mxu3 %v5142_v7  ;;  %v4265_v58 = vand.u32 4294901760, %v4264_v1  ;;  %v4407_v1 = vld [vmem:[%s6706_s4 + $0x38] sm:$0xff] }
 0x59f   :  { %v6553_v46 = vand.u32 4294901760, %v4407_v1 }
 0x5a0   :  { %4130 = vmatpush.msrb.mxu2 %v7055_v28  ;;  %4189 = vmatpush.msrb.mxu3 %v5157_v12  ;;  %v6450_v28 = vsub.f32 %v4415_v0, %v6437_v25 }
 0x5a2   :  { %4134 = vmatpush.msrb.mxu2 %v7056_v30  ;;  %4191 = vmatpush.msrb.mxu3 %v5212_v52  ;;  %v6453_v30 = vsub.f32 %v4414_v21, %v6439_v60 }
 0x5a4   :  { %4138 = vmatpush.msrb.mxu2 %v7057_v34  ;;  %4193 = vmatpush.msrb.mxu3 %v5215_v57  ;;  %v6455_v34 = vand.u32 4294901760, %v4412_v14 }
 0x5a6   :  { %4142 = vmatpush.msrb.mxu2 %v7058_v39  ;;  %4195 = vmatpush.msrb.mxu3 %v5227_v8  ;;  %v4410_v39 = vld [vmem:[%s6706_s4 + $0x50] sm:$0xff] }
 0x5a7   :  { %4810 = vmatmul.msk.f32.vlgmr.msrb.gmra.mxu3 %vm3857_vm8, %v6886_v55 }
 0x5a8   :  { %4146 = vmatpush.msrb.mxu2 %v7059_v44  ;;  %4617 = vmatpush.msra.mxu3 %v6437_v25 }
 0x5aa   :  { %4150 = vmatpush.msrb.mxu2 %v7060_v59  ;;  %v4463_v59 = vand.u32 4294901760, %v6450_v28  ;;  %4619 = vmatpush.msra.mxu3 %v6439_v60 }
 0x5ac   :  { %4154 = vmatpush.msrb.mxu2 %v7061_v62  ;;  %v6464_v62 = vsub.f32 %v4413_v32, %v6441_v9  ;;  %4621 = vmatpush.msra.mxu3 %v6441_v9  ;;  %v4404_v32 = vld [vmem:[%s6706_s4 + $0x20] sm:$0xff] }
 0x5ae   :  { %4158 = vmatpush.msrb.mxu2 %v7062_v3  ;;  %v6466_v3 = vand.u32 4294901760, %v4411_v22  ;;  %4623 = vmatpush.msra.mxu3 %v6455_v34 }
 0x5af   :  { %4809 = vmatmul.msk.f32.vlgmr.msrb.gmra.mxu2 %vm3857_vm8, %v6886_v55  ;;  %v6385_v55 = vand.u32 4294901760, %v4203_v27 }
 0x5b0   :  { %4564 = vmatpush.msra.mxu2 %v6450_v28  ;;  %4625 = vmatpush.msra.mxu3 %v6466_v3 }
 0x5b1   :  { %v6390_v23 = vsub.f32 %v4203_v27, %v6385_v55  ;;  %4223 = vmatpush.msrb.mxu0 %v6385_v55 }
 0x5b2   :  { %4567 = vmatpush.msra.mxu2 %v6453_v30 }
 0x5b3   :  { %v4257_v43 = vand.u32 4294901760, %v6390_v23  ;;  %4225 = vmatpush.msrb.mxu0 %v6392_v19 }
 0x5b4   :  { %4570 = vmatpush.msra.mxu2 %v6464_v62 }
 0x5b5   :  { %v4258_v40 = vsub.f32 %v6390_v23, %v4257_v43  ;;  %4227 = vmatpush.msrb.mxu0 %v6402_v53 }
 0x5b7   :  { %4292 = vmatpush.msra.mxu0 %v6383_v61  ;;  %v4259_v54 = vand.u32 4294901760, %v4258_v40 }
 0x5b9   :  { %4295 = vmatpush.msra.mxu0 %v6390_v23  ;;  %4260 = vmatpush.msrb.mxu1 %v4259_v54  ;;  %v4409_v23 = vld [vmem:[%s6706_s4 + $0x48] sm:$0xff] }
 0x5bb   :  { %4298 = vmatpush.msra.mxu0 %v6400_v51  ;;  %4266 = vmatpush.msrb.mxu1 %v4265_v58  ;;  %v4408_v51 = vld [vmem:[%s6706_s4 + $0x40] sm:$0xff] }
 0x5bd   :  { %4301 = vmatpush.msra.mxu0 %v6410_v24  ;;  %4272 = vmatpush.msrb.mxu1 %v4271_v56  ;;  %v6542_v24 = vand.u32 4294901760, %v4408_v51  ;;  %v4406_v56 = vld [vmem:[%s6706_s4 + $0x30] sm:$0xff] }
 0x5bf   :  { %4321 = vmatpush.msra.mxu1 %v6380_v2  ;;  %v6551_v58 = vsub.f32 %v4408_v51, %v6542_v24 }
 0x5c1   :  { %4323 = vmatpush.msra.mxu1 %v6385_v55 }
 0x5c3   :  { %4325 = vmatpush.msra.mxu1 %v6392_v19 }
 0x5c5   :  { %4327 = vmatpush.msra.mxu1 %v6402_v53 }
 0x5e2   :  { %v3735_v7 = vpop.f32.mrf.mxu3 }
 0x5ea   :  { %v3694_v12 = vpop.f32.mrf.mxu2  ;;  %v3792_v57 = vpop.f32.mrf.mxu3 }
 0x5eb   :  { %v3736_v52 = vadd.f32 %v3735_v7, %v3694_v12  ;;  %v4053_v33 = vpop.f32.mrf.mxu0  ;;  %v4469_v12 = vand.u32 4294901760, %v6453_v30 }
 0x5ee   :  { %v4092_v4 = vpop.f32.mrf.mxu1 }
 0x5f2   :  { %v3765_v8 = vpop.f32.mrf.mxu2  ;;  %v3850_v35 = vpop.f32.mrf.mxu3 }
 0x5f3   :  { %v3766_v41 = vadd.f32 %v3765_v8, %v3736_v52  ;;  %v6472_v52 = vsub.f32 %v4412_v14, %v6455_v34 }
 0x5f5   :  { %v3793_v5 = vadd.f32 %v3792_v57, %v3766_v41  ;;  %v6474_v57 = vand.u32 4294901760, %v4410_v39  ;;  %v4464_v41 = vsub.f32 %v6450_v28, %v4463_v59  ;;  %4573 = vmatpush.msra.mxu2 %v6472_v52 }
 0x5f7   :  { %4627 = vmatpush.msra.mxu3 %v6474_v57 }
 0x5fa   :  { %v3825_v45 = vpop.f32.mrf.mxu2 }
 0x5fb   :  { %v3826_v38 = vadd.f32 %v3825_v45, %v3793_v5  ;;  %v4475_v5 = vand.u32 4294901760, %v6464_v62  ;;  %v6484_v45 = vsub.f32 %v4411_v22, %v6466_v3  ;;  %v6595_v22 = vand.u32 4294901760, %v4404_v32 }
 0x5fd   :  { %v3851_v29 = vadd.f32 %v3850_v35, %v3826_v38  ;;  %v4470_v35 = vsub.f32 %v6453_v30, %v4469_v12  ;;  %v4476_v27 = vsub.f32 %v6464_v62, %v4475_v5  ;;  %4576 = vmatpush.msra.mxu2 %v6484_v45 }
 0x5ff   :  { %v6378_v15 = vadd.f32 %v3851_v29, %v7063_v31  ;;  %v4481_v29 = vand.u32 4294901760, %v6472_v52  ;;  %v6494_v31 = vsub.f32 %v4410_v39, %v6474_v57  ;;  %v4471_v49 = vand.u32 4294901760, %v4470_v35  ;;  %v4403_v39 = vld [vmem:[%s6706_s4 + $0x18] sm:$0xff]  ;;  %v4402_v35 = vld [vmem:[%s6706_s4 + $0x10] sm:$0xff] }
 0x600   :  { %v4477_v20 = vand.u32 4294901760, %v4476_v27 }
 0x601   :  { %v4482_v47 = vsub.f32 %v6472_v52, %v4481_v29  ;;  %4579 = vmatpush.msra.mxu2 %v6494_v31 }
 0x603   :  { %v4483_v40 = vand.u32 4294901760, %v4482_v47  ;;  %v4401_v47 = vld [vmem:[%s6706_s4 + $0x8] sm:$0xff] }
 0x60a   :  { %v3999_v13 = vpop.f32.mrf.mxu3 }
 0x612   :  { %v3898_v36 = vpop.f32.mrf.mxu2 }
 0x613   :  { %v4000_v16 = vadd.f32 %v3999_v13, %v3898_v36  ;;  %v4505_v13 = vand.u32 4294901760, %v6551_v58 }
 0x615   :  { %v4054_v42 = vadd.f32 %v4053_v33, %v4000_v16  ;;  %v6566_v16 = vsub.f32 %v4407_v1, %v6553_v46  ;;  %v6568_v33 = vand.u32 4294901760, %v4406_v56 }
 0x617   :  { %v4093_v50 = vadd.f32 %v4092_v4, %v4054_v42  ;;  %v4405_v42 = vld [vmem:[%s6706_s4 + $0x28] sm:$0xff]  ;;  %v6581_v0 = vsub.f32 %v4406_v56, %v6568_v33 }
 0x618   :  { %v6585_v21 = vand.u32 4294901760, %v4405_v42 }
 0x62a   :  { %v4198_v18 = vpop.f32.mrf.mxu3 }
 0x632   :  { %v4161_v6 = vpop.f32.mrf.mxu2 }
 0x633   :  { %v4162_v63 = vadd.f32 %v4161_v6, %v4093_v50  ;;  %v4506_v50 = vsub.f32 %v6551_v58, %v4505_v13  ;;  %v4511_v6 = vand.u32 4294901760, %v6566_v16 }
 0x635   :  { %v4199_v26 = vadd.f32 %v4198_v18, %v4162_v63  ;;  %v4507_v63 = vand.u32 4294901760, %v4506_v50  ;;  %v4512_v14 = vsub.f32 %v6566_v16, %v4511_v6  ;;  %v4517_v18 = vand.u32 4294901760, %v6581_v0 }
 0x637   :  { %v4206_v44 = vsel %vm777_vm2, %v4199_v26, 0  ;;  %v6599_v26 = vsub.f32 %v4405_v42, %v6585_v21 }
 0x638   :  { %v4228_v7 = vand.u32 4294901760, %v4206_v44 }
 0x63a   :  { %v4229_v8 = vsub.f32 %v4206_v44, %v4228_v7  ;;  %4274 = vmatmul.f32.vlgmr.msrb.gmra.mxu1 %v4228_v7  ;;  %v4513_v44 = vand.u32 4294901760, %v4512_v14 }
 0x63b   :  { %4381 = vmatpush.msrb.mxu1 %v6380_v2  ;;  %v4465_v2 = vand.u32 4294901760, %v4464_v41  ;;  %v6612_v41 = vand.u32 4294901760, %v4403_v39 }
 0x63c   :  { %v4230_v38 = vand.u32 4294901760, %v4229_v8 }
 0x63d   :  { %4383 = vmatpush.msrb.mxu1 %v6385_v55  ;;  %v4487_v55 = vand.u32 4294901760, %v6484_v45  ;;  %v6622_v27 = vsub.f32 %v4403_v39, %v6612_v41 }
 0x63e   :  { %v4231_v37 = vsub.f32 %v4229_v8, %v4230_v38 }
 0x63f   :  { %4385 = vmatpush.msrb.mxu1 %v6392_v19  ;;  %v4493_v19 = vand.u32 4294901760, %v6494_v31 }
 0x640   :  { %v4232_v11 = vand.u32 4294901760, %v4231_v37 }
 0x641   :  { %4387 = vmatpush.msrb.mxu1 %v6402_v53  ;;  %v4488_v53 = vsub.f32 %v6484_v45, %v4487_v55  ;;  %v4494_v54 = vsub.f32 %v6494_v31, %v4493_v19 }
 0x642   :  { %4233 = vmatmul.f32.vlgmr.msrb.gmra.mxu0 %v4232_v11  ;;  %4331 = vmatmul.f32.vlgmr.msra.gmra.mxu1 %v4230_v38  ;;  %v4523_v38 = vand.u32 4294901760, %v6599_v26  ;;  %v6624_v11 = vand.u32 4294901760, %v4402_v35 }
 0x643   :  { %4350 = vmatpush.msrb.mxu0 %v4251_v48  ;;  %4466 = vmatpush.msra.mxu1 %v4465_v2  ;;  %v4489_v61 = vand.u32 4294901760, %v4488_v53  ;;  %v4495_v48 = vand.u32 4294901760, %v4494_v54  ;;  %v4535_v53 = vand.u32 4294901760, %v6622_v27  ;;  %v6640_v54 = vand.u32 4294901760, %v4401_v47 }
 0x645   :  { %4354 = vmatpush.msrb.mxu0 %v4257_v43  ;;  %4472 = vmatpush.msra.mxu1 %v4471_v49  ;;  %v6534_v43 = vand.u32 4294901760, %v4409_v23  ;;  %v4524_v49 = vsub.f32 %v6599_v26, %v4523_v38  ;;  %v4536_v51 = vsub.f32 %v6622_v27, %v4535_v53  ;;  %v4546_v56 = vsub.f32 %v4401_v47, %v6640_v54 }
 0x647   :  { %4358 = vmatpush.msrb.mxu0 %v4263_v10  ;;  %4478 = vmatpush.msra.mxu1 %v4477_v20  ;;  %v6540_v10 = vsub.f32 %v4409_v23, %v6534_v43  ;;  %v4537_v42 = vand.u32 4294901760, %v4536_v51  ;;  %v4547_v50 = vand.u32 4294901760, %v4546_v56 }
 0x648   :  { %4629 = vmatpush.msra.mxu3 %v6534_v43 }
 0x649   :  { %4362 = vmatpush.msrb.mxu0 %v4269_v17  ;;  %4484 = vmatpush.msra.mxu1 %v4483_v40  ;;  %v4499_v17 = vand.u32 4294901760, %v6540_v10  ;;  %v4540_v40 = vsub.f32 %v4402_v35, %v6624_v11  ;;  %v4548_v14 = vsub.f32 %v4546_v56, %v4547_v50 }
 0x64a   :  { %4304 = vmatmul.f32.vlgmr.msra.gmra.mxu0 %v4229_v8  ;;  %4389 = vmatmul.f32.vlgmr.msrb.gmra.mxu1 %v4228_v7  ;;  %v6610_v8 = vsub.f32 %v4404_v32, %v6595_v22 }
 0x64b   :  { %4421 = vmatpush.msra.mxu0 %v6437_v25  ;;  %4490 = vmatpush.msra.mxu1 %v4489_v61  ;;  %v4500_v36 = vsub.f32 %v6540_v10, %v4499_v17  ;;  %v4525_v61 = vand.u32 4294901760, %v4524_v49  ;;  %v4541_v1 = vand.u32 4294901760, %v4540_v40 }
 0x64c   :  { %4582 = vmatpush.msra.mxu2 %v6540_v10  ;;  %4631 = vmatpush.msra.mxu3 %v6542_v24  ;;  %v4529_v2 = vand.u32 4294901760, %v6610_v8 }
 0x64d   :  { %4423 = vmatpush.msra.mxu0 %v6439_v60  ;;  %4496 = vmatpush.msra.mxu1 %v4495_v48  ;;  %v4501_v4 = vand.u32 4294901760, %v4500_v36  ;;  %v4400_v48 = vld [vmem:[%s6706_s4] sm:$0xff] }
 0x64e   :  { %4585 = vmatpush.msra.mxu2 %v6551_v58  ;;  %4633 = vmatpush.msra.mxu3 %v6553_v46  ;;  %v4530_v20 = vsub.f32 %v6610_v8, %v4529_v2  ;;  %v4450_v36 = vand.u32 4294901760, %v4400_v48 }
 0x64f   :  { %4425 = vmatpush.msra.mxu0 %v6441_v9  ;;  %4502 = vmatpush.msra.mxu1 %v4501_v4  ;;  %v4542_v4 = vsub.f32 %v4540_v40, %v4541_v1 }
 0x650   :  { %4588 = vmatpush.msra.mxu2 %v6566_v16  ;;  %4635 = vmatpush.msra.mxu3 %v6568_v33  ;;  %v4531_v23 = vand.u32 4294901760, %v4530_v20  ;;  %v4552_v32 = vsub.f32 %v4400_v48, %v4450_v36 }
 0x651   :  { %4427 = vmatpush.msra.mxu0 %v6455_v34  ;;  %4508 = vmatpush.msra.mxu1 %v4507_v63  ;;  %v4543_v63 = vand.u32 4294901760, %v4542_v4 }
 0x652   :  { %4364 = vmatmul.f32.vlgmr.msrb.gmra.mxu0 %v4228_v7  ;;  %4591 = vmatpush.msra.mxu2 %v6581_v0  ;;  %v4518_v7 = vsub.f32 %v6581_v0, %v4517_v18  ;;  %v4553_v39 = vand.u32 4294901760, %v4552_v32 }
 0x653   :  { %4429 = vmatpush.msra.mxu0 %v6466_v3  ;;  %4637 = vmatpush.msra.mxu3 %v6585_v21 }
 0x654   :  { %4594 = vmatpush.msra.mxu2 %v6599_v26  ;;  %4514 = vmatpush.msra.mxu1 %v4513_v44  ;;  %v4519_v37 = vand.u32 4294901760, %v4518_v7  ;;  %v4549_v44 = vand.u32 4294901760, %v4548_v14  ;;  %v4554_v7 = vsub.f32 %v4552_v32, %v4553_v39 }
 0x655   :  { %4431 = vmatpush.msra.mxu0 %v6474_v57  ;;  %4639 = vmatpush.msra.mxu3 %v6595_v22 }
 0x656   :  { %4597 = vmatpush.msra.mxu2 %v6610_v8  ;;  %4520 = vmatpush.msra.mxu1 %v4519_v37  ;;  %v4555_v35 = vand.u32 4294901760, %v4554_v7 }
 0x657   :  { %4433 = vmatpush.msra.mxu0 %v6534_v43  ;;  %4641 = vmatpush.msra.mxu3 %v6612_v41 }
 0x658   :  { %4600 = vmatpush.msra.mxu2 %v6622_v27  ;;  %4526 = vmatpush.msra.mxu1 %v4525_v61 }
 0x659   :  { %4435 = vmatpush.msra.mxu0 %v6542_v24  ;;  %4643 = vmatpush.msra.mxu3 %v6624_v11 }
 0x65a   :  { %4603 = vmatpush.msra.mxu2 %v4540_v40  ;;  %4532 = vmatpush.msra.mxu1 %v4531_v23 }
 0x65b   :  { %4437 = vmatpush.msra.mxu0 %v6553_v46  ;;  %4645 = vmatpush.msra.mxu3 %v6640_v54 }
 0x65c   :  { %4606 = vmatpush.msra.mxu2 %v4546_v56  ;;  %4538 = vmatpush.msra.mxu1 %v4537_v42 }
 0x65d   :  { %4439 = vmatpush.msra.mxu0 %v6568_v33  ;;  %4647 = vmatpush.msra.mxu3 %v4450_v36 }
 0x65e   :  { %4609 = vmatpush.msra.mxu2 %v4552_v32  ;;  %4544 = vmatpush.msra.mxu1 %v4543_v63 }
 0x65f   :  { %4441 = vmatpush.msra.mxu0 %v6585_v21 }
 0x660   :  { %4550 = vmatpush.msra.mxu1 %v4549_v44 }
 0x661   :  { %4443 = vmatpush.msra.mxu0 %v6595_v22 }
 0x662   :  { %4556 = vmatpush.msra.mxu1 %v4555_v35 }
 0x663   :  { %4445 = vmatpush.msra.mxu0 %v6612_v41 }
 0x664   :  { %4725 = vmatpush.msrb.mxu1 %v6437_v25 }
 0x665   :  { %4447 = vmatpush.msra.mxu0 %v6624_v11 }
 0x666   :  { %4727 = vmatpush.msrb.mxu1 %v6439_v60 }
 0x667   :  { %4449 = vmatpush.msra.mxu0 %v6640_v54 }
 0x668   :  { %4729 = vmatpush.msrb.mxu1 %v6441_v9 }
 0x669   :  { %4451 = vmatpush.msra.mxu0 %v4450_v36 }
 0x66a   :  { %4731 = vmatpush.msrb.mxu1 %v6455_v34 }
 0x66b   :  { %4658 = vmatpush.msrb.mxu0 %v4463_v59 }
 0x66c   :  { %4733 = vmatpush.msrb.mxu1 %v6466_v3 }
 0x66d   :  { %4662 = vmatpush.msrb.mxu0 %v4469_v12 }
 0x66e   :  { %4735 = vmatpush.msrb.mxu1 %v6474_v57  ;;  %v4834_v57 = vld [vmem:[%s6705_s3] ss:$0 sm:$0xff]  ;;  %s4937_s3 = smov [#allocation5]  }
 0x66f   :  { %4666 = vmatpush.msrb.mxu0 %v4475_v5  ;;  %s4767_s22 = sshll.u32 %s4937_s3, 4  ;;  %s4768_s22 = int_to_ptr.vmem [resolvable:$true] %s4767_s22 }
 0x670   :  { %4737 = vmatpush.msrb.mxu1 %v6534_v43 }
 0x671   :  { %4670 = vmatpush.msrb.mxu0 %v4481_v29 }
 0x672   :  { %4739 = vmatpush.msrb.mxu1 %v6542_v24  ;;  %v4835_v24 = vld [vmem:[%s6707_s5] ss:$0 sm:$0xff] }
 0x673   :  { %4674 = vmatpush.msrb.mxu0 %v4487_v55 }
 0x674   :  { %4741 = vmatpush.msrb.mxu1 %v6553_v46 }
 0x675   :  { %4678 = vmatpush.msrb.mxu0 %v4493_v19 }
 0x676   :  { %4743 = vmatpush.msrb.mxu1 %v6568_v33 }
 0x677   :  { %4682 = vmatpush.msrb.mxu0 %v4499_v17 }
 0x678   :  { %4745 = vmatpush.msrb.mxu1 %v6585_v21 }
 0x679   :  { %4686 = vmatpush.msrb.mxu0 %v4505_v13 }
 0x67a   :  { %4747 = vmatpush.msrb.mxu1 %v6595_v22 }
 0x67b   :  { %4690 = vmatpush.msrb.mxu0 %v4511_v6 }
 0x67c   :  { %4749 = vmatpush.msrb.mxu1 %v6612_v41 }
 0x67d   :  { %4694 = vmatpush.msrb.mxu0 %v4517_v18 }
 0x67e   :  { %4751 = vmatpush.msrb.mxu1 %v6624_v11 }
 0x67f   :  { %4698 = vmatpush.msrb.mxu0 %v4523_v38 }
 0x680   :  { %4753 = vmatpush.msrb.mxu1 %v6640_v54 }
 0x681   :  { %4702 = vmatpush.msrb.mxu0 %v4529_v2 }
 0x682   :  { %4755 = vmatpush.msrb.mxu1 %v4450_v36 }
 0x683   :  { %4706 = vmatpush.msrb.mxu0 %v4535_v53 }
 0x685   :  { %4710 = vmatpush.msrb.mxu0 %v4541_v1 }
 0x687   :  { %4714 = vmatpush.msrb.mxu0 %v4547_v50 }
 0x689   :  { %4718 = vmatpush.msrb.mxu0 %v4553_v39 }
 0x6b7   :  { %v4275_v25 = vpop.f32.mrf.mxu1 }
 0x6bf   :  { %v4234_v60 = vpop.f32.mrf.mxu0  ;;  %v4332_v9 = vpop.f32.mrf.mxu1 }
 0x6c0   :  { %v4276_v30 = vadd.f32 %v4275_v25, %v4234_v60 }
 0x6c7   :  { %v4305_v28 = vpop.f32.mrf.mxu0  ;;  %v4390_v12 = vpop.f32.mrf.mxu1 }
 0x6c8   :  { %v4306_v34 = vadd.f32 %v4305_v28, %v4276_v30 }
 0x6ca   :  { %v4333_v59 = vadd.f32 %v4332_v9, %v4306_v34 }
 0x6cf   :  { %v4365_v62 = vpop.f32.mrf.mxu0 }
 0x6d0   :  { %v4366_v3 = vadd.f32 %v4365_v62, %v4333_v59 }
 0x6d2   :  { %v4391_v52 = vadd.f32 %v4390_v12, %v4366_v3 }
 0x6d4   :  { %v4393_v5 = vadd.f32 %v4391_v52, %v6378_v15 }
 0x6d6   :  { %v4398_v45 = vadd.f32 %v4834_v57, %v4393_v5 }
 0x6d8   :  { %4868 = vtanh.f32 %v4398_v45 }
 0x6de   :  { %v4869_v29 = vpop.eup %4868 }
 0x6df   :  { %v4452_v31 = vand.u32 4294901760, %v4869_v29 }
 0x6e1   :  { %4558 = vmatmul.f32.vlgmr.msra.gmra.mxu1 %v4452_v31  ;;  %v4453_v55 = vsub.f32 %v4869_v29, %v4452_v31 }
 0x6e3   :  { %4612 = vmatmul.f32.vlgmr.msra.gmra.mxu2 %v4453_v55  ;;  %v4454_v19 = vand.u32 4294901760, %v4453_v55 }
 0x6e5   :  { %4651 = vmatmul.f32.vlgmr.msra.gmra.mxu3 %v4454_v19  ;;  %v4455_v43 = vsub.f32 %v4453_v55, %v4454_v19 }
 0x6e7   :  { %v4456_v10 = vand.u32 4294901760, %v4455_v43 }
 0x6e9   :  { %4457 = vmatmul.f32.vlgmr.msra.gmra.mxu0 %v4456_v10  ;;  %4757 = vmatmul.f32.vlgmr.msrb.gmra.mxu1 %v4452_v31 }
 0x6f1   :  { %4720 = vmatmul.f32.vlgmr.msrb.gmra.mxu0 %v4452_v31 }
 0x75e   :  { %v4559_v17 = vpop.f32.mrf.mxu1 }
 0x766   :  { %v4458_v15 = vpop.f32.mrf.mxu0  ;;  %v4613_v13 = vpop.f32.mrf.mxu2 }
 0x767   :  { %v4459_v58 = vadd.f32 %v4835_v24, %v4458_v15  ;;  %v4758_v18 = vpop.f32.mrf.mxu1 }
 0x768   :  { %v4652_v33 = vpop.f32.mrf.mxu3 }
 0x769   :  { %v4560_v46 = vadd.f32 %v4559_v17, %v4459_v58 }
 0x76b   :  { %v4614_v16 = vadd.f32 %v4613_v13, %v4560_v46 }
 0x76d   :  { %v4653_v6 = vadd.f32 %v4652_v33, %v4614_v16 }
 0x76e   :  { %v4721_v0 = vpop.f32.mrf.mxu0 }
 0x76f   :  { %v4722_v21 = vadd.f32 %v4721_v0, %v4653_v6 }
 0x771   :  { %v4759_v22 = vadd.f32 %v4758_v18, %v4722_v21 }
 0x773   :  { %4761 = vst [vmem:[#allocation5] sm:$0xff] %v4759_v22 }
 0x774   :  { %4772 = dma.vmem_to_hbm [thread:$0]  %s4768_s22, 128, %s4770_s25, [#allocation4]  }
 0x775   :  { %4922 = dma.done.wait [#allocation4], 128  }
 0x776   :  { %4923 = vsyncadd [#allocation4], 4294967168 }
 0x777   :  { %4777 = vsyncpa [#allocation3], 1 }
 0x778   :  { %4778 = vsyncpa [#allocation4], 1 }

</bundles_post_ra>
